<compile_context>
chip_gen: v7x
topology: tpu7x:2x2x1
jax: 0.10.0
libtpu: 0.0.40
codegen_flags: <defaults>
</compile_context>

<pallas_src>
import numpy as np
import jax
import jax.numpy as jnp
from jax.experimental import pallas as pl
from jax.experimental.pallas import tpu as pltpu

P = 128            # padded lane width of the packed gate block / output
GATE = 32          # lanes per gate block (max hidden size is 16 <= 32)
NUM_LAYERS = 6     # 3 encoder + 3 decoder LSTM layers


# ----------------------------------------------------------------------------
# Pallas kernel: whole forward pass (6 LSTM layers + bottleneck + Linear)
# ----------------------------------------------------------------------------
def lstm_autoencoder_kernel(x_ref, wih_ref, whh_ref, b_ref, wout_ref, bout_ref,
                            out_ref):
    # x_ref   : (T, BP, 32)  f32  padded time-major input (live lanes only)
    # wih_ref : (6, 32, 128) bf16 W_ih^T, gate g in lanes [32g, 32g+hid), g x2
    # whh_ref : (6, 32, 128) bf16 W_hh^T, same packing
    # b_ref   : (6, 1, 128)  f32  b_ih + b_hh, same packing
    # wout_ref: (32, 128)    bf16 W_out^T padded
    # bout_ref: (1, 128)     f32  b_out padded
    # out_ref : (T, BP, 128) f32  final output (written once)
    T, BP, _ = x_ref.shape

    def project(layer, src_flat):
        # Hoisted input projection for all T steps: (T*BP, 32) @ (32, 128).
        gx = jnp.dot(src_flat.astype(jnp.bfloat16), wih_ref[layer],
                     preferred_element_type=jnp.float32) + b_ref[layer]
        return [gx[t * BP:(t + 1) * BP] for t in range(T)]

    def recur(layer, gx_list):
        w_hh = whh_ref[layer]                           # (32, 128) bf16, once
        h = jnp.zeros((BP, GATE), jnp.float32)
        c = jnp.zeros((BP, GATE), jnp.float32)
        hs = []
        for t in range(T):                              # static unroll, T small
            gates = gx_list[t] + jnp.dot(h.astype(jnp.bfloat16), w_hh,
                                         preferred_element_type=jnp.float32)
            a = jax.nn.sigmoid(gates)                   # one EUP pass (f32)
            i = a[:, 0 * GATE:1 * GATE]
            f = a[:, 1 * GATE:2 * GATE]
            g = 2.0 * a[:, 2 * GATE:3 * GATE] - 1.0     # tanh(z) = 2*sig(2z)-1
            o = a[:, 3 * GATE:4 * GATE]
            c = f * c + i * g
            h = o * jnp.tanh(c)
            hs.append(h)                                # (BP, 32), in registers
        return hs

    def flat(h_list):
        return jnp.concatenate(h_list, axis=0)          # (T*BP, 32)

    # --- encoder (dropouts are identity in eval mode) ---
    h = recur(0, project(0, x_ref[...].reshape(T * BP, GATE)))
    h = recur(1, project(1, flat(h)))
    h = recur(2, project(2, flat(h)))

    # --- bottleneck: encoding = last timestep, repeated along time.
    # Every decoder-l1 timestep input is identical -> compute its projection
    # once and reuse the same vreg for all T steps.
    enc = h[T - 1]                                       # (BP, 32)
    gx_row = jnp.dot(enc.astype(jnp.bfloat16), wih_ref[3],
                     preferred_element_type=jnp.float32) + b_ref[3]
    h = recur(3, [gx_row] * T)

    # --- decoder layers 2, 3 ---
    h = recur(4, project(4, flat(h)))
    h = recur(5, project(5, flat(h)))

    # --- output Linear: single (T*BP, 32) @ (32, 128) matmul, one store ---
    y = jnp.dot(flat(h).astype(jnp.bfloat16), wout_ref[...],
                preferred_element_type=jnp.float32) + bout_ref[...]
    out_ref[...] = y.reshape(T, BP, P)


# ----------------------------------------------------------------------------
# Parameter construction (deterministic, PyTorch-style shapes) and packing
# ----------------------------------------------------------------------------
def layer_dims(n_features):
    return [(n_features, 16), (16, 4), (4, 1), (1, 4), (4, 8), (8, 16)]


def init_params(key, n_features):
    dims = layer_dims(n_features)
    keys = jax.random.split(key, 4 * len(dims) + 2)
    raw = []
    for l, (in_dim, hid) in enumerate(dims):
        k = 1.0 / np.sqrt(hid)
        w_ih = jax.random.uniform(keys[4 * l + 0], (4 * hid, in_dim),
                                  jnp.float32, -k, k)
        w_hh = jax.random.uniform(keys[4 * l + 1], (4 * hid, hid),
                                  jnp.float32, -k, k)
        b_ih = jax.random.uniform(keys[4 * l + 2], (4 * hid,),
                                  jnp.float32, -k, k)
        b_hh = jax.random.uniform(keys[4 * l + 3], (4 * hid,),
                                  jnp.float32, -k, k)
        raw.append((w_ih, w_hh, b_ih, b_hh))
    k = 1.0 / np.sqrt(16)
    W_out = jax.random.uniform(keys[-2], (n_features, 16), jnp.float32, -k, k)
    b_out = jax.random.uniform(keys[-1], (n_features,), jnp.float32, -k, k)
    return raw, W_out, b_out


def pad_params(raw, W_out, b_out, n_features):
    dims = layer_dims(n_features)
    assert n_features <= GATE
    wih_all = np.zeros((NUM_LAYERS, GATE, P), np.float32)
    whh_all = np.zeros((NUM_LAYERS, GATE, P), np.float32)
    b_all = np.zeros((NUM_LAYERS, 1, P), np.float32)
    for l, ((w_ih, w_hh, b_ih, b_hh), (in_dim, hid)) in enumerate(zip(raw, dims)):
        assert in_dim <= GATE and hid <= GATE
        w_ih = np.asarray(w_ih)
        w_hh = np.asarray(w_hh)
        b = np.asarray(b_ih) + np.asarray(b_hh)
        for g in range(4):   # PyTorch gate order: i, f, g, o
            scale = 2.0 if g == 2 else 1.0   # g-gate pre-scaled: tanh via sigmoid
            lo, hi = g * GATE, g * GATE + hid
            wih_all[l, :in_dim, lo:hi] = scale * w_ih[g * hid:(g + 1) * hid, :].T
            whh_all[l, :hid, lo:hi] = scale * w_hh[g * hid:(g + 1) * hid, :].T
            b_all[l, 0, lo:hi] = scale * b[g * hid:(g + 1) * hid]
    wout = np.zeros((GATE, P), np.float32)
    wout[:16, :n_features] = np.asarray(W_out).T
    bout = np.zeros((1, P), np.float32)
    bout[0, :n_features] = np.asarray(b_out)
    # Matmul operands in bf16 (MXU-native on v6e/v7x); biases stay f32 so the
    # elementwise/EUP path is f32 everywhere (v5e has no bf16 VPU/EUP).
    return (jnp.asarray(wih_all, jnp.bfloat16),
            jnp.asarray(whh_all, jnp.bfloat16),
            jnp.asarray(b_all, jnp.float32),
            jnp.asarray(wout, jnp.bfloat16),
            jnp.asarray(bout, jnp.float32))


# ----------------------------------------------------------------------------
# Wrapper around pallas_call
# ----------------------------------------------------------------------------
@jax.jit
def lstm_autoencoder_forward(x, wih_all, whh_all, b_all, wout, bout):
    B, T, F = x.shape
    BP = ((B + 7) // 8) * 8                                   # full sublane group
    x_tm = jnp.transpose(x, (1, 0, 2)).astype(jnp.float32)    # (T, B, F)
    x_pad = jnp.zeros((T, BP, GATE), jnp.float32).at[:, :B, :F].set(x_tm)
    out = pl.pallas_call(
        lstm_autoencoder_kernel,
        out_shape=jax.ShapeDtypeStruct((T, BP, P), jnp.float32),
        in_specs=[pl.BlockSpec(memory_space=pltpu.MemorySpace.VMEM)] * 6,
        out_specs=pl.BlockSpec(memory_space=pltpu.MemorySpace.VMEM),
    )(x_pad, wih_all, whh_all, b_all, wout, bout)
    return jnp.transpose(out, (1, 0, 2))[:B, :, :F]           # (B, T, F)


# ----------------------------------------------------------------------------
# NumPy float64 reference (mirrors PyTorch nn.LSTM math) for verification
# ----------------------------------------------------------------------------
def _lstm_ref(x, w_ih, w_hh, b_ih, b_hh):
    w_ih = np.asarray(w_ih, np.float64)
    w_hh = np.asarray(w_hh, np.float64)
    b = np.asarray(b_ih, np.float64) + np.asarray(b_hh, np.float64)
    B, T, _ = x.shape
    H = w_hh.shape[1]
    h = np.zeros((B, H), np.float64)
    c = np.zeros((B, H), np.float64)
    sig = lambda z: 1.0 / (1.0 + np.exp(-z))
    outs = []
    for t in range(T):
        gates = x[:, t] @ w_ih.T + h @ w_hh.T + b
        i, f, g, o = np.split(gates, 4, axis=1)
        i, f, o = sig(i), sig(f), sig(o)
        g = np.tanh(g)
        c = f * c + i * g
        h = o * np.tanh(c)
        outs.append(h)
    return np.stack(outs, axis=1)


def forward_ref(x, raw, W_out, b_out):
    h = np.asarray(x, np.float64)
    for l in range(3):
        h = _lstm_ref(h, *raw[l])
    enc = h[:, -1, :]
    h = np.repeat(enc[:, None, :], x.shape[1], axis=1)
    for l in range(3, 6):
        h = _lstm_ref(h, *raw[l])
    return h @ np.asarray(W_out, np.float64).T + np.asarray(b_out, np.float64)


# ----------------------------------------------------------------------------
if __name__ == "__main__":
    key = jax.random.PRNGKey(0)
    k_param, k_x = jax.random.split(key)

    batch, seq_len, n_features = 2, 8, 4
    raw, W_out, b_out = init_params(k_param, n_features)
    packed = pad_params(raw, W_out, b_out, n_features)

    x = jax.random.normal(k_x, (batch, seq_len, n_features), jnp.float32)

    y = lstm_autoencoder_forward(x, *packed)
    y = jax.block_until_ready(y)

    y_ref = forward_ref(np.asarray(x), raw, W_out, b_out)
    assert y.shape == (batch, seq_len, n_features)
    # bf16 matmul operands (f32 accumulation) -> looser tolerance than pure f32.
    np.testing.assert_allclose(np.asarray(y, np.float64), y_ref,
                               atol=3e-2, rtol=3e-2)
    print("KERNEL_OK")
</pallas_src>

<mosaic_0001>
module attributes {stable_mosaic.version = 11 : i64} {
  func.func @lstm_autoencoder_kernel(%arg0: memref<8x8x32xf32, #tpu.memory_space<vmem>>, %arg1: memref<6x32x128xbf16, #tpu.memory_space<vmem>>, %arg2: memref<6x32x128xbf16, #tpu.memory_space<vmem>>, %arg3: memref<6x1x128xf32, #tpu.memory_space<vmem>>, %arg4: memref<32x128xbf16, #tpu.memory_space<vmem>>, %arg5: memref<1x128xf32, #tpu.memory_space<vmem>>, %arg6: memref<8x8x128xf32, #tpu.memory_space<vmem>>) attributes {dimension_semantics = [], scalar_prefetch = 0 : i64, scratch_operands = 0 : i64, tpu.core_type = #tpu.core_type<tc>} {
    %c0 = arith.constant 0 : index
    %c0_0 = arith.constant 0 : index
    %c0_1 = arith.constant 0 : index
    %0 = vector.load %arg0[%c0, %c0_0, %c0_1] : memref<8x8x32xf32, #tpu.memory_space<vmem>>, vector<8x8x32xf32>
    %1 = vector.shape_cast %0 : vector<8x8x32xf32> to vector<64x32xf32>
    %2 = arith.truncf %1 : vector<64x32xf32> to vector<64x32xbf16>
    %c0_2 = arith.constant 0 : index
    %c0_3 = arith.constant 0 : index
    %c0_4 = arith.constant 0 : index
    %3 = vector.load %arg1[%c0_2, %c0_3, %c0_4] : memref<6x32x128xbf16, #tpu.memory_space<vmem>>, vector<1x32x128xbf16>
    %4 = vector.shape_cast %3 : vector<1x32x128xbf16> to vector<32x128xbf16>
    %cst = arith.constant dense<0.000000e+00> : vector<64x128xf32>
    %5 = tpu.matmul %2, %4, %cst {dimension_numbers = #tpu.dot_dimension_numbers<[1], [0], [0], [1], [0, 0, 1, 1], [], []>} : vector<64x32xbf16>, vector<32x128xbf16>, vector<64x128xf32> -> vector<64x128xf32>
    %c0_5 = arith.constant 0 : index
    %c0_6 = arith.constant 0 : index
    %c0_7 = arith.constant 0 : index
    %6 = vector.load %arg3[%c0_5, %c0_6, %c0_7] : memref<6x1x128xf32, #tpu.memory_space<vmem>>, vector<1x1x128xf32>
    %7 = vector.shape_cast %6 : vector<1x1x128xf32> to vector<1x128xf32>
    %8 = vector.broadcast %7 : vector<1x128xf32> to vector<64x128xf32>
    %9 = arith.addf %5, %8 : vector<64x128xf32>
    %10 = vector.extract_strided_slice %9 {offsets = [0, 0], sizes = [8, 128], strides = [1, 1]} : vector<64x128xf32> to vector<8x128xf32>
    %11 = vector.extract_strided_slice %9 {offsets = [8, 0], sizes = [8, 128], strides = [1, 1]} : vector<64x128xf32> to vector<8x128xf32>
    %12 = vector.extract_strided_slice %9 {offsets = [16, 0], sizes = [8, 128], strides = [1, 1]} : vector<64x128xf32> to vector<8x128xf32>
    %13 = vector.extract_strided_slice %9 {offsets = [24, 0], sizes = [8, 128], strides = [1, 1]} : vector<64x128xf32> to vector<8x128xf32>
    %14 = vector.extract_strided_slice %9 {offsets = [32, 0], sizes = [8, 128], strides = [1, 1]} : vector<64x128xf32> to vector<8x128xf32>
    %15 = vector.extract_strided_slice %9 {offsets = [40, 0], sizes = [8, 128], strides = [1, 1]} : vector<64x128xf32> to vector<8x128xf32>
    %16 = vector.extract_strided_slice %9 {offsets = [48, 0], sizes = [8, 128], strides = [1, 1]} : vector<64x128xf32> to vector<8x128xf32>
    %17 = vector.extract_strided_slice %9 {offsets = [56, 0], sizes = [8, 128], strides = [1, 1]} : vector<64x128xf32> to vector<8x128xf32>
    %c0_8 = arith.constant 0 : index
    %c0_9 = arith.constant 0 : index
    %c0_10 = arith.constant 0 : index
    %18 = vector.load %arg2[%c0_8, %c0_9, %c0_10] : memref<6x32x128xbf16, #tpu.memory_space<vmem>>, vector<1x32x128xbf16>
    %19 = vector.shape_cast %18 : vector<1x32x128xbf16> to vector<32x128xbf16>
    %cst_11 = arith.constant 0.000000e+00 : f32
    %20 = vector.broadcast %cst_11 : f32 to vector<8x32xf32>
    %cst_12 = arith.constant 0.000000e+00 : f32
    %21 = vector.broadcast %cst_12 : f32 to vector<8x32xf32>
    %22 = arith.truncf %20 : vector<8x32xf32> to vector<8x32xbf16>
    %cst_13 = arith.constant dense<0.000000e+00> : vector<8x128xf32>
    %23 = tpu.matmul %22, %19, %cst_13 {dimension_numbers = #tpu.dot_dimension_numbers<[1], [0], [0], [1], [0, 0, 1, 1], [], []>} : vector<8x32xbf16>, vector<32x128xbf16>, vector<8x128xf32> -> vector<8x128xf32>
    %24 = arith.addf %10, %23 : vector<8x128xf32>
    %25 = arith.negf %24 : vector<8x128xf32>
    %26 = math.exp %25 : vector<8x128xf32>
    %cst_14 = arith.constant 1.000000e+00 : f32
    %27 = vector.broadcast %cst_14 : f32 to vector<8x128xf32>
    %28 = arith.addf %27, %26 : vector<8x128xf32>
    %29 = arith.divf %27, %28 : vector<8x128xf32>
    %30 = vector.extract_strided_slice %29 {offsets = [0, 0], sizes = [8, 32], strides = [1, 1]} : vector<8x128xf32> to vector<8x32xf32>
    %31 = vector.extract_strided_slice %29 {offsets = [0, 32], sizes = [8, 32], strides = [1, 1]} : vector<8x128xf32> to vector<8x32xf32>
    %32 = vector.extract_strided_slice %29 {offsets = [0, 64], sizes = [8, 32], strides = [1, 1]} : vector<8x128xf32> to vector<8x32xf32>
    %cst_15 = arith.constant 2.000000e+00 : f32
    %33 = vector.broadcast %cst_15 : f32 to vector<8x32xf32>
    %34 = arith.mulf %33, %32 : vector<8x32xf32>
    %cst_16 = arith.constant 1.000000e+00 : f32
    %35 = vector.broadcast %cst_16 : f32 to vector<8x32xf32>
    %36 = arith.subf %34, %35 : vector<8x32xf32>
    %37 = vector.extract_strided_slice %29 {offsets = [0, 96], sizes = [8, 32], strides = [1, 1]} : vector<8x128xf32> to vector<8x32xf32>
    %38 = arith.mulf %31, %21 : vector<8x32xf32>
    %39 = arith.mulf %30, %36 : vector<8x32xf32>
    %40 = arith.addf %38, %39 : vector<8x32xf32>
    %41 = math.tanh %40 : vector<8x32xf32>
    %42 = arith.mulf %37, %41 : vector<8x32xf32>
    %43 = arith.truncf %42 : vector<8x32xf32> to vector<8x32xbf16>
    %cst_17 = arith.constant dense<0.000000e+00> : vector<8x128xf32>
    %44 = tpu.matmul %43, %19, %cst_17 {dimension_numbers = #tpu.dot_dimension_numbers<[1], [0], [0], [1], [0, 0, 1, 1], [], []>} : vector<8x32xbf16>, vector<32x128xbf16>, vector<8x128xf32> -> vector<8x128xf32>
    %45 = arith.addf %11, %44 : vector<8x128xf32>
    %46 = arith.negf %45 : vector<8x128xf32>
    %47 = math.exp %46 : vector<8x128xf32>
    %cst_18 = arith.constant 1.000000e+00 : f32
    %48 = vector.broadcast %cst_18 : f32 to vector<8x128xf32>
    %49 = arith.addf %48, %47 : vector<8x128xf32>
    %50 = arith.divf %48, %49 : vector<8x128xf32>
    %51 = vector.extract_strided_slice %50 {offsets = [0, 0], sizes = [8, 32], strides = [1, 1]} : vector<8x128xf32> to vector<8x32xf32>
    %52 = vector.extract_strided_slice %50 {offsets = [0, 32], sizes = [8, 32], strides = [1, 1]} : vector<8x128xf32> to vector<8x32xf32>
    %53 = vector.extract_strided_slice %50 {offsets = [0, 64], sizes = [8, 32], strides = [1, 1]} : vector<8x128xf32> to vector<8x32xf32>
    %cst_19 = arith.constant 2.000000e+00 : f32
    %54 = vector.broadcast %cst_19 : f32 to vector<8x32xf32>
    %55 = arith.mulf %54, %53 : vector<8x32xf32>
    %cst_20 = arith.constant 1.000000e+00 : f32
    %56 = vector.broadcast %cst_20 : f32 to vector<8x32xf32>
    %57 = arith.subf %55, %56 : vector<8x32xf32>
    %58 = vector.extract_strided_slice %50 {offsets = [0, 96], sizes = [8, 32], strides = [1, 1]} : vector<8x128xf32> to vector<8x32xf32>
    %59 = arith.mulf %52, %40 : vector<8x32xf32>
    %60 = arith.mulf %51, %57 : vector<8x32xf32>
    %61 = arith.addf %59, %60 : vector<8x32xf32>
    %62 = math.tanh %61 : vector<8x32xf32>
    %63 = arith.mulf %58, %62 : vector<8x32xf32>
    %64 = arith.truncf %63 : vector<8x32xf32> to vector<8x32xbf16>
    %cst_21 = arith.constant dense<0.000000e+00> : vector<8x128xf32>
    %65 = tpu.matmul %64, %19, %cst_21 {dimension_numbers = #tpu.dot_dimension_numbers<[1], [0], [0], [1], [0, 0, 1, 1], [], []>} : vector<8x32xbf16>, vector<32x128xbf16>, vector<8x128xf32> -> vector<8x128xf32>
    %66 = arith.addf %12, %65 : vector<8x128xf32>
    %67 = arith.negf %66 : vector<8x128xf32>
    %68 = math.exp %67 : vector<8x128xf32>
    %cst_22 = arith.constant 1.000000e+00 : f32
    %69 = vector.broadcast %cst_22 : f32 to vector<8x128xf32>
    %70 = arith.addf %69, %68 : vector<8x128xf32>
    %71 = arith.divf %69, %70 : vector<8x128xf32>
    %72 = vector.extract_strided_slice %71 {offsets = [0, 0], sizes = [8, 32], strides = [1, 1]} : vector<8x128xf32> to vector<8x32xf32>
    %73 = vector.extract_strided_slice %71 {offsets = [0, 32], sizes = [8, 32], strides = [1, 1]} : vector<8x128xf32> to vector<8x32xf32>
    %74 = vector.extract_strided_slice %71 {offsets = [0, 64], sizes = [8, 32], strides = [1, 1]} : vector<8x128xf32> to vector<8x32xf32>
    %cst_23 = arith.constant 2.000000e+00 : f32
    %75 = vector.broadcast %cst_23 : f32 to vector<8x32xf32>
    %76 = arith.mulf %75, %74 : vector<8x32xf32>
    %cst_24 = arith.constant 1.000000e+00 : f32
    %77 = vector.broadcast %cst_24 : f32 to vector<8x32xf32>
    %78 = arith.subf %76, %77 : vector<8x32xf32>
    %79 = vector.extract_strided_slice %71 {offsets = [0, 96], sizes = [8, 32], strides = [1, 1]} : vector<8x128xf32> to vector<8x32xf32>
    %80 = arith.mulf %73, %61 : vector<8x32xf32>
    %81 = arith.mulf %72, %78 : vector<8x32xf32>
    %82 = arith.addf %80, %81 : vector<8x32xf32>
    %83 = math.tanh %82 : vector<8x32xf32>
    %84 = arith.mulf %79, %83 : vector<8x32xf32>
    %85 = arith.truncf %84 : vector<8x32xf32> to vector<8x32xbf16>
    %cst_25 = arith.constant dense<0.000000e+00> : vector<8x128xf32>
    %86 = tpu.matmul %85, %19, %cst_25 {dimension_numbers = #tpu.dot_dimension_numbers<[1], [0], [0], [1], [0, 0, 1, 1], [], []>} : vector<8x32xbf16>, vector<32x128xbf16>, vector<8x128xf32> -> vector<8x128xf32>
    %87 = arith.addf %13, %86 : vector<8x128xf32>
    %88 = arith.negf %87 : vector<8x128xf32>
    %89 = math.exp %88 : vector<8x128xf32>
    %cst_26 = arith.constant 1.000000e+00 : f32
    %90 = vector.broadcast %cst_26 : f32 to vector<8x128xf32>
    %91 = arith.addf %90, %89 : vector<8x128xf32>
    %92 = arith.divf %90, %91 : vector<8x128xf32>
    %93 = vector.extract_strided_slice %92 {offsets = [0, 0], sizes = [8, 32], strides = [1, 1]} : vector<8x128xf32> to vector<8x32xf32>
    %94 = vector.extract_strided_slice %92 {offsets = [0, 32], sizes = [8, 32], strides = [1, 1]} : vector<8x128xf32> to vector<8x32xf32>
    %95 = vector.extract_strided_slice %92 {offsets = [0, 64], sizes = [8, 32], strides = [1, 1]} : vector<8x128xf32> to vector<8x32xf32>
    %cst_27 = arith.constant 2.000000e+00 : f32
    %96 = vector.broadcast %cst_27 : f32 to vector<8x32xf32>
    %97 = arith.mulf %96, %95 : vector<8x32xf32>
    %cst_28 = arith.constant 1.000000e+00 : f32
    %98 = vector.broadcast %cst_28 : f32 to vector<8x32xf32>
    %99 = arith.subf %97, %98 : vector<8x32xf32>
    %100 = vector.extract_strided_slice %92 {offsets = [0, 96], sizes = [8, 32], strides = [1, 1]} : vector<8x128xf32> to vector<8x32xf32>
    %101 = arith.mulf %94, %82 : vector<8x32xf32>
    %102 = arith.mulf %93, %99 : vector<8x32xf32>
    %103 = arith.addf %101, %102 : vector<8x32xf32>
    %104 = math.tanh %103 : vector<8x32xf32>
    %105 = arith.mulf %100, %104 : vector<8x32xf32>
    %106 = arith.truncf %105 : vector<8x32xf32> to vector<8x32xbf16>
    %cst_29 = arith.constant dense<0.000000e+00> : vector<8x128xf32>
    %107 = tpu.matmul %106, %19, %cst_29 {dimension_numbers = #tpu.dot_dimension_numbers<[1], [0], [0], [1], [0, 0, 1, 1], [], []>} : vector<8x32xbf16>, vector<32x128xbf16>, vector<8x128xf32> -> vector<8x128xf32>
    %108 = arith.addf %14, %107 : vector<8x128xf32>
    %109 = arith.negf %108 : vector<8x128xf32>
    %110 = math.exp %109 : vector<8x128xf32>
    %cst_30 = arith.constant 1.000000e+00 : f32
    %111 = vector.broadcast %cst_30 : f32 to vector<8x128xf32>
    %112 = arith.addf %111, %110 : vector<8x128xf32>
    %113 = arith.divf %111, %112 : vector<8x128xf32>
    %114 = vector.extract_strided_slice %113 {offsets = [0, 0], sizes = [8, 32], strides = [1, 1]} : vector<8x128xf32> to vector<8x32xf32>
    %115 = vector.extract_strided_slice %113 {offsets = [0, 32], sizes = [8, 32], strides = [1, 1]} : vector<8x128xf32> to vector<8x32xf32>
    %116 = vector.extract_strided_slice %113 {offsets = [0, 64], sizes = [8, 32], strides = [1, 1]} : vector<8x128xf32> to vector<8x32xf32>
    %cst_31 = arith.constant 2.000000e+00 : f32
    %117 = vector.broadcast %cst_31 : f32 to vector<8x32xf32>
    %118 = arith.mulf %117, %116 : vector<8x32xf32>
    %cst_32 = arith.constant 1.000000e+00 : f32
    %119 = vector.broadcast %cst_32 : f32 to vector<8x32xf32>
    %120 = arith.subf %118, %119 : vector<8x32xf32>
    %121 = vector.extract_strided_slice %113 {offsets = [0, 96], sizes = [8, 32], strides = [1, 1]} : vector<8x128xf32> to vector<8x32xf32>
    %122 = arith.mulf %115, %103 : vector<8x32xf32>
    %123 = arith.mulf %114, %120 : vector<8x32xf32>
    %124 = arith.addf %122, %123 : vector<8x32xf32>
    %125 = math.tanh %124 : vector<8x32xf32>
    %126 = arith.mulf %121, %125 : vector<8x32xf32>
    %127 = arith.truncf %126 : vector<8x32xf32> to vector<8x32xbf16>
    %cst_33 = arith.constant dense<0.000000e+00> : vector<8x128xf32>
    %128 = tpu.matmul %127, %19, %cst_33 {dimension_numbers = #tpu.dot_dimension_numbers<[1], [0], [0], [1], [0, 0, 1, 1], [], []>} : vector<8x32xbf16>, vector<32x128xbf16>, vector<8x128xf32> -> vector<8x128xf32>
    %129 = arith.addf %15, %128 : vector<8x128xf32>
    %130 = arith.negf %129 : vector<8x128xf32>
    %131 = math.exp %130 : vector<8x128xf32>
    %cst_34 = arith.constant 1.000000e+00 : f32
    %132 = vector.broadcast %cst_34 : f32 to vector<8x128xf32>
    %133 = arith.addf %132, %131 : vector<8x128xf32>
    %134 = arith.divf %132, %133 : vector<8x128xf32>
    %135 = vector.extract_strided_slice %134 {offsets = [0, 0], sizes = [8, 32], strides = [1, 1]} : vector<8x128xf32> to vector<8x32xf32>
    %136 = vector.extract_strided_slice %134 {offsets = [0, 32], sizes = [8, 32], strides = [1, 1]} : vector<8x128xf32> to vector<8x32xf32>
    %137 = vector.extract_strided_slice %134 {offsets = [0, 64], sizes = [8, 32], strides = [1, 1]} : vector<8x128xf32> to vector<8x32xf32>
    %cst_35 = arith.constant 2.000000e+00 : f32
    %138 = vector.broadcast %cst_35 : f32 to vector<8x32xf32>
    %139 = arith.mulf %138, %137 : vector<8x32xf32>
    %cst_36 = arith.constant 1.000000e+00 : f32
    %140 = vector.broadcast %cst_36 : f32 to vector<8x32xf32>
    %141 = arith.subf %139, %140 : vector<8x32xf32>
    %142 = vector.extract_strided_slice %134 {offsets = [0, 96], sizes = [8, 32], strides = [1, 1]} : vector<8x128xf32> to vector<8x32xf32>
    %143 = arith.mulf %136, %124 : vector<8x32xf32>
    %144 = arith.mulf %135, %141 : vector<8x32xf32>
    %145 = arith.addf %143, %144 : vector<8x32xf32>
    %146 = math.tanh %145 : vector<8x32xf32>
    %147 = arith.mulf %142, %146 : vector<8x32xf32>
    %148 = arith.truncf %147 : vector<8x32xf32> to vector<8x32xbf16>
    %cst_37 = arith.constant dense<0.000000e+00> : vector<8x128xf32>
    %149 = tpu.matmul %148, %19, %cst_37 {dimension_numbers = #tpu.dot_dimension_numbers<[1], [0], [0], [1], [0, 0, 1, 1], [], []>} : vector<8x32xbf16>, vector<32x128xbf16>, vector<8x128xf32> -> vector<8x128xf32>
    %150 = arith.addf %16, %149 : vector<8x128xf32>
    %151 = arith.negf %150 : vector<8x128xf32>
    %152 = math.exp %151 : vector<8x128xf32>
    %cst_38 = arith.constant 1.000000e+00 : f32
    %153 = vector.broadcast %cst_38 : f32 to vector<8x128xf32>
    %154 = arith.addf %153, %152 : vector<8x128xf32>
    %155 = arith.divf %153, %154 : vector<8x128xf32>
    %156 = vector.extract_strided_slice %155 {offsets = [0, 0], sizes = [8, 32], strides = [1, 1]} : vector<8x128xf32> to vector<8x32xf32>
    %157 = vector.extract_strided_slice %155 {offsets = [0, 32], sizes = [8, 32], strides = [1, 1]} : vector<8x128xf32> to vector<8x32xf32>
    %158 = vector.extract_strided_slice %155 {offsets = [0, 64], sizes = [8, 32], strides = [1, 1]} : vector<8x128xf32> to vector<8x32xf32>
    %cst_39 = arith.constant 2.000000e+00 : f32
    %159 = vector.broadcast %cst_39 : f32 to vector<8x32xf32>
    %160 = arith.mulf %159, %158 : vector<8x32xf32>
    %cst_40 = arith.constant 1.000000e+00 : f32
    %161 = vector.broadcast %cst_40 : f32 to vector<8x32xf32>
    %162 = arith.subf %160, %161 : vector<8x32xf32>
    %163 = vector.extract_strided_slice %155 {offsets = [0, 96], sizes = [8, 32], strides = [1, 1]} : vector<8x128xf32> to vector<8x32xf32>
    %164 = arith.mulf %157, %145 : vector<8x32xf32>
    %165 = arith.mulf %156, %162 : vector<8x32xf32>
    %166 = arith.addf %164, %165 : vector<8x32xf32>
    %167 = math.tanh %166 : vector<8x32xf32>
    %168 = arith.mulf %163, %167 : vector<8x32xf32>
    %169 = arith.truncf %168 : vector<8x32xf32> to vector<8x32xbf16>
    %cst_41 = arith.constant dense<0.000000e+00> : vector<8x128xf32>
    %170 = tpu.matmul %169, %19, %cst_41 {dimension_numbers = #tpu.dot_dimension_numbers<[1], [0], [0], [1], [0, 0, 1, 1], [], []>} : vector<8x32xbf16>, vector<32x128xbf16>, vector<8x128xf32> -> vector<8x128xf32>
    %171 = arith.addf %17, %170 : vector<8x128xf32>
    %172 = arith.negf %171 : vector<8x128xf32>
    %173 = math.exp %172 : vector<8x128xf32>
    %cst_42 = arith.constant 1.000000e+00 : f32
    %174 = vector.broadcast %cst_42 : f32 to vector<8x128xf32>
    %175 = arith.addf %174, %173 : vector<8x128xf32>
    %176 = arith.divf %174, %175 : vector<8x128xf32>
    %177 = vector.extract_strided_slice %176 {offsets = [0, 0], sizes = [8, 32], strides = [1, 1]} : vector<8x128xf32> to vector<8x32xf32>
    %178 = vector.extract_strided_slice %176 {offsets = [0, 32], sizes = [8, 32], strides = [1, 1]} : vector<8x128xf32> to vector<8x32xf32>
    %179 = vector.extract_strided_slice %176 {offsets = [0, 64], sizes = [8, 32], strides = [1, 1]} : vector<8x128xf32> to vector<8x32xf32>
    %cst_43 = arith.constant 2.000000e+00 : f32
    %180 = vector.broadcast %cst_43 : f32 to vector<8x32xf32>
    %181 = arith.mulf %180, %179 : vector<8x32xf32>
    %cst_44 = arith.constant 1.000000e+00 : f32
    %182 = vector.broadcast %cst_44 : f32 to vector<8x32xf32>
    %183 = arith.subf %181, %182 : vector<8x32xf32>
    %184 = vector.extract_strided_slice %176 {offsets = [0, 96], sizes = [8, 32], strides = [1, 1]} : vector<8x128xf32> to vector<8x32xf32>
    %185 = arith.mulf %178, %166 : vector<8x32xf32>
    %186 = arith.mulf %177, %183 : vector<8x32xf32>
    %187 = arith.addf %185, %186 : vector<8x32xf32>
    %188 = math.tanh %187 : vector<8x32xf32>
    %189 = arith.mulf %184, %188 : vector<8x32xf32>
    %190 = tpu.concatenate %42, %63, %84, %105, %126, %147, %168, %189 in 0 : vector<8x32xf32>, vector<8x32xf32>, vector<8x32xf32>, vector<8x32xf32>, vector<8x32xf32>, vector<8x32xf32>, vector<8x32xf32>, vector<8x32xf32> -> vector<64x32xf32>
    %191 = arith.truncf %190 : vector<64x32xf32> to vector<64x32xbf16>
    %c1 = arith.constant 1 : index
    %c0_45 = arith.constant 0 : index
    %c0_46 = arith.constant 0 : index
    %192 = vector.load %arg1[%c1, %c0_45, %c0_46] : memref<6x32x128xbf16, #tpu.memory_space<vmem>>, vector<1x32x128xbf16>
    %193 = vector.shape_cast %192 : vector<1x32x128xbf16> to vector<32x128xbf16>
    %cst_47 = arith.constant dense<0.000000e+00> : vector<64x128xf32>
    %194 = tpu.matmul %191, %193, %cst_47 {dimension_numbers = #tpu.dot_dimension_numbers<[1], [0], [0], [1], [0, 0, 1, 1], [], []>} : vector<64x32xbf16>, vector<32x128xbf16>, vector<64x128xf32> -> vector<64x128xf32>
    %c1_48 = arith.constant 1 : index
    %c0_49 = arith.constant 0 : index
    %c0_50 = arith.constant 0 : index
    %195 = vector.load %arg3[%c1_48, %c0_49, %c0_50] : memref<6x1x128xf32, #tpu.memory_space<vmem>>, vector<1x1x128xf32>
    %196 = vector.shape_cast %195 : vector<1x1x128xf32> to vector<1x128xf32>
    %197 = vector.broadcast %196 : vector<1x128xf32> to vector<64x128xf32>
    %198 = arith.addf %194, %197 : vector<64x128xf32>
    %199 = vector.extract_strided_slice %198 {offsets = [0, 0], sizes = [8, 128], strides = [1, 1]} : vector<64x128xf32> to vector<8x128xf32>
    %200 = vector.extract_strided_slice %198 {offsets = [8, 0], sizes = [8, 128], strides = [1, 1]} : vector<64x128xf32> to vector<8x128xf32>
    %201 = vector.extract_strided_slice %198 {offsets = [16, 0], sizes = [8, 128], strides = [1, 1]} : vector<64x128xf32> to vector<8x128xf32>
    %202 = vector.extract_strided_slice %198 {offsets = [24, 0], sizes = [8, 128], strides = [1, 1]} : vector<64x128xf32> to vector<8x128xf32>
    %203 = vector.extract_strided_slice %198 {offsets = [32, 0], sizes = [8, 128], strides = [1, 1]} : vector<64x128xf32> to vector<8x128xf32>
    %204 = vector.extract_strided_slice %198 {offsets = [40, 0], sizes = [8, 128], strides = [1, 1]} : vector<64x128xf32> to vector<8x128xf32>
    %205 = vector.extract_strided_slice %198 {offsets = [48, 0], sizes = [8, 128], strides = [1, 1]} : vector<64x128xf32> to vector<8x128xf32>
    %206 = vector.extract_strided_slice %198 {offsets = [56, 0], sizes = [8, 128], strides = [1, 1]} : vector<64x128xf32> to vector<8x128xf32>
    %c1_51 = arith.constant 1 : index
    %c0_52 = arith.constant 0 : index
    %c0_53 = arith.constant 0 : index
    %207 = vector.load %arg2[%c1_51, %c0_52, %c0_53] : memref<6x32x128xbf16, #tpu.memory_space<vmem>>, vector<1x32x128xbf16>
    %208 = vector.shape_cast %207 : vector<1x32x128xbf16> to vector<32x128xbf16>
    %cst_54 = arith.constant 0.000000e+00 : f32
    %209 = vector.broadcast %cst_54 : f32 to vector<8x32xf32>
    %cst_55 = arith.constant 0.000000e+00 : f32
    %210 = vector.broadcast %cst_55 : f32 to vector<8x32xf32>
    %211 = arith.truncf %209 : vector<8x32xf32> to vector<8x32xbf16>
    %cst_56 = arith.constant dense<0.000000e+00> : vector<8x128xf32>
    %212 = tpu.matmul %211, %208, %cst_56 {dimension_numbers = #tpu.dot_dimension_numbers<[1], [0], [0], [1], [0, 0, 1, 1], [], []>} : vector<8x32xbf16>, vector<32x128xbf16>, vector<8x128xf32> -> vector<8x128xf32>
    %213 = arith.addf %199, %212 : vector<8x128xf32>
    %214 = arith.negf %213 : vector<8x128xf32>
    %215 = math.exp %214 : vector<8x128xf32>
    %cst_57 = arith.constant 1.000000e+00 : f32
    %216 = vector.broadcast %cst_57 : f32 to vector<8x128xf32>
    %217 = arith.addf %216, %215 : vector<8x128xf32>
    %218 = arith.divf %216, %217 : vector<8x128xf32>
    %219 = vector.extract_strided_slice %218 {offsets = [0, 0], sizes = [8, 32], strides = [1, 1]} : vector<8x128xf32> to vector<8x32xf32>
    %220 = vector.extract_strided_slice %218 {offsets = [0, 32], sizes = [8, 32], strides = [1, 1]} : vector<8x128xf32> to vector<8x32xf32>
    %221 = vector.extract_strided_slice %218 {offsets = [0, 64], sizes = [8, 32], strides = [1, 1]} : vector<8x128xf32> to vector<8x32xf32>
    %cst_58 = arith.constant 2.000000e+00 : f32
    %222 = vector.broadcast %cst_58 : f32 to vector<8x32xf32>
    %223 = arith.mulf %222, %221 : vector<8x32xf32>
    %cst_59 = arith.constant 1.000000e+00 : f32
    %224 = vector.broadcast %cst_59 : f32 to vector<8x32xf32>
    %225 = arith.subf %223, %224 : vector<8x32xf32>
    %226 = vector.extract_strided_slice %218 {offsets = [0, 96], sizes = [8, 32], strides = [1, 1]} : vector<8x128xf32> to vector<8x32xf32>
    %227 = arith.mulf %220, %210 : vector<8x32xf32>
    %228 = arith.mulf %219, %225 : vector<8x32xf32>
    %229 = arith.addf %227, %228 : vector<8x32xf32>
    %230 = math.tanh %229 : vector<8x32xf32>
    %231 = arith.mulf %226, %230 : vector<8x32xf32>
    %232 = arith.truncf %231 : vector<8x32xf32> to vector<8x32xbf16>
    %cst_60 = arith.constant dense<0.000000e+00> : vector<8x128xf32>
    %233 = tpu.matmul %232, %208, %cst_60 {dimension_numbers = #tpu.dot_dimension_numbers<[1], [0], [0], [1], [0, 0, 1, 1], [], []>} : vector<8x32xbf16>, vector<32x128xbf16>, vector<8x128xf32> -> vector<8x128xf32>
    %234 = arith.addf %200, %233 : vector<8x128xf32>
    %235 = arith.negf %234 : vector<8x128xf32>
    %236 = math.exp %235 : vector<8x128xf32>
    %cst_61 = arith.constant 1.000000e+00 : f32
    %237 = vector.broadcast %cst_61 : f32 to vector<8x128xf32>
    %238 = arith.addf %237, %236 : vector<8x128xf32>
    %239 = arith.divf %237, %238 : vector<8x128xf32>
    %240 = vector.extract_strided_slice %239 {offsets = [0, 0], sizes = [8, 32], strides = [1, 1]} : vector<8x128xf32> to vector<8x32xf32>
    %241 = vector.extract_strided_slice %239 {offsets = [0, 32], sizes = [8, 32], strides = [1, 1]} : vector<8x128xf32> to vector<8x32xf32>
    %242 = vector.extract_strided_slice %239 {offsets = [0, 64], sizes = [8, 32], strides = [1, 1]} : vector<8x128xf32> to vector<8x32xf32>
    %cst_62 = arith.constant 2.000000e+00 : f32
    %243 = vector.broadcast %cst_62 : f32 to vector<8x32xf32>
    %244 = arith.mulf %243, %242 : vector<8x32xf32>
    %cst_63 = arith.constant 1.000000e+00 : f32
    %245 = vector.broadcast %cst_63 : f32 to vector<8x32xf32>
    %246 = arith.subf %244, %245 : vector<8x32xf32>
    %247 = vector.extract_strided_slice %239 {offsets = [0, 96], sizes = [8, 32], strides = [1, 1]} : vector<8x128xf32> to vector<8x32xf32>
    %248 = arith.mulf %241, %229 : vector<8x32xf32>
    %249 = arith.mulf %240, %246 : vector<8x32xf32>
    %250 = arith.addf %248, %249 : vector<8x32xf32>
    %251 = math.tanh %250 : vector<8x32xf32>
    %252 = arith.mulf %247, %251 : vector<8x32xf32>
    %253 = arith.truncf %252 : vector<8x32xf32> to vector<8x32xbf16>
    %cst_64 = arith.constant dense<0.000000e+00> : vector<8x128xf32>
    %254 = tpu.matmul %253, %208, %cst_64 {dimension_numbers = #tpu.dot_dimension_numbers<[1], [0], [0], [1], [0, 0, 1, 1], [], []>} : vector<8x32xbf16>, vector<32x128xbf16>, vector<8x128xf32> -> vector<8x128xf32>
    %255 = arith.addf %201, %254 : vector<8x128xf32>
    %256 = arith.negf %255 : vector<8x128xf32>
    %257 = math.exp %256 : vector<8x128xf32>
    %cst_65 = arith.constant 1.000000e+00 : f32
    %258 = vector.broadcast %cst_65 : f32 to vector<8x128xf32>
    %259 = arith.addf %258, %257 : vector<8x128xf32>
    %260 = arith.divf %258, %259 : vector<8x128xf32>
    %261 = vector.extract_strided_slice %260 {offsets = [0, 0], sizes = [8, 32], strides = [1, 1]} : vector<8x128xf32> to vector<8x32xf32>
    %262 = vector.extract_strided_slice %260 {offsets = [0, 32], sizes = [8, 32], strides = [1, 1]} : vector<8x128xf32> to vector<8x32xf32>
    %263 = vector.extract_strided_slice %260 {offsets = [0, 64], sizes = [8, 32], strides = [1, 1]} : vector<8x128xf32> to vector<8x32xf32>
    %cst_66 = arith.constant 2.000000e+00 : f32
    %264 = vector.broadcast %cst_66 : f32 to vector<8x32xf32>
    %265 = arith.mulf %264, %263 : vector<8x32xf32>
    %cst_67 = arith.constant 1.000000e+00 : f32
    %266 = vector.broadcast %cst_67 : f32 to vector<8x32xf32>
    %267 = arith.subf %265, %266 : vector<8x32xf32>
    %268 = vector.extract_strided_slice %260 {offsets = [0, 96], sizes = [8, 32], strides = [1, 1]} : vector<8x128xf32> to vector<8x32xf32>
    %269 = arith.mulf %262, %250 : vector<8x32xf32>
    %270 = arith.mulf %261, %267 : vector<8x32xf32>
    %271 = arith.addf %269, %270 : vector<8x32xf32>
    %272 = math.tanh %271 : vector<8x32xf32>
    %273 = arith.mulf %268, %272 : vector<8x32xf32>
    %274 = arith.truncf %273 : vector<8x32xf32> to vector<8x32xbf16>
    %cst_68 = arith.constant dense<0.000000e+00> : vector<8x128xf32>
    %275 = tpu.matmul %274, %208, %cst_68 {dimension_numbers = #tpu.dot_dimension_numbers<[1], [0], [0], [1], [0, 0, 1, 1], [], []>} : vector<8x32xbf16>, vector<32x128xbf16>, vector<8x128xf32> -> vector<8x128xf32>
    %276 = arith.addf %202, %275 : vector<8x128xf32>
    %277 = arith.negf %276 : vector<8x128xf32>
    %278 = math.exp %277 : vector<8x128xf32>
    %cst_69 = arith.constant 1.000000e+00 : f32
    %279 = vector.broadcast %cst_69 : f32 to vector<8x128xf32>
    %280 = arith.addf %279, %278 : vector<8x128xf32>
    %281 = arith.divf %279, %280 : vector<8x128xf32>
    %282 = vector.extract_strided_slice %281 {offsets = [0, 0], sizes = [8, 32], strides = [1, 1]} : vector<8x128xf32> to vector<8x32xf32>
    %283 = vector.extract_strided_slice %281 {offsets = [0, 32], sizes = [8, 32], strides = [1, 1]} : vector<8x128xf32> to vector<8x32xf32>
    %284 = vector.extract_strided_slice %281 {offsets = [0, 64], sizes = [8, 32], strides = [1, 1]} : vector<8x128xf32> to vector<8x32xf32>
    %cst_70 = arith.constant 2.000000e+00 : f32
    %285 = vector.broadcast %cst_70 : f32 to vector<8x32xf32>
    %286 = arith.mulf %285, %284 : vector<8x32xf32>
    %cst_71 = arith.constant 1.000000e+00 : f32
    %287 = vector.broadcast %cst_71 : f32 to vector<8x32xf32>
    %288 = arith.subf %286, %287 : vector<8x32xf32>
    %289 = vector.extract_strided_slice %281 {offsets = [0, 96], sizes = [8, 32], strides = [1, 1]} : vector<8x128xf32> to vector<8x32xf32>
    %290 = arith.mulf %283, %271 : vector<8x32xf32>
    %291 = arith.mulf %282, %288 : vector<8x32xf32>
    %292 = arith.addf %290, %291 : vector<8x32xf32>
    %293 = math.tanh %292 : vector<8x32xf32>
    %294 = arith.mulf %289, %293 : vector<8x32xf32>
    %295 = arith.truncf %294 : vector<8x32xf32> to vector<8x32xbf16>
    %cst_72 = arith.constant dense<0.000000e+00> : vector<8x128xf32>
    %296 = tpu.matmul %295, %208, %cst_72 {dimension_numbers = #tpu.dot_dimension_numbers<[1], [0], [0], [1], [0, 0, 1, 1], [], []>} : vector<8x32xbf16>, vector<32x128xbf16>, vector<8x128xf32> -> vector<8x128xf32>
    %297 = arith.addf %203, %296 : vector<8x128xf32>
    %298 = arith.negf %297 : vector<8x128xf32>
    %299 = math.exp %298 : vector<8x128xf32>
    %cst_73 = arith.constant 1.000000e+00 : f32
    %300 = vector.broadcast %cst_73 : f32 to vector<8x128xf32>
    %301 = arith.addf %300, %299 : vector<8x128xf32>
    %302 = arith.divf %300, %301 : vector<8x128xf32>
    %303 = vector.extract_strided_slice %302 {offsets = [0, 0], sizes = [8, 32], strides = [1, 1]} : vector<8x128xf32> to vector<8x32xf32>
    %304 = vector.extract_strided_slice %302 {offsets = [0, 32], sizes = [8, 32], strides = [1, 1]} : vector<8x128xf32> to vector<8x32xf32>
    %305 = vector.extract_strided_slice %302 {offsets = [0, 64], sizes = [8, 32], strides = [1, 1]} : vector<8x128xf32> to vector<8x32xf32>
    %cst_74 = arith.constant 2.000000e+00 : f32
    %306 = vector.broadcast %cst_74 : f32 to vector<8x32xf32>
    %307 = arith.mulf %306, %305 : vector<8x32xf32>
    %cst_75 = arith.constant 1.000000e+00 : f32
    %308 = vector.broadcast %cst_75 : f32 to vector<8x32xf32>
    %309 = arith.subf %307, %308 : vector<8x32xf32>
    %310 = vector.extract_strided_slice %302 {offsets = [0, 96], sizes = [8, 32], strides = [1, 1]} : vector<8x128xf32> to vector<8x32xf32>
    %311 = arith.mulf %304, %292 : vector<8x32xf32>
    %312 = arith.mulf %303, %309 : vector<8x32xf32>
    %313 = arith.addf %311, %312 : vector<8x32xf32>
    %314 = math.tanh %313 : vector<8x32xf32>
    %315 = arith.mulf %310, %314 : vector<8x32xf32>
    %316 = arith.truncf %315 : vector<8x32xf32> to vector<8x32xbf16>
    %cst_76 = arith.constant dense<0.000000e+00> : vector<8x128xf32>
    %317 = tpu.matmul %316, %208, %cst_76 {dimension_numbers = #tpu.dot_dimension_numbers<[1], [0], [0], [1], [0, 0, 1, 1], [], []>} : vector<8x32xbf16>, vector<32x128xbf16>, vector<8x128xf32> -> vector<8x128xf32>
    %318 = arith.addf %204, %317 : vector<8x128xf32>
    %319 = arith.negf %318 : vector<8x128xf32>
    %320 = math.exp %319 : vector<8x128xf32>
    %cst_77 = arith.constant 1.000000e+00 : f32
    %321 = vector.broadcast %cst_77 : f32 to vector<8x128xf32>
    %322 = arith.addf %321, %320 : vector<8x128xf32>
    %323 = arith.divf %321, %322 : vector<8x128xf32>
    %324 = vector.extract_strided_slice %323 {offsets = [0, 0], sizes = [8, 32], strides = [1, 1]} : vector<8x128xf32> to vector<8x32xf32>
    %325 = vector.extract_strided_slice %323 {offsets = [0, 32], sizes = [8, 32], strides = [1, 1]} : vector<8x128xf32> to vector<8x32xf32>
    %326 = vector.extract_strided_slice %323 {offsets = [0, 64], sizes = [8, 32], strides = [1, 1]} : vector<8x128xf32> to vector<8x32xf32>
    %cst_78 = arith.constant 2.000000e+00 : f32
    %327 = vector.broadcast %cst_78 : f32 to vector<8x32xf32>
    %328 = arith.mulf %327, %326 : vector<8x32xf32>
    %cst_79 = arith.constant 1.000000e+00 : f32
    %329 = vector.broadcast %cst_79 : f32 to vector<8x32xf32>
    %330 = arith.subf %328, %329 : vector<8x32xf32>
    %331 = vector.extract_strided_slice %323 {offsets = [0, 96], sizes = [8, 32], strides = [1, 1]} : vector<8x128xf32> to vector<8x32xf32>
    %332 = arith.mulf %325, %313 : vector<8x32xf32>
    %333 = arith.mulf %324, %330 : vector<8x32xf32>
    %334 = arith.addf %332, %333 : vector<8x32xf32>
    %335 = math.tanh %334 : vector<8x32xf32>
    %336 = arith.mulf %331, %335 : vector<8x32xf32>
    %337 = arith.truncf %336 : vector<8x32xf32> to vector<8x32xbf16>
    %cst_80 = arith.constant dense<0.000000e+00> : vector<8x128xf32>
    %338 = tpu.matmul %337, %208, %cst_80 {dimension_numbers = #tpu.dot_dimension_numbers<[1], [0], [0], [1], [0, 0, 1, 1], [], []>} : vector<8x32xbf16>, vector<32x128xbf16>, vector<8x128xf32> -> vector<8x128xf32>
    %339 = arith.addf %205, %338 : vector<8x128xf32>
    %340 = arith.negf %339 : vector<8x128xf32>
    %341 = math.exp %340 : vector<8x128xf32>
    %cst_81 = arith.constant 1.000000e+00 : f32
    %342 = vector.broadcast %cst_81 : f32 to vector<8x128xf32>
    %343 = arith.addf %342, %341 : vector<8x128xf32>
    %344 = arith.divf %342, %343 : vector<8x128xf32>
    %345 = vector.extract_strided_slice %344 {offsets = [0, 0], sizes = [8, 32], strides = [1, 1]} : vector<8x128xf32> to vector<8x32xf32>
    %346 = vector.extract_strided_slice %344 {offsets = [0, 32], sizes = [8, 32], strides = [1, 1]} : vector<8x128xf32> to vector<8x32xf32>
    %347 = vector.extract_strided_slice %344 {offsets = [0, 64], sizes = [8, 32], strides = [1, 1]} : vector<8x128xf32> to vector<8x32xf32>
    %cst_82 = arith.constant 2.000000e+00 : f32
    %348 = vector.broadcast %cst_82 : f32 to vector<8x32xf32>
    %349 = arith.mulf %348, %347 : vector<8x32xf32>
    %cst_83 = arith.constant 1.000000e+00 : f32
    %350 = vector.broadcast %cst_83 : f32 to vector<8x32xf32>
    %351 = arith.subf %349, %350 : vector<8x32xf32>
    %352 = vector.extract_strided_slice %344 {offsets = [0, 96], sizes = [8, 32], strides = [1, 1]} : vector<8x128xf32> to vector<8x32xf32>
    %353 = arith.mulf %346, %334 : vector<8x32xf32>
    %354 = arith.mulf %345, %351 : vector<8x32xf32>
    %355 = arith.addf %353, %354 : vector<8x32xf32>
    %356 = math.tanh %355 : vector<8x32xf32>
    %357 = arith.mulf %352, %356 : vector<8x32xf32>
    %358 = arith.truncf %357 : vector<8x32xf32> to vector<8x32xbf16>
    %cst_84 = arith.constant dense<0.000000e+00> : vector<8x128xf32>
    %359 = tpu.matmul %358, %208, %cst_84 {dimension_numbers = #tpu.dot_dimension_numbers<[1], [0], [0], [1], [0, 0, 1, 1], [], []>} : vector<8x32xbf16>, vector<32x128xbf16>, vector<8x128xf32> -> vector<8x128xf32>
    %360 = arith.addf %206, %359 : vector<8x128xf32>
    %361 = arith.negf %360 : vector<8x128xf32>
    %362 = math.exp %361 : vector<8x128xf32>
    %cst_85 = arith.constant 1.000000e+00 : f32
    %363 = vector.broadcast %cst_85 : f32 to vector<8x128xf32>
    %364 = arith.addf %363, %362 : vector<8x128xf32>
    %365 = arith.divf %363, %364 : vector<8x128xf32>
    %366 = vector.extract_strided_slice %365 {offsets = [0, 0], sizes = [8, 32], strides = [1, 1]} : vector<8x128xf32> to vector<8x32xf32>
    %367 = vector.extract_strided_slice %365 {offsets = [0, 32], sizes = [8, 32], strides = [1, 1]} : vector<8x128xf32> to vector<8x32xf32>
    %368 = vector.extract_strided_slice %365 {offsets = [0, 64], sizes = [8, 32], strides = [1, 1]} : vector<8x128xf32> to vector<8x32xf32>
    %cst_86 = arith.constant 2.000000e+00 : f32
    %369 = vector.broadcast %cst_86 : f32 to vector<8x32xf32>
    %370 = arith.mulf %369, %368 : vector<8x32xf32>
    %cst_87 = arith.constant 1.000000e+00 : f32
    %371 = vector.broadcast %cst_87 : f32 to vector<8x32xf32>
    %372 = arith.subf %370, %371 : vector<8x32xf32>
    %373 = vector.extract_strided_slice %365 {offsets = [0, 96], sizes = [8, 32], strides = [1, 1]} : vector<8x128xf32> to vector<8x32xf32>
    %374 = arith.mulf %367, %355 : vector<8x32xf32>
    %375 = arith.mulf %366, %372 : vector<8x32xf32>
    %376 = arith.addf %374, %375 : vector<8x32xf32>
    %377 = math.tanh %376 : vector<8x32xf32>
    %378 = arith.mulf %373, %377 : vector<8x32xf32>
    %379 = tpu.concatenate %231, %252, %273, %294, %315, %336, %357, %378 in 0 : vector<8x32xf32>, vector<8x32xf32>, vector<8x32xf32>, vector<8x32xf32>, vector<8x32xf32>, vector<8x32xf32>, vector<8x32xf32>, vector<8x32xf32> -> vector<64x32xf32>
    %380 = arith.truncf %379 : vector<64x32xf32> to vector<64x32xbf16>
    %c2 = arith.constant 2 : index
    %c0_88 = arith.constant 0 : index
    %c0_89 = arith.constant 0 : index
    %381 = vector.load %arg1[%c2, %c0_88, %c0_89] : memref<6x32x128xbf16, #tpu.memory_space<vmem>>, vector<1x32x128xbf16>
    %382 = vector.shape_cast %381 : vector<1x32x128xbf16> to vector<32x128xbf16>
    %cst_90 = arith.constant dense<0.000000e+00> : vector<64x128xf32>
    %383 = tpu.matmul %380, %382, %cst_90 {dimension_numbers = #tpu.dot_dimension_numbers<[1], [0], [0], [1], [0, 0, 1, 1], [], []>} : vector<64x32xbf16>, vector<32x128xbf16>, vector<64x128xf32> -> vector<64x128xf32>
    %c2_91 = arith.constant 2 : index
    %c0_92 = arith.constant 0 : index
    %c0_93 = arith.constant 0 : index
    %384 = vector.load %arg3[%c2_91, %c0_92, %c0_93] : memref<6x1x128xf32, #tpu.memory_space<vmem>>, vector<1x1x128xf32>
    %385 = vector.shape_cast %384 : vector<1x1x128xf32> to vector<1x128xf32>
    %386 = vector.broadcast %385 : vector<1x128xf32> to vector<64x128xf32>
    %387 = arith.addf %383, %386 : vector<64x128xf32>
    %388 = vector.extract_strided_slice %387 {offsets = [0, 0], sizes = [8, 128], strides = [1, 1]} : vector<64x128xf32> to vector<8x128xf32>
    %389 = vector.extract_strided_slice %387 {offsets = [8, 0], sizes = [8, 128], strides = [1, 1]} : vector<64x128xf32> to vector<8x128xf32>
    %390 = vector.extract_strided_slice %387 {offsets = [16, 0], sizes = [8, 128], strides = [1, 1]} : vector<64x128xf32> to vector<8x128xf32>
    %391 = vector.extract_strided_slice %387 {offsets = [24, 0], sizes = [8, 128], strides = [1, 1]} : vector<64x128xf32> to vector<8x128xf32>
    %392 = vector.extract_strided_slice %387 {offsets = [32, 0], sizes = [8, 128], strides = [1, 1]} : vector<64x128xf32> to vector<8x128xf32>
    %393 = vector.extract_strided_slice %387 {offsets = [40, 0], sizes = [8, 128], strides = [1, 1]} : vector<64x128xf32> to vector<8x128xf32>
    %394 = vector.extract_strided_slice %387 {offsets = [48, 0], sizes = [8, 128], strides = [1, 1]} : vector<64x128xf32> to vector<8x128xf32>
    %395 = vector.extract_strided_slice %387 {offsets = [56, 0], sizes = [8, 128], strides = [1, 1]} : vector<64x128xf32> to vector<8x128xf32>
    %c2_94 = arith.constant 2 : index
    %c0_95 = arith.constant 0 : index
    %c0_96 = arith.constant 0 : index
    %396 = vector.load %arg2[%c2_94, %c0_95, %c0_96] : memref<6x32x128xbf16, #tpu.memory_space<vmem>>, vector<1x32x128xbf16>
    %397 = vector.shape_cast %396 : vector<1x32x128xbf16> to vector<32x128xbf16>
    %cst_97 = arith.constant 0.000000e+00 : f32
    %398 = vector.broadcast %cst_97 : f32 to vector<8x32xf32>
    %cst_98 = arith.constant 0.000000e+00 : f32
    %399 = vector.broadcast %cst_98 : f32 to vector<8x32xf32>
    %400 = arith.truncf %398 : vector<8x32xf32> to vector<8x32xbf16>
    %cst_99 = arith.constant dense<0.000000e+00> : vector<8x128xf32>
    %401 = tpu.matmul %400, %397, %cst_99 {dimension_numbers = #tpu.dot_dimension_numbers<[1], [0], [0], [1], [0, 0, 1, 1], [], []>} : vector<8x32xbf16>, vector<32x128xbf16>, vector<8x128xf32> -> vector<8x128xf32>
    %402 = arith.addf %388, %401 : vector<8x128xf32>
    %403 = arith.negf %402 : vector<8x128xf32>
    %404 = math.exp %403 : vector<8x128xf32>
    %cst_100 = arith.constant 1.000000e+00 : f32
    %405 = vector.broadcast %cst_100 : f32 to vector<8x128xf32>
    %406 = arith.addf %405, %404 : vector<8x128xf32>
    %407 = arith.divf %405, %406 : vector<8x128xf32>
    %408 = vector.extract_strided_slice %407 {offsets = [0, 0], sizes = [8, 32], strides = [1, 1]} : vector<8x128xf32> to vector<8x32xf32>
    %409 = vector.extract_strided_slice %407 {offsets = [0, 32], sizes = [8, 32], strides = [1, 1]} : vector<8x128xf32> to vector<8x32xf32>
    %410 = vector.extract_strided_slice %407 {offsets = [0, 64], sizes = [8, 32], strides = [1, 1]} : vector<8x128xf32> to vector<8x32xf32>
    %cst_101 = arith.constant 2.000000e+00 : f32
    %411 = vector.broadcast %cst_101 : f32 to vector<8x32xf32>
    %412 = arith.mulf %411, %410 : vector<8x32xf32>
    %cst_102 = arith.constant 1.000000e+00 : f32
    %413 = vector.broadcast %cst_102 : f32 to vector<8x32xf32>
    %414 = arith.subf %412, %413 : vector<8x32xf32>
    %415 = vector.extract_strided_slice %407 {offsets = [0, 96], sizes = [8, 32], strides = [1, 1]} : vector<8x128xf32> to vector<8x32xf32>
    %416 = arith.mulf %409, %399 : vector<8x32xf32>
    %417 = arith.mulf %408, %414 : vector<8x32xf32>
    %418 = arith.addf %416, %417 : vector<8x32xf32>
    %419 = math.tanh %418 : vector<8x32xf32>
    %420 = arith.mulf %415, %419 : vector<8x32xf32>
    %421 = arith.truncf %420 : vector<8x32xf32> to vector<8x32xbf16>
    %cst_103 = arith.constant dense<0.000000e+00> : vector<8x128xf32>
    %422 = tpu.matmul %421, %397, %cst_103 {dimension_numbers = #tpu.dot_dimension_numbers<[1], [0], [0], [1], [0, 0, 1, 1], [], []>} : vector<8x32xbf16>, vector<32x128xbf16>, vector<8x128xf32> -> vector<8x128xf32>
    %423 = arith.addf %389, %422 : vector<8x128xf32>
    %424 = arith.negf %423 : vector<8x128xf32>
    %425 = math.exp %424 : vector<8x128xf32>
    %cst_104 = arith.constant 1.000000e+00 : f32
    %426 = vector.broadcast %cst_104 : f32 to vector<8x128xf32>
    %427 = arith.addf %426, %425 : vector<8x128xf32>
    %428 = arith.divf %426, %427 : vector<8x128xf32>
    %429 = vector.extract_strided_slice %428 {offsets = [0, 0], sizes = [8, 32], strides = [1, 1]} : vector<8x128xf32> to vector<8x32xf32>
    %430 = vector.extract_strided_slice %428 {offsets = [0, 32], sizes = [8, 32], strides = [1, 1]} : vector<8x128xf32> to vector<8x32xf32>
    %431 = vector.extract_strided_slice %428 {offsets = [0, 64], sizes = [8, 32], strides = [1, 1]} : vector<8x128xf32> to vector<8x32xf32>
    %cst_105 = arith.constant 2.000000e+00 : f32
    %432 = vector.broadcast %cst_105 : f32 to vector<8x32xf32>
    %433 = arith.mulf %432, %431 : vector<8x32xf32>
    %cst_106 = arith.constant 1.000000e+00 : f32
    %434 = vector.broadcast %cst_106 : f32 to vector<8x32xf32>
    %435 = arith.subf %433, %434 : vector<8x32xf32>
    %436 = vector.extract_strided_slice %428 {offsets = [0, 96], sizes = [8, 32], strides = [1, 1]} : vector<8x128xf32> to vector<8x32xf32>
    %437 = arith.mulf %430, %418 : vector<8x32xf32>
    %438 = arith.mulf %429, %435 : vector<8x32xf32>
    %439 = arith.addf %437, %438 : vector<8x32xf32>
    %440 = math.tanh %439 : vector<8x32xf32>
    %441 = arith.mulf %436, %440 : vector<8x32xf32>
    %442 = arith.truncf %441 : vector<8x32xf32> to vector<8x32xbf16>
    %cst_107 = arith.constant dense<0.000000e+00> : vector<8x128xf32>
    %443 = tpu.matmul %442, %397, %cst_107 {dimension_numbers = #tpu.dot_dimension_numbers<[1], [0], [0], [1], [0, 0, 1, 1], [], []>} : vector<8x32xbf16>, vector<32x128xbf16>, vector<8x128xf32> -> vector<8x128xf32>
    %444 = arith.addf %390, %443 : vector<8x128xf32>
    %445 = arith.negf %444 : vector<8x128xf32>
    %446 = math.exp %445 : vector<8x128xf32>
    %cst_108 = arith.constant 1.000000e+00 : f32
    %447 = vector.broadcast %cst_108 : f32 to vector<8x128xf32>
    %448 = arith.addf %447, %446 : vector<8x128xf32>
    %449 = arith.divf %447, %448 : vector<8x128xf32>
    %450 = vector.extract_strided_slice %449 {offsets = [0, 0], sizes = [8, 32], strides = [1, 1]} : vector<8x128xf32> to vector<8x32xf32>
    %451 = vector.extract_strided_slice %449 {offsets = [0, 32], sizes = [8, 32], strides = [1, 1]} : vector<8x128xf32> to vector<8x32xf32>
    %452 = vector.extract_strided_slice %449 {offsets = [0, 64], sizes = [8, 32], strides = [1, 1]} : vector<8x128xf32> to vector<8x32xf32>
    %cst_109 = arith.constant 2.000000e+00 : f32
    %453 = vector.broadcast %cst_109 : f32 to vector<8x32xf32>
    %454 = arith.mulf %453, %452 : vector<8x32xf32>
    %cst_110 = arith.constant 1.000000e+00 : f32
    %455 = vector.broadcast %cst_110 : f32 to vector<8x32xf32>
    %456 = arith.subf %454, %455 : vector<8x32xf32>
    %457 = vector.extract_strided_slice %449 {offsets = [0, 96], sizes = [8, 32], strides = [1, 1]} : vector<8x128xf32> to vector<8x32xf32>
    %458 = arith.mulf %451, %439 : vector<8x32xf32>
    %459 = arith.mulf %450, %456 : vector<8x32xf32>
    %460 = arith.addf %458, %459 : vector<8x32xf32>
    %461 = math.tanh %460 : vector<8x32xf32>
    %462 = arith.mulf %457, %461 : vector<8x32xf32>
    %463 = arith.truncf %462 : vector<8x32xf32> to vector<8x32xbf16>
    %cst_111 = arith.constant dense<0.000000e+00> : vector<8x128xf32>
    %464 = tpu.matmul %463, %397, %cst_111 {dimension_numbers = #tpu.dot_dimension_numbers<[1], [0], [0], [1], [0, 0, 1, 1], [], []>} : vector<8x32xbf16>, vector<32x128xbf16>, vector<8x128xf32> -> vector<8x128xf32>
    %465 = arith.addf %391, %464 : vector<8x128xf32>
    %466 = arith.negf %465 : vector<8x128xf32>
    %467 = math.exp %466 : vector<8x128xf32>
    %cst_112 = arith.constant 1.000000e+00 : f32
    %468 = vector.broadcast %cst_112 : f32 to vector<8x128xf32>
    %469 = arith.addf %468, %467 : vector<8x128xf32>
    %470 = arith.divf %468, %469 : vector<8x128xf32>
    %471 = vector.extract_strided_slice %470 {offsets = [0, 0], sizes = [8, 32], strides = [1, 1]} : vector<8x128xf32> to vector<8x32xf32>
    %472 = vector.extract_strided_slice %470 {offsets = [0, 32], sizes = [8, 32], strides = [1, 1]} : vector<8x128xf32> to vector<8x32xf32>
    %473 = vector.extract_strided_slice %470 {offsets = [0, 64], sizes = [8, 32], strides = [1, 1]} : vector<8x128xf32> to vector<8x32xf32>
    %cst_113 = arith.constant 2.000000e+00 : f32
    %474 = vector.broadcast %cst_113 : f32 to vector<8x32xf32>
    %475 = arith.mulf %474, %473 : vector<8x32xf32>
    %cst_114 = arith.constant 1.000000e+00 : f32
    %476 = vector.broadcast %cst_114 : f32 to vector<8x32xf32>
    %477 = arith.subf %475, %476 : vector<8x32xf32>
    %478 = vector.extract_strided_slice %470 {offsets = [0, 96], sizes = [8, 32], strides = [1, 1]} : vector<8x128xf32> to vector<8x32xf32>
    %479 = arith.mulf %472, %460 : vector<8x32xf32>
    %480 = arith.mulf %471, %477 : vector<8x32xf32>
    %481 = arith.addf %479, %480 : vector<8x32xf32>
    %482 = math.tanh %481 : vector<8x32xf32>
    %483 = arith.mulf %478, %482 : vector<8x32xf32>
    %484 = arith.truncf %483 : vector<8x32xf32> to vector<8x32xbf16>
    %cst_115 = arith.constant dense<0.000000e+00> : vector<8x128xf32>
    %485 = tpu.matmul %484, %397, %cst_115 {dimension_numbers = #tpu.dot_dimension_numbers<[1], [0], [0], [1], [0, 0, 1, 1], [], []>} : vector<8x32xbf16>, vector<32x128xbf16>, vector<8x128xf32> -> vector<8x128xf32>
    %486 = arith.addf %392, %485 : vector<8x128xf32>
    %487 = arith.negf %486 : vector<8x128xf32>
    %488 = math.exp %487 : vector<8x128xf32>
    %cst_116 = arith.constant 1.000000e+00 : f32
    %489 = vector.broadcast %cst_116 : f32 to vector<8x128xf32>
    %490 = arith.addf %489, %488 : vector<8x128xf32>
    %491 = arith.divf %489, %490 : vector<8x128xf32>
    %492 = vector.extract_strided_slice %491 {offsets = [0, 0], sizes = [8, 32], strides = [1, 1]} : vector<8x128xf32> to vector<8x32xf32>
    %493 = vector.extract_strided_slice %491 {offsets = [0, 32], sizes = [8, 32], strides = [1, 1]} : vector<8x128xf32> to vector<8x32xf32>
    %494 = vector.extract_strided_slice %491 {offsets = [0, 64], sizes = [8, 32], strides = [1, 1]} : vector<8x128xf32> to vector<8x32xf32>
    %cst_117 = arith.constant 2.000000e+00 : f32
    %495 = vector.broadcast %cst_117 : f32 to vector<8x32xf32>
    %496 = arith.mulf %495, %494 : vector<8x32xf32>
    %cst_118 = arith.constant 1.000000e+00 : f32
    %497 = vector.broadcast %cst_118 : f32 to vector<8x32xf32>
    %498 = arith.subf %496, %497 : vector<8x32xf32>
    %499 = vector.extract_strided_slice %491 {offsets = [0, 96], sizes = [8, 32], strides = [1, 1]} : vector<8x128xf32> to vector<8x32xf32>
    %500 = arith.mulf %493, %481 : vector<8x32xf32>
    %501 = arith.mulf %492, %498 : vector<8x32xf32>
    %502 = arith.addf %500, %501 : vector<8x32xf32>
    %503 = math.tanh %502 : vector<8x32xf32>
    %504 = arith.mulf %499, %503 : vector<8x32xf32>
    %505 = arith.truncf %504 : vector<8x32xf32> to vector<8x32xbf16>
    %cst_119 = arith.constant dense<0.000000e+00> : vector<8x128xf32>
    %506 = tpu.matmul %505, %397, %cst_119 {dimension_numbers = #tpu.dot_dimension_numbers<[1], [0], [0], [1], [0, 0, 1, 1], [], []>} : vector<8x32xbf16>, vector<32x128xbf16>, vector<8x128xf32> -> vector<8x128xf32>
    %507 = arith.addf %393, %506 : vector<8x128xf32>
    %508 = arith.negf %507 : vector<8x128xf32>
    %509 = math.exp %508 : vector<8x128xf32>
    %cst_120 = arith.constant 1.000000e+00 : f32
    %510 = vector.broadcast %cst_120 : f32 to vector<8x128xf32>
    %511 = arith.addf %510, %509 : vector<8x128xf32>
    %512 = arith.divf %510, %511 : vector<8x128xf32>
    %513 = vector.extract_strided_slice %512 {offsets = [0, 0], sizes = [8, 32], strides = [1, 1]} : vector<8x128xf32> to vector<8x32xf32>
    %514 = vector.extract_strided_slice %512 {offsets = [0, 32], sizes = [8, 32], strides = [1, 1]} : vector<8x128xf32> to vector<8x32xf32>
    %515 = vector.extract_strided_slice %512 {offsets = [0, 64], sizes = [8, 32], strides = [1, 1]} : vector<8x128xf32> to vector<8x32xf32>
    %cst_121 = arith.constant 2.000000e+00 : f32
    %516 = vector.broadcast %cst_121 : f32 to vector<8x32xf32>
    %517 = arith.mulf %516, %515 : vector<8x32xf32>
    %cst_122 = arith.constant 1.000000e+00 : f32
    %518 = vector.broadcast %cst_122 : f32 to vector<8x32xf32>
    %519 = arith.subf %517, %518 : vector<8x32xf32>
    %520 = vector.extract_strided_slice %512 {offsets = [0, 96], sizes = [8, 32], strides = [1, 1]} : vector<8x128xf32> to vector<8x32xf32>
    %521 = arith.mulf %514, %502 : vector<8x32xf32>
    %522 = arith.mulf %513, %519 : vector<8x32xf32>
    %523 = arith.addf %521, %522 : vector<8x32xf32>
    %524 = math.tanh %523 : vector<8x32xf32>
    %525 = arith.mulf %520, %524 : vector<8x32xf32>
    %526 = arith.truncf %525 : vector<8x32xf32> to vector<8x32xbf16>
    %cst_123 = arith.constant dense<0.000000e+00> : vector<8x128xf32>
    %527 = tpu.matmul %526, %397, %cst_123 {dimension_numbers = #tpu.dot_dimension_numbers<[1], [0], [0], [1], [0, 0, 1, 1], [], []>} : vector<8x32xbf16>, vector<32x128xbf16>, vector<8x128xf32> -> vector<8x128xf32>
    %528 = arith.addf %394, %527 : vector<8x128xf32>
    %529 = arith.negf %528 : vector<8x128xf32>
    %530 = math.exp %529 : vector<8x128xf32>
    %cst_124 = arith.constant 1.000000e+00 : f32
    %531 = vector.broadcast %cst_124 : f32 to vector<8x128xf32>
    %532 = arith.addf %531, %530 : vector<8x128xf32>
    %533 = arith.divf %531, %532 : vector<8x128xf32>
    %534 = vector.extract_strided_slice %533 {offsets = [0, 0], sizes = [8, 32], strides = [1, 1]} : vector<8x128xf32> to vector<8x32xf32>
    %535 = vector.extract_strided_slice %533 {offsets = [0, 32], sizes = [8, 32], strides = [1, 1]} : vector<8x128xf32> to vector<8x32xf32>
    %536 = vector.extract_strided_slice %533 {offsets = [0, 64], sizes = [8, 32], strides = [1, 1]} : vector<8x128xf32> to vector<8x32xf32>
    %cst_125 = arith.constant 2.000000e+00 : f32
    %537 = vector.broadcast %cst_125 : f32 to vector<8x32xf32>
    %538 = arith.mulf %537, %536 : vector<8x32xf32>
    %cst_126 = arith.constant 1.000000e+00 : f32
    %539 = vector.broadcast %cst_126 : f32 to vector<8x32xf32>
    %540 = arith.subf %538, %539 : vector<8x32xf32>
    %541 = vector.extract_strided_slice %533 {offsets = [0, 96], sizes = [8, 32], strides = [1, 1]} : vector<8x128xf32> to vector<8x32xf32>
    %542 = arith.mulf %535, %523 : vector<8x32xf32>
    %543 = arith.mulf %534, %540 : vector<8x32xf32>
    %544 = arith.addf %542, %543 : vector<8x32xf32>
    %545 = math.tanh %544 : vector<8x32xf32>
    %546 = arith.mulf %541, %545 : vector<8x32xf32>
    %547 = arith.truncf %546 : vector<8x32xf32> to vector<8x32xbf16>
    %cst_127 = arith.constant dense<0.000000e+00> : vector<8x128xf32>
    %548 = tpu.matmul %547, %397, %cst_127 {dimension_numbers = #tpu.dot_dimension_numbers<[1], [0], [0], [1], [0, 0, 1, 1], [], []>} : vector<8x32xbf16>, vector<32x128xbf16>, vector<8x128xf32> -> vector<8x128xf32>
    %549 = arith.addf %395, %548 : vector<8x128xf32>
    %550 = arith.negf %549 : vector<8x128xf32>
    %551 = math.exp %550 : vector<8x128xf32>
    %cst_128 = arith.constant 1.000000e+00 : f32
    %552 = vector.broadcast %cst_128 : f32 to vector<8x128xf32>
    %553 = arith.addf %552, %551 : vector<8x128xf32>
    %554 = arith.divf %552, %553 : vector<8x128xf32>
    %555 = vector.extract_strided_slice %554 {offsets = [0, 0], sizes = [8, 32], strides = [1, 1]} : vector<8x128xf32> to vector<8x32xf32>
    %556 = vector.extract_strided_slice %554 {offsets = [0, 32], sizes = [8, 32], strides = [1, 1]} : vector<8x128xf32> to vector<8x32xf32>
    %557 = vector.extract_strided_slice %554 {offsets = [0, 64], sizes = [8, 32], strides = [1, 1]} : vector<8x128xf32> to vector<8x32xf32>
    %cst_129 = arith.constant 2.000000e+00 : f32
    %558 = vector.broadcast %cst_129 : f32 to vector<8x32xf32>
    %559 = arith.mulf %558, %557 : vector<8x32xf32>
    %cst_130 = arith.constant 1.000000e+00 : f32
    %560 = vector.broadcast %cst_130 : f32 to vector<8x32xf32>
    %561 = arith.subf %559, %560 : vector<8x32xf32>
    %562 = vector.extract_strided_slice %554 {offsets = [0, 96], sizes = [8, 32], strides = [1, 1]} : vector<8x128xf32> to vector<8x32xf32>
    %563 = arith.mulf %556, %544 : vector<8x32xf32>
    %564 = arith.mulf %555, %561 : vector<8x32xf32>
    %565 = arith.addf %563, %564 : vector<8x32xf32>
    %566 = math.tanh %565 : vector<8x32xf32>
    %567 = arith.mulf %562, %566 : vector<8x32xf32>
    %568 = arith.truncf %567 : vector<8x32xf32> to vector<8x32xbf16>
    %c3 = arith.constant 3 : index
    %c0_131 = arith.constant 0 : index
    %c0_132 = arith.constant 0 : index
    %569 = vector.load %arg1[%c3, %c0_131, %c0_132] : memref<6x32x128xbf16, #tpu.memory_space<vmem>>, vector<1x32x128xbf16>
    %570 = vector.shape_cast %569 : vector<1x32x128xbf16> to vector<32x128xbf16>
    %cst_133 = arith.constant dense<0.000000e+00> : vector<8x128xf32>
    %571 = tpu.matmul %568, %570, %cst_133 {dimension_numbers = #tpu.dot_dimension_numbers<[1], [0], [0], [1], [0, 0, 1, 1], [], []>} : vector<8x32xbf16>, vector<32x128xbf16>, vector<8x128xf32> -> vector<8x128xf32>
    %c3_134 = arith.constant 3 : index
    %c0_135 = arith.constant 0 : index
    %c0_136 = arith.constant 0 : index
    %572 = vector.load %arg3[%c3_134, %c0_135, %c0_136] : memref<6x1x128xf32, #tpu.memory_space<vmem>>, vector<1x1x128xf32>
    %573 = vector.shape_cast %572 : vector<1x1x128xf32> to vector<1x128xf32>
    %574 = vector.broadcast %573 : vector<1x128xf32> to vector<8x128xf32>
    %575 = arith.addf %571, %574 : vector<8x128xf32>
    %c3_137 = arith.constant 3 : index
    %c0_138 = arith.constant 0 : index
    %c0_139 = arith.constant 0 : index
    %576 = vector.load %arg2[%c3_137, %c0_138, %c0_139] : memref<6x32x128xbf16, #tpu.memory_space<vmem>>, vector<1x32x128xbf16>
    %577 = vector.shape_cast %576 : vector<1x32x128xbf16> to vector<32x128xbf16>
    %cst_140 = arith.constant 0.000000e+00 : f32
    %578 = vector.broadcast %cst_140 : f32 to vector<8x32xf32>
    %cst_141 = arith.constant 0.000000e+00 : f32
    %579 = vector.broadcast %cst_141 : f32 to vector<8x32xf32>
    %580 = arith.truncf %578 : vector<8x32xf32> to vector<8x32xbf16>
    %cst_142 = arith.constant dense<0.000000e+00> : vector<8x128xf32>
    %581 = tpu.matmul %580, %577, %cst_142 {dimension_numbers = #tpu.dot_dimension_numbers<[1], [0], [0], [1], [0, 0, 1, 1], [], []>} : vector<8x32xbf16>, vector<32x128xbf16>, vector<8x128xf32> -> vector<8x128xf32>
    %582 = arith.addf %575, %581 : vector<8x128xf32>
    %583 = arith.negf %582 : vector<8x128xf32>
    %584 = math.exp %583 : vector<8x128xf32>
    %cst_143 = arith.constant 1.000000e+00 : f32
    %585 = vector.broadcast %cst_143 : f32 to vector<8x128xf32>
    %586 = arith.addf %585, %584 : vector<8x128xf32>
    %587 = arith.divf %585, %586 : vector<8x128xf32>
    %588 = vector.extract_strided_slice %587 {offsets = [0, 0], sizes = [8, 32], strides = [1, 1]} : vector<8x128xf32> to vector<8x32xf32>
    %589 = vector.extract_strided_slice %587 {offsets = [0, 32], sizes = [8, 32], strides = [1, 1]} : vector<8x128xf32> to vector<8x32xf32>
    %590 = vector.extract_strided_slice %587 {offsets = [0, 64], sizes = [8, 32], strides = [1, 1]} : vector<8x128xf32> to vector<8x32xf32>
    %cst_144 = arith.constant 2.000000e+00 : f32
    %591 = vector.broadcast %cst_144 : f32 to vector<8x32xf32>
    %592 = arith.mulf %591, %590 : vector<8x32xf32>
    %cst_145 = arith.constant 1.000000e+00 : f32
    %593 = vector.broadcast %cst_145 : f32 to vector<8x32xf32>
    %594 = arith.subf %592, %593 : vector<8x32xf32>
    %595 = vector.extract_strided_slice %587 {offsets = [0, 96], sizes = [8, 32], strides = [1, 1]} : vector<8x128xf32> to vector<8x32xf32>
    %596 = arith.mulf %589, %579 : vector<8x32xf32>
    %597 = arith.mulf %588, %594 : vector<8x32xf32>
    %598 = arith.addf %596, %597 : vector<8x32xf32>
    %599 = math.tanh %598 : vector<8x32xf32>
    %600 = arith.mulf %595, %599 : vector<8x32xf32>
    %601 = arith.truncf %600 : vector<8x32xf32> to vector<8x32xbf16>
    %cst_146 = arith.constant dense<0.000000e+00> : vector<8x128xf32>
    %602 = tpu.matmul %601, %577, %cst_146 {dimension_numbers = #tpu.dot_dimension_numbers<[1], [0], [0], [1], [0, 0, 1, 1], [], []>} : vector<8x32xbf16>, vector<32x128xbf16>, vector<8x128xf32> -> vector<8x128xf32>
    %603 = arith.addf %575, %602 : vector<8x128xf32>
    %604 = arith.negf %603 : vector<8x128xf32>
    %605 = math.exp %604 : vector<8x128xf32>
    %cst_147 = arith.constant 1.000000e+00 : f32
    %606 = vector.broadcast %cst_147 : f32 to vector<8x128xf32>
    %607 = arith.addf %606, %605 : vector<8x128xf32>
    %608 = arith.divf %606, %607 : vector<8x128xf32>
    %609 = vector.extract_strided_slice %608 {offsets = [0, 0], sizes = [8, 32], strides = [1, 1]} : vector<8x128xf32> to vector<8x32xf32>
    %610 = vector.extract_strided_slice %608 {offsets = [0, 32], sizes = [8, 32], strides = [1, 1]} : vector<8x128xf32> to vector<8x32xf32>
    %611 = vector.extract_strided_slice %608 {offsets = [0, 64], sizes = [8, 32], strides = [1, 1]} : vector<8x128xf32> to vector<8x32xf32>
    %cst_148 = arith.constant 2.000000e+00 : f32
    %612 = vector.broadcast %cst_148 : f32 to vector<8x32xf32>
    %613 = arith.mulf %612, %611 : vector<8x32xf32>
    %cst_149 = arith.constant 1.000000e+00 : f32
    %614 = vector.broadcast %cst_149 : f32 to vector<8x32xf32>
    %615 = arith.subf %613, %614 : vector<8x32xf32>
    %616 = vector.extract_strided_slice %608 {offsets = [0, 96], sizes = [8, 32], strides = [1, 1]} : vector<8x128xf32> to vector<8x32xf32>
    %617 = arith.mulf %610, %598 : vector<8x32xf32>
    %618 = arith.mulf %609, %615 : vector<8x32xf32>
    %619 = arith.addf %617, %618 : vector<8x32xf32>
    %620 = math.tanh %619 : vector<8x32xf32>
    %621 = arith.mulf %616, %620 : vector<8x32xf32>
    %622 = arith.truncf %621 : vector<8x32xf32> to vector<8x32xbf16>
    %cst_150 = arith.constant dense<0.000000e+00> : vector<8x128xf32>
    %623 = tpu.matmul %622, %577, %cst_150 {dimension_numbers = #tpu.dot_dimension_numbers<[1], [0], [0], [1], [0, 0, 1, 1], [], []>} : vector<8x32xbf16>, vector<32x128xbf16>, vector<8x128xf32> -> vector<8x128xf32>
    %624 = arith.addf %575, %623 : vector<8x128xf32>
    %625 = arith.negf %624 : vector<8x128xf32>
    %626 = math.exp %625 : vector<8x128xf32>
    %cst_151 = arith.constant 1.000000e+00 : f32
    %627 = vector.broadcast %cst_151 : f32 to vector<8x128xf32>
    %628 = arith.addf %627, %626 : vector<8x128xf32>
    %629 = arith.divf %627, %628 : vector<8x128xf32>
    %630 = vector.extract_strided_slice %629 {offsets = [0, 0], sizes = [8, 32], strides = [1, 1]} : vector<8x128xf32> to vector<8x32xf32>
    %631 = vector.extract_strided_slice %629 {offsets = [0, 32], sizes = [8, 32], strides = [1, 1]} : vector<8x128xf32> to vector<8x32xf32>
    %632 = vector.extract_strided_slice %629 {offsets = [0, 64], sizes = [8, 32], strides = [1, 1]} : vector<8x128xf32> to vector<8x32xf32>
    %cst_152 = arith.constant 2.000000e+00 : f32
    %633 = vector.broadcast %cst_152 : f32 to vector<8x32xf32>
    %634 = arith.mulf %633, %632 : vector<8x32xf32>
    %cst_153 = arith.constant 1.000000e+00 : f32
    %635 = vector.broadcast %cst_153 : f32 to vector<8x32xf32>
    %636 = arith.subf %634, %635 : vector<8x32xf32>
    %637 = vector.extract_strided_slice %629 {offsets = [0, 96], sizes = [8, 32], strides = [1, 1]} : vector<8x128xf32> to vector<8x32xf32>
    %638 = arith.mulf %631, %619 : vector<8x32xf32>
    %639 = arith.mulf %630, %636 : vector<8x32xf32>
    %640 = arith.addf %638, %639 : vector<8x32xf32>
    %641 = math.tanh %640 : vector<8x32xf32>
    %642 = arith.mulf %637, %641 : vector<8x32xf32>
    %643 = arith.truncf %642 : vector<8x32xf32> to vector<8x32xbf16>
    %cst_154 = arith.constant dense<0.000000e+00> : vector<8x128xf32>
    %644 = tpu.matmul %643, %577, %cst_154 {dimension_numbers = #tpu.dot_dimension_numbers<[1], [0], [0], [1], [0, 0, 1, 1], [], []>} : vector<8x32xbf16>, vector<32x128xbf16>, vector<8x128xf32> -> vector<8x128xf32>
    %645 = arith.addf %575, %644 : vector<8x128xf32>
    %646 = arith.negf %645 : vector<8x128xf32>
    %647 = math.exp %646 : vector<8x128xf32>
    %cst_155 = arith.constant 1.000000e+00 : f32
    %648 = vector.broadcast %cst_155 : f32 to vector<8x128xf32>
    %649 = arith.addf %648, %647 : vector<8x128xf32>
    %650 = arith.divf %648, %649 : vector<8x128xf32>
    %651 = vector.extract_strided_slice %650 {offsets = [0, 0], sizes = [8, 32], strides = [1, 1]} : vector<8x128xf32> to vector<8x32xf32>
    %652 = vector.extract_strided_slice %650 {offsets = [0, 32], sizes = [8, 32], strides = [1, 1]} : vector<8x128xf32> to vector<8x32xf32>
    %653 = vector.extract_strided_slice %650 {offsets = [0, 64], sizes = [8, 32], strides = [1, 1]} : vector<8x128xf32> to vector<8x32xf32>
    %cst_156 = arith.constant 2.000000e+00 : f32
    %654 = vector.broadcast %cst_156 : f32 to vector<8x32xf32>
    %655 = arith.mulf %654, %653 : vector<8x32xf32>
    %cst_157 = arith.constant 1.000000e+00 : f32
    %656 = vector.broadcast %cst_157 : f32 to vector<8x32xf32>
    %657 = arith.subf %655, %656 : vector<8x32xf32>
    %658 = vector.extract_strided_slice %650 {offsets = [0, 96], sizes = [8, 32], strides = [1, 1]} : vector<8x128xf32> to vector<8x32xf32>
    %659 = arith.mulf %652, %640 : vector<8x32xf32>
    %660 = arith.mulf %651, %657 : vector<8x32xf32>
    %661 = arith.addf %659, %660 : vector<8x32xf32>
    %662 = math.tanh %661 : vector<8x32xf32>
    %663 = arith.mulf %658, %662 : vector<8x32xf32>
    %664 = arith.truncf %663 : vector<8x32xf32> to vector<8x32xbf16>
    %cst_158 = arith.constant dense<0.000000e+00> : vector<8x128xf32>
    %665 = tpu.matmul %664, %577, %cst_158 {dimension_numbers = #tpu.dot_dimension_numbers<[1], [0], [0], [1], [0, 0, 1, 1], [], []>} : vector<8x32xbf16>, vector<32x128xbf16>, vector<8x128xf32> -> vector<8x128xf32>
    %666 = arith.addf %575, %665 : vector<8x128xf32>
    %667 = arith.negf %666 : vector<8x128xf32>
    %668 = math.exp %667 : vector<8x128xf32>
    %cst_159 = arith.constant 1.000000e+00 : f32
    %669 = vector.broadcast %cst_159 : f32 to vector<8x128xf32>
    %670 = arith.addf %669, %668 : vector<8x128xf32>
    %671 = arith.divf %669, %670 : vector<8x128xf32>
    %672 = vector.extract_strided_slice %671 {offsets = [0, 0], sizes = [8, 32], strides = [1, 1]} : vector<8x128xf32> to vector<8x32xf32>
    %673 = vector.extract_strided_slice %671 {offsets = [0, 32], sizes = [8, 32], strides = [1, 1]} : vector<8x128xf32> to vector<8x32xf32>
    %674 = vector.extract_strided_slice %671 {offsets = [0, 64], sizes = [8, 32], strides = [1, 1]} : vector<8x128xf32> to vector<8x32xf32>
    %cst_160 = arith.constant 2.000000e+00 : f32
    %675 = vector.broadcast %cst_160 : f32 to vector<8x32xf32>
    %676 = arith.mulf %675, %674 : vector<8x32xf32>
    %cst_161 = arith.constant 1.000000e+00 : f32
    %677 = vector.broadcast %cst_161 : f32 to vector<8x32xf32>
    %678 = arith.subf %676, %677 : vector<8x32xf32>
    %679 = vector.extract_strided_slice %671 {offsets = [0, 96], sizes = [8, 32], strides = [1, 1]} : vector<8x128xf32> to vector<8x32xf32>
    %680 = arith.mulf %673, %661 : vector<8x32xf32>
    %681 = arith.mulf %672, %678 : vector<8x32xf32>
    %682 = arith.addf %680, %681 : vector<8x32xf32>
    %683 = math.tanh %682 : vector<8x32xf32>
    %684 = arith.mulf %679, %683 : vector<8x32xf32>
    %685 = arith.truncf %684 : vector<8x32xf32> to vector<8x32xbf16>
    %cst_162 = arith.constant dense<0.000000e+00> : vector<8x128xf32>
    %686 = tpu.matmul %685, %577, %cst_162 {dimension_numbers = #tpu.dot_dimension_numbers<[1], [0], [0], [1], [0, 0, 1, 1], [], []>} : vector<8x32xbf16>, vector<32x128xbf16>, vector<8x128xf32> -> vector<8x128xf32>
    %687 = arith.addf %575, %686 : vector<8x128xf32>
    %688 = arith.negf %687 : vector<8x128xf32>
    %689 = math.exp %688 : vector<8x128xf32>
    %cst_163 = arith.constant 1.000000e+00 : f32
    %690 = vector.broadcast %cst_163 : f32 to vector<8x128xf32>
    %691 = arith.addf %690, %689 : vector<8x128xf32>
    %692 = arith.divf %690, %691 : vector<8x128xf32>
    %693 = vector.extract_strided_slice %692 {offsets = [0, 0], sizes = [8, 32], strides = [1, 1]} : vector<8x128xf32> to vector<8x32xf32>
    %694 = vector.extract_strided_slice %692 {offsets = [0, 32], sizes = [8, 32], strides = [1, 1]} : vector<8x128xf32> to vector<8x32xf32>
    %695 = vector.extract_strided_slice %692 {offsets = [0, 64], sizes = [8, 32], strides = [1, 1]} : vector<8x128xf32> to vector<8x32xf32>
    %cst_164 = arith.constant 2.000000e+00 : f32
    %696 = vector.broadcast %cst_164 : f32 to vector<8x32xf32>
    %697 = arith.mulf %696, %695 : vector<8x32xf32>
    %cst_165 = arith.constant 1.000000e+00 : f32
    %698 = vector.broadcast %cst_165 : f32 to vector<8x32xf32>
    %699 = arith.subf %697, %698 : vector<8x32xf32>
    %700 = vector.extract_strided_slice %692 {offsets = [0, 96], sizes = [8, 32], strides = [1, 1]} : vector<8x128xf32> to vector<8x32xf32>
    %701 = arith.mulf %694, %682 : vector<8x32xf32>
    %702 = arith.mulf %693, %699 : vector<8x32xf32>
    %703 = arith.addf %701, %702 : vector<8x32xf32>
    %704 = math.tanh %703 : vector<8x32xf32>
    %705 = arith.mulf %700, %704 : vector<8x32xf32>
    %706 = arith.truncf %705 : vector<8x32xf32> to vector<8x32xbf16>
    %cst_166 = arith.constant dense<0.000000e+00> : vector<8x128xf32>
    %707 = tpu.matmul %706, %577, %cst_166 {dimension_numbers = #tpu.dot_dimension_numbers<[1], [0], [0], [1], [0, 0, 1, 1], [], []>} : vector<8x32xbf16>, vector<32x128xbf16>, vector<8x128xf32> -> vector<8x128xf32>
    %708 = arith.addf %575, %707 : vector<8x128xf32>
    %709 = arith.negf %708 : vector<8x128xf32>
    %710 = math.exp %709 : vector<8x128xf32>
    %cst_167 = arith.constant 1.000000e+00 : f32
    %711 = vector.broadcast %cst_167 : f32 to vector<8x128xf32>
    %712 = arith.addf %711, %710 : vector<8x128xf32>
    %713 = arith.divf %711, %712 : vector<8x128xf32>
    %714 = vector.extract_strided_slice %713 {offsets = [0, 0], sizes = [8, 32], strides = [1, 1]} : vector<8x128xf32> to vector<8x32xf32>
    %715 = vector.extract_strided_slice %713 {offsets = [0, 32], sizes = [8, 32], strides = [1, 1]} : vector<8x128xf32> to vector<8x32xf32>
    %716 = vector.extract_strided_slice %713 {offsets = [0, 64], sizes = [8, 32], strides = [1, 1]} : vector<8x128xf32> to vector<8x32xf32>
    %cst_168 = arith.constant 2.000000e+00 : f32
    %717 = vector.broadcast %cst_168 : f32 to vector<8x32xf32>
    %718 = arith.mulf %717, %716 : vector<8x32xf32>
    %cst_169 = arith.constant 1.000000e+00 : f32
    %719 = vector.broadcast %cst_169 : f32 to vector<8x32xf32>
    %720 = arith.subf %718, %719 : vector<8x32xf32>
    %721 = vector.extract_strided_slice %713 {offsets = [0, 96], sizes = [8, 32], strides = [1, 1]} : vector<8x128xf32> to vector<8x32xf32>
    %722 = arith.mulf %715, %703 : vector<8x32xf32>
    %723 = arith.mulf %714, %720 : vector<8x32xf32>
    %724 = arith.addf %722, %723 : vector<8x32xf32>
    %725 = math.tanh %724 : vector<8x32xf32>
    %726 = arith.mulf %721, %725 : vector<8x32xf32>
    %727 = arith.truncf %726 : vector<8x32xf32> to vector<8x32xbf16>
    %cst_170 = arith.constant dense<0.000000e+00> : vector<8x128xf32>
    %728 = tpu.matmul %727, %577, %cst_170 {dimension_numbers = #tpu.dot_dimension_numbers<[1], [0], [0], [1], [0, 0, 1, 1], [], []>} : vector<8x32xbf16>, vector<32x128xbf16>, vector<8x128xf32> -> vector<8x128xf32>
    %729 = arith.addf %575, %728 : vector<8x128xf32>
    %730 = arith.negf %729 : vector<8x128xf32>
    %731 = math.exp %730 : vector<8x128xf32>
    %cst_171 = arith.constant 1.000000e+00 : f32
    %732 = vector.broadcast %cst_171 : f32 to vector<8x128xf32>
    %733 = arith.addf %732, %731 : vector<8x128xf32>
    %734 = arith.divf %732, %733 : vector<8x128xf32>
    %735 = vector.extract_strided_slice %734 {offsets = [0, 0], sizes = [8, 32], strides = [1, 1]} : vector<8x128xf32> to vector<8x32xf32>
    %736 = vector.extract_strided_slice %734 {offsets = [0, 32], sizes = [8, 32], strides = [1, 1]} : vector<8x128xf32> to vector<8x32xf32>
    %737 = vector.extract_strided_slice %734 {offsets = [0, 64], sizes = [8, 32], strides = [1, 1]} : vector<8x128xf32> to vector<8x32xf32>
    %cst_172 = arith.constant 2.000000e+00 : f32
    %738 = vector.broadcast %cst_172 : f32 to vector<8x32xf32>
    %739 = arith.mulf %738, %737 : vector<8x32xf32>
    %cst_173 = arith.constant 1.000000e+00 : f32
    %740 = vector.broadcast %cst_173 : f32 to vector<8x32xf32>
    %741 = arith.subf %739, %740 : vector<8x32xf32>
    %742 = vector.extract_strided_slice %734 {offsets = [0, 96], sizes = [8, 32], strides = [1, 1]} : vector<8x128xf32> to vector<8x32xf32>
    %743 = arith.mulf %736, %724 : vector<8x32xf32>
    %744 = arith.mulf %735, %741 : vector<8x32xf32>
    %745 = arith.addf %743, %744 : vector<8x32xf32>
    %746 = math.tanh %745 : vector<8x32xf32>
    %747 = arith.mulf %742, %746 : vector<8x32xf32>
    %748 = tpu.concatenate %600, %621, %642, %663, %684, %705, %726, %747 in 0 : vector<8x32xf32>, vector<8x32xf32>, vector<8x32xf32>, vector<8x32xf32>, vector<8x32xf32>, vector<8x32xf32>, vector<8x32xf32>, vector<8x32xf32> -> vector<64x32xf32>
    %749 = arith.truncf %748 : vector<64x32xf32> to vector<64x32xbf16>
    %c4 = arith.constant 4 : index
    %c0_174 = arith.constant 0 : index
    %c0_175 = arith.constant 0 : index
    %750 = vector.load %arg1[%c4, %c0_174, %c0_175] : memref<6x32x128xbf16, #tpu.memory_space<vmem>>, vector<1x32x128xbf16>
    %751 = vector.shape_cast %750 : vector<1x32x128xbf16> to vector<32x128xbf16>
    %cst_176 = arith.constant dense<0.000000e+00> : vector<64x128xf32>
    %752 = tpu.matmul %749, %751, %cst_176 {dimension_numbers = #tpu.dot_dimension_numbers<[1], [0], [0], [1], [0, 0, 1, 1], [], []>} : vector<64x32xbf16>, vector<32x128xbf16>, vector<64x128xf32> -> vector<64x128xf32>
    %c4_177 = arith.constant 4 : index
    %c0_178 = arith.constant 0 : index
    %c0_179 = arith.constant 0 : index
    %753 = vector.load %arg3[%c4_177, %c0_178, %c0_179] : memref<6x1x128xf32, #tpu.memory_space<vmem>>, vector<1x1x128xf32>
    %754 = vector.shape_cast %753 : vector<1x1x128xf32> to vector<1x128xf32>
    %755 = vector.broadcast %754 : vector<1x128xf32> to vector<64x128xf32>
    %756 = arith.addf %752, %755 : vector<64x128xf32>
    %757 = vector.extract_strided_slice %756 {offsets = [0, 0], sizes = [8, 128], strides = [1, 1]} : vector<64x128xf32> to vector<8x128xf32>
    %758 = vector.extract_strided_slice %756 {offsets = [8, 0], sizes = [8, 128], strides = [1, 1]} : vector<64x128xf32> to vector<8x128xf32>
    %759 = vector.extract_strided_slice %756 {offsets = [16, 0], sizes = [8, 128], strides = [1, 1]} : vector<64x128xf32> to vector<8x128xf32>
    %760 = vector.extract_strided_slice %756 {offsets = [24, 0], sizes = [8, 128], strides = [1, 1]} : vector<64x128xf32> to vector<8x128xf32>
    %761 = vector.extract_strided_slice %756 {offsets = [32, 0], sizes = [8, 128], strides = [1, 1]} : vector<64x128xf32> to vector<8x128xf32>
    %762 = vector.extract_strided_slice %756 {offsets = [40, 0], sizes = [8, 128], strides = [1, 1]} : vector<64x128xf32> to vector<8x128xf32>
    %763 = vector.extract_strided_slice %756 {offsets = [48, 0], sizes = [8, 128], strides = [1, 1]} : vector<64x128xf32> to vector<8x128xf32>
    %764 = vector.extract_strided_slice %756 {offsets = [56, 0], sizes = [8, 128], strides = [1, 1]} : vector<64x128xf32> to vector<8x128xf32>
    %c4_180 = arith.constant 4 : index
    %c0_181 = arith.constant 0 : index
    %c0_182 = arith.constant 0 : index
    %765 = vector.load %arg2[%c4_180, %c0_181, %c0_182] : memref<6x32x128xbf16, #tpu.memory_space<vmem>>, vector<1x32x128xbf16>
    %766 = vector.shape_cast %765 : vector<1x32x128xbf16> to vector<32x128xbf16>
    %cst_183 = arith.constant 0.000000e+00 : f32
    %767 = vector.broadcast %cst_183 : f32 to vector<8x32xf32>
    %cst_184 = arith.constant 0.000000e+00 : f32
    %768 = vector.broadcast %cst_184 : f32 to vector<8x32xf32>
    %769 = arith.truncf %767 : vector<8x32xf32> to vector<8x32xbf16>
    %cst_185 = arith.constant dense<0.000000e+00> : vector<8x128xf32>
    %770 = tpu.matmul %769, %766, %cst_185 {dimension_numbers = #tpu.dot_dimension_numbers<[1], [0], [0], [1], [0, 0, 1, 1], [], []>} : vector<8x32xbf16>, vector<32x128xbf16>, vector<8x128xf32> -> vector<8x128xf32>
    %771 = arith.addf %757, %770 : vector<8x128xf32>
    %772 = arith.negf %771 : vector<8x128xf32>
    %773 = math.exp %772 : vector<8x128xf32>
    %cst_186 = arith.constant 1.000000e+00 : f32
    %774 = vector.broadcast %cst_186 : f32 to vector<8x128xf32>
    %775 = arith.addf %774, %773 : vector<8x128xf32>
    %776 = arith.divf %774, %775 : vector<8x128xf32>
    %777 = vector.extract_strided_slice %776 {offsets = [0, 0], sizes = [8, 32], strides = [1, 1]} : vector<8x128xf32> to vector<8x32xf32>
    %778 = vector.extract_strided_slice %776 {offsets = [0, 32], sizes = [8, 32], strides = [1, 1]} : vector<8x128xf32> to vector<8x32xf32>
    %779 = vector.extract_strided_slice %776 {offsets = [0, 64], sizes = [8, 32], strides = [1, 1]} : vector<8x128xf32> to vector<8x32xf32>
    %cst_187 = arith.constant 2.000000e+00 : f32
    %780 = vector.broadcast %cst_187 : f32 to vector<8x32xf32>
    %781 = arith.mulf %780, %779 : vector<8x32xf32>
    %cst_188 = arith.constant 1.000000e+00 : f32
    %782 = vector.broadcast %cst_188 : f32 to vector<8x32xf32>
    %783 = arith.subf %781, %782 : vector<8x32xf32>
    %784 = vector.extract_strided_slice %776 {offsets = [0, 96], sizes = [8, 32], strides = [1, 1]} : vector<8x128xf32> to vector<8x32xf32>
    %785 = arith.mulf %778, %768 : vector<8x32xf32>
    %786 = arith.mulf %777, %783 : vector<8x32xf32>
    %787 = arith.addf %785, %786 : vector<8x32xf32>
    %788 = math.tanh %787 : vector<8x32xf32>
    %789 = arith.mulf %784, %788 : vector<8x32xf32>
    %790 = arith.truncf %789 : vector<8x32xf32> to vector<8x32xbf16>
    %cst_189 = arith.constant dense<0.000000e+00> : vector<8x128xf32>
    %791 = tpu.matmul %790, %766, %cst_189 {dimension_numbers = #tpu.dot_dimension_numbers<[1], [0], [0], [1], [0, 0, 1, 1], [], []>} : vector<8x32xbf16>, vector<32x128xbf16>, vector<8x128xf32> -> vector<8x128xf32>
    %792 = arith.addf %758, %791 : vector<8x128xf32>
    %793 = arith.negf %792 : vector<8x128xf32>
    %794 = math.exp %793 : vector<8x128xf32>
    %cst_190 = arith.constant 1.000000e+00 : f32
    %795 = vector.broadcast %cst_190 : f32 to vector<8x128xf32>
    %796 = arith.addf %795, %794 : vector<8x128xf32>
    %797 = arith.divf %795, %796 : vector<8x128xf32>
    %798 = vector.extract_strided_slice %797 {offsets = [0, 0], sizes = [8, 32], strides = [1, 1]} : vector<8x128xf32> to vector<8x32xf32>
    %799 = vector.extract_strided_slice %797 {offsets = [0, 32], sizes = [8, 32], strides = [1, 1]} : vector<8x128xf32> to vector<8x32xf32>
    %800 = vector.extract_strided_slice %797 {offsets = [0, 64], sizes = [8, 32], strides = [1, 1]} : vector<8x128xf32> to vector<8x32xf32>
    %cst_191 = arith.constant 2.000000e+00 : f32
    %801 = vector.broadcast %cst_191 : f32 to vector<8x32xf32>
    %802 = arith.mulf %801, %800 : vector<8x32xf32>
    %cst_192 = arith.constant 1.000000e+00 : f32
    %803 = vector.broadcast %cst_192 : f32 to vector<8x32xf32>
    %804 = arith.subf %802, %803 : vector<8x32xf32>
    %805 = vector.extract_strided_slice %797 {offsets = [0, 96], sizes = [8, 32], strides = [1, 1]} : vector<8x128xf32> to vector<8x32xf32>
    %806 = arith.mulf %799, %787 : vector<8x32xf32>
    %807 = arith.mulf %798, %804 : vector<8x32xf32>
    %808 = arith.addf %806, %807 : vector<8x32xf32>
    %809 = math.tanh %808 : vector<8x32xf32>
    %810 = arith.mulf %805, %809 : vector<8x32xf32>
    %811 = arith.truncf %810 : vector<8x32xf32> to vector<8x32xbf16>
    %cst_193 = arith.constant dense<0.000000e+00> : vector<8x128xf32>
    %812 = tpu.matmul %811, %766, %cst_193 {dimension_numbers = #tpu.dot_dimension_numbers<[1], [0], [0], [1], [0, 0, 1, 1], [], []>} : vector<8x32xbf16>, vector<32x128xbf16>, vector<8x128xf32> -> vector<8x128xf32>
    %813 = arith.addf %759, %812 : vector<8x128xf32>
    %814 = arith.negf %813 : vector<8x128xf32>
    %815 = math.exp %814 : vector<8x128xf32>
    %cst_194 = arith.constant 1.000000e+00 : f32
    %816 = vector.broadcast %cst_194 : f32 to vector<8x128xf32>
    %817 = arith.addf %816, %815 : vector<8x128xf32>
    %818 = arith.divf %816, %817 : vector<8x128xf32>
    %819 = vector.extract_strided_slice %818 {offsets = [0, 0], sizes = [8, 32], strides = [1, 1]} : vector<8x128xf32> to vector<8x32xf32>
    %820 = vector.extract_strided_slice %818 {offsets = [0, 32], sizes = [8, 32], strides = [1, 1]} : vector<8x128xf32> to vector<8x32xf32>
    %821 = vector.extract_strided_slice %818 {offsets = [0, 64], sizes = [8, 32], strides = [1, 1]} : vector<8x128xf32> to vector<8x32xf32>
    %cst_195 = arith.constant 2.000000e+00 : f32
    %822 = vector.broadcast %cst_195 : f32 to vector<8x32xf32>
    %823 = arith.mulf %822, %821 : vector<8x32xf32>
    %cst_196 = arith.constant 1.000000e+00 : f32
    %824 = vector.broadcast %cst_196 : f32 to vector<8x32xf32>
    %825 = arith.subf %823, %824 : vector<8x32xf32>
    %826 = vector.extract_strided_slice %818 {offsets = [0, 96], sizes = [8, 32], strides = [1, 1]} : vector<8x128xf32> to vector<8x32xf32>
    %827 = arith.mulf %820, %808 : vector<8x32xf32>
    %828 = arith.mulf %819, %825 : vector<8x32xf32>
    %829 = arith.addf %827, %828 : vector<8x32xf32>
    %830 = math.tanh %829 : vector<8x32xf32>
    %831 = arith.mulf %826, %830 : vector<8x32xf32>
    %832 = arith.truncf %831 : vector<8x32xf32> to vector<8x32xbf16>
    %cst_197 = arith.constant dense<0.000000e+00> : vector<8x128xf32>
    %833 = tpu.matmul %832, %766, %cst_197 {dimension_numbers = #tpu.dot_dimension_numbers<[1], [0], [0], [1], [0, 0, 1, 1], [], []>} : vector<8x32xbf16>, vector<32x128xbf16>, vector<8x128xf32> -> vector<8x128xf32>
    %834 = arith.addf %760, %833 : vector<8x128xf32>
    %835 = arith.negf %834 : vector<8x128xf32>
    %836 = math.exp %835 : vector<8x128xf32>
    %cst_198 = arith.constant 1.000000e+00 : f32
    %837 = vector.broadcast %cst_198 : f32 to vector<8x128xf32>
    %838 = arith.addf %837, %836 : vector<8x128xf32>
    %839 = arith.divf %837, %838 : vector<8x128xf32>
    %840 = vector.extract_strided_slice %839 {offsets = [0, 0], sizes = [8, 32], strides = [1, 1]} : vector<8x128xf32> to vector<8x32xf32>
    %841 = vector.extract_strided_slice %839 {offsets = [0, 32], sizes = [8, 32], strides = [1, 1]} : vector<8x128xf32> to vector<8x32xf32>
    %842 = vector.extract_strided_slice %839 {offsets = [0, 64], sizes = [8, 32], strides = [1, 1]} : vector<8x128xf32> to vector<8x32xf32>
    %cst_199 = arith.constant 2.000000e+00 : f32
    %843 = vector.broadcast %cst_199 : f32 to vector<8x32xf32>
    %844 = arith.mulf %843, %842 : vector<8x32xf32>
    %cst_200 = arith.constant 1.000000e+00 : f32
    %845 = vector.broadcast %cst_200 : f32 to vector<8x32xf32>
    %846 = arith.subf %844, %845 : vector<8x32xf32>
    %847 = vector.extract_strided_slice %839 {offsets = [0, 96], sizes = [8, 32], strides = [1, 1]} : vector<8x128xf32> to vector<8x32xf32>
    %848 = arith.mulf %841, %829 : vector<8x32xf32>
    %849 = arith.mulf %840, %846 : vector<8x32xf32>
    %850 = arith.addf %848, %849 : vector<8x32xf32>
    %851 = math.tanh %850 : vector<8x32xf32>
    %852 = arith.mulf %847, %851 : vector<8x32xf32>
    %853 = arith.truncf %852 : vector<8x32xf32> to vector<8x32xbf16>
    %cst_201 = arith.constant dense<0.000000e+00> : vector<8x128xf32>
    %854 = tpu.matmul %853, %766, %cst_201 {dimension_numbers = #tpu.dot_dimension_numbers<[1], [0], [0], [1], [0, 0, 1, 1], [], []>} : vector<8x32xbf16>, vector<32x128xbf16>, vector<8x128xf32> -> vector<8x128xf32>
    %855 = arith.addf %761, %854 : vector<8x128xf32>
    %856 = arith.negf %855 : vector<8x128xf32>
    %857 = math.exp %856 : vector<8x128xf32>
    %cst_202 = arith.constant 1.000000e+00 : f32
    %858 = vector.broadcast %cst_202 : f32 to vector<8x128xf32>
    %859 = arith.addf %858, %857 : vector<8x128xf32>
    %860 = arith.divf %858, %859 : vector<8x128xf32>
    %861 = vector.extract_strided_slice %860 {offsets = [0, 0], sizes = [8, 32], strides = [1, 1]} : vector<8x128xf32> to vector<8x32xf32>
    %862 = vector.extract_strided_slice %860 {offsets = [0, 32], sizes = [8, 32], strides = [1, 1]} : vector<8x128xf32> to vector<8x32xf32>
    %863 = vector.extract_strided_slice %860 {offsets = [0, 64], sizes = [8, 32], strides = [1, 1]} : vector<8x128xf32> to vector<8x32xf32>
    %cst_203 = arith.constant 2.000000e+00 : f32
    %864 = vector.broadcast %cst_203 : f32 to vector<8x32xf32>
    %865 = arith.mulf %864, %863 : vector<8x32xf32>
    %cst_204 = arith.constant 1.000000e+00 : f32
    %866 = vector.broadcast %cst_204 : f32 to vector<8x32xf32>
    %867 = arith.subf %865, %866 : vector<8x32xf32>
    %868 = vector.extract_strided_slice %860 {offsets = [0, 96], sizes = [8, 32], strides = [1, 1]} : vector<8x128xf32> to vector<8x32xf32>
    %869 = arith.mulf %862, %850 : vector<8x32xf32>
    %870 = arith.mulf %861, %867 : vector<8x32xf32>
    %871 = arith.addf %869, %870 : vector<8x32xf32>
    %872 = math.tanh %871 : vector<8x32xf32>
    %873 = arith.mulf %868, %872 : vector<8x32xf32>
    %874 = arith.truncf %873 : vector<8x32xf32> to vector<8x32xbf16>
    %cst_205 = arith.constant dense<0.000000e+00> : vector<8x128xf32>
    %875 = tpu.matmul %874, %766, %cst_205 {dimension_numbers = #tpu.dot_dimension_numbers<[1], [0], [0], [1], [0, 0, 1, 1], [], []>} : vector<8x32xbf16>, vector<32x128xbf16>, vector<8x128xf32> -> vector<8x128xf32>
    %876 = arith.addf %762, %875 : vector<8x128xf32>
    %877 = arith.negf %876 : vector<8x128xf32>
    %878 = math.exp %877 : vector<8x128xf32>
    %cst_206 = arith.constant 1.000000e+00 : f32
    %879 = vector.broadcast %cst_206 : f32 to vector<8x128xf32>
    %880 = arith.addf %879, %878 : vector<8x128xf32>
    %881 = arith.divf %879, %880 : vector<8x128xf32>
    %882 = vector.extract_strided_slice %881 {offsets = [0, 0], sizes = [8, 32], strides = [1, 1]} : vector<8x128xf32> to vector<8x32xf32>
    %883 = vector.extract_strided_slice %881 {offsets = [0, 32], sizes = [8, 32], strides = [1, 1]} : vector<8x128xf32> to vector<8x32xf32>
    %884 = vector.extract_strided_slice %881 {offsets = [0, 64], sizes = [8, 32], strides = [1, 1]} : vector<8x128xf32> to vector<8x32xf32>
    %cst_207 = arith.constant 2.000000e+00 : f32
    %885 = vector.broadcast %cst_207 : f32 to vector<8x32xf32>
    %886 = arith.mulf %885, %884 : vector<8x32xf32>
    %cst_208 = arith.constant 1.000000e+00 : f32
    %887 = vector.broadcast %cst_208 : f32 to vector<8x32xf32>
    %888 = arith.subf %886, %887 : vector<8x32xf32>
    %889 = vector.extract_strided_slice %881 {offsets = [0, 96], sizes = [8, 32], strides = [1, 1]} : vector<8x128xf32> to vector<8x32xf32>
    %890 = arith.mulf %883, %871 : vector<8x32xf32>
    %891 = arith.mulf %882, %888 : vector<8x32xf32>
    %892 = arith.addf %890, %891 : vector<8x32xf32>
    %893 = math.tanh %892 : vector<8x32xf32>
    %894 = arith.mulf %889, %893 : vector<8x32xf32>
    %895 = arith.truncf %894 : vector<8x32xf32> to vector<8x32xbf16>
    %cst_209 = arith.constant dense<0.000000e+00> : vector<8x128xf32>
    %896 = tpu.matmul %895, %766, %cst_209 {dimension_numbers = #tpu.dot_dimension_numbers<[1], [0], [0], [1], [0, 0, 1, 1], [], []>} : vector<8x32xbf16>, vector<32x128xbf16>, vector<8x128xf32> -> vector<8x128xf32>
    %897 = arith.addf %763, %896 : vector<8x128xf32>
    %898 = arith.negf %897 : vector<8x128xf32>
    %899 = math.exp %898 : vector<8x128xf32>
    %cst_210 = arith.constant 1.000000e+00 : f32
    %900 = vector.broadcast %cst_210 : f32 to vector<8x128xf32>
    %901 = arith.addf %900, %899 : vector<8x128xf32>
    %902 = arith.divf %900, %901 : vector<8x128xf32>
    %903 = vector.extract_strided_slice %902 {offsets = [0, 0], sizes = [8, 32], strides = [1, 1]} : vector<8x128xf32> to vector<8x32xf32>
    %904 = vector.extract_strided_slice %902 {offsets = [0, 32], sizes = [8, 32], strides = [1, 1]} : vector<8x128xf32> to vector<8x32xf32>
    %905 = vector.extract_strided_slice %902 {offsets = [0, 64], sizes = [8, 32], strides = [1, 1]} : vector<8x128xf32> to vector<8x32xf32>
    %cst_211 = arith.constant 2.000000e+00 : f32
    %906 = vector.broadcast %cst_211 : f32 to vector<8x32xf32>
    %907 = arith.mulf %906, %905 : vector<8x32xf32>
    %cst_212 = arith.constant 1.000000e+00 : f32
    %908 = vector.broadcast %cst_212 : f32 to vector<8x32xf32>
    %909 = arith.subf %907, %908 : vector<8x32xf32>
    %910 = vector.extract_strided_slice %902 {offsets = [0, 96], sizes = [8, 32], strides = [1, 1]} : vector<8x128xf32> to vector<8x32xf32>
    %911 = arith.mulf %904, %892 : vector<8x32xf32>
    %912 = arith.mulf %903, %909 : vector<8x32xf32>
    %913 = arith.addf %911, %912 : vector<8x32xf32>
    %914 = math.tanh %913 : vector<8x32xf32>
    %915 = arith.mulf %910, %914 : vector<8x32xf32>
    %916 = arith.truncf %915 : vector<8x32xf32> to vector<8x32xbf16>
    %cst_213 = arith.constant dense<0.000000e+00> : vector<8x128xf32>
    %917 = tpu.matmul %916, %766, %cst_213 {dimension_numbers = #tpu.dot_dimension_numbers<[1], [0], [0], [1], [0, 0, 1, 1], [], []>} : vector<8x32xbf16>, vector<32x128xbf16>, vector<8x128xf32> -> vector<8x128xf32>
    %918 = arith.addf %764, %917 : vector<8x128xf32>
    %919 = arith.negf %918 : vector<8x128xf32>
    %920 = math.exp %919 : vector<8x128xf32>
    %cst_214 = arith.constant 1.000000e+00 : f32
    %921 = vector.broadcast %cst_214 : f32 to vector<8x128xf32>
    %922 = arith.addf %921, %920 : vector<8x128xf32>
    %923 = arith.divf %921, %922 : vector<8x128xf32>
    %924 = vector.extract_strided_slice %923 {offsets = [0, 0], sizes = [8, 32], strides = [1, 1]} : vector<8x128xf32> to vector<8x32xf32>
    %925 = vector.extract_strided_slice %923 {offsets = [0, 32], sizes = [8, 32], strides = [1, 1]} : vector<8x128xf32> to vector<8x32xf32>
    %926 = vector.extract_strided_slice %923 {offsets = [0, 64], sizes = [8, 32], strides = [1, 1]} : vector<8x128xf32> to vector<8x32xf32>
    %cst_215 = arith.constant 2.000000e+00 : f32
    %927 = vector.broadcast %cst_215 : f32 to vector<8x32xf32>
    %928 = arith.mulf %927, %926 : vector<8x32xf32>
    %cst_216 = arith.constant 1.000000e+00 : f32
    %929 = vector.broadcast %cst_216 : f32 to vector<8x32xf32>
    %930 = arith.subf %928, %929 : vector<8x32xf32>
    %931 = vector.extract_strided_slice %923 {offsets = [0, 96], sizes = [8, 32], strides = [1, 1]} : vector<8x128xf32> to vector<8x32xf32>
    %932 = arith.mulf %925, %913 : vector<8x32xf32>
    %933 = arith.mulf %924, %930 : vector<8x32xf32>
    %934 = arith.addf %932, %933 : vector<8x32xf32>
    %935 = math.tanh %934 : vector<8x32xf32>
    %936 = arith.mulf %931, %935 : vector<8x32xf32>
    %937 = tpu.concatenate %789, %810, %831, %852, %873, %894, %915, %936 in 0 : vector<8x32xf32>, vector<8x32xf32>, vector<8x32xf32>, vector<8x32xf32>, vector<8x32xf32>, vector<8x32xf32>, vector<8x32xf32>, vector<8x32xf32> -> vector<64x32xf32>
    %938 = arith.truncf %937 : vector<64x32xf32> to vector<64x32xbf16>
    %c5 = arith.constant 5 : index
    %c0_217 = arith.constant 0 : index
    %c0_218 = arith.constant 0 : index
    %939 = vector.load %arg1[%c5, %c0_217, %c0_218] : memref<6x32x128xbf16, #tpu.memory_space<vmem>>, vector<1x32x128xbf16>
    %940 = vector.shape_cast %939 : vector<1x32x128xbf16> to vector<32x128xbf16>
    %cst_219 = arith.constant dense<0.000000e+00> : vector<64x128xf32>
    %941 = tpu.matmul %938, %940, %cst_219 {dimension_numbers = #tpu.dot_dimension_numbers<[1], [0], [0], [1], [0, 0, 1, 1], [], []>} : vector<64x32xbf16>, vector<32x128xbf16>, vector<64x128xf32> -> vector<64x128xf32>
    %c5_220 = arith.constant 5 : index
    %c0_221 = arith.constant 0 : index
    %c0_222 = arith.constant 0 : index
    %942 = vector.load %arg3[%c5_220, %c0_221, %c0_222] : memref<6x1x128xf32, #tpu.memory_space<vmem>>, vector<1x1x128xf32>
    %943 = vector.shape_cast %942 : vector<1x1x128xf32> to vector<1x128xf32>
    %944 = vector.broadcast %943 : vector<1x128xf32> to vector<64x128xf32>
    %945 = arith.addf %941, %944 : vector<64x128xf32>
    %946 = vector.extract_strided_slice %945 {offsets = [0, 0], sizes = [8, 128], strides = [1, 1]} : vector<64x128xf32> to vector<8x128xf32>
    %947 = vector.extract_strided_slice %945 {offsets = [8, 0], sizes = [8, 128], strides = [1, 1]} : vector<64x128xf32> to vector<8x128xf32>
    %948 = vector.extract_strided_slice %945 {offsets = [16, 0], sizes = [8, 128], strides = [1, 1]} : vector<64x128xf32> to vector<8x128xf32>
    %949 = vector.extract_strided_slice %945 {offsets = [24, 0], sizes = [8, 128], strides = [1, 1]} : vector<64x128xf32> to vector<8x128xf32>
    %950 = vector.extract_strided_slice %945 {offsets = [32, 0], sizes = [8, 128], strides = [1, 1]} : vector<64x128xf32> to vector<8x128xf32>
    %951 = vector.extract_strided_slice %945 {offsets = [40, 0], sizes = [8, 128], strides = [1, 1]} : vector<64x128xf32> to vector<8x128xf32>
    %952 = vector.extract_strided_slice %945 {offsets = [48, 0], sizes = [8, 128], strides = [1, 1]} : vector<64x128xf32> to vector<8x128xf32>
    %953 = vector.extract_strided_slice %945 {offsets = [56, 0], sizes = [8, 128], strides = [1, 1]} : vector<64x128xf32> to vector<8x128xf32>
    %c5_223 = arith.constant 5 : index
    %c0_224 = arith.constant 0 : index
    %c0_225 = arith.constant 0 : index
    %954 = vector.load %arg2[%c5_223, %c0_224, %c0_225] : memref<6x32x128xbf16, #tpu.memory_space<vmem>>, vector<1x32x128xbf16>
    %955 = vector.shape_cast %954 : vector<1x32x128xbf16> to vector<32x128xbf16>
    %cst_226 = arith.constant 0.000000e+00 : f32
    %956 = vector.broadcast %cst_226 : f32 to vector<8x32xf32>
    %cst_227 = arith.constant 0.000000e+00 : f32
    %957 = vector.broadcast %cst_227 : f32 to vector<8x32xf32>
    %958 = arith.truncf %956 : vector<8x32xf32> to vector<8x32xbf16>
    %cst_228 = arith.constant dense<0.000000e+00> : vector<8x128xf32>
    %959 = tpu.matmul %958, %955, %cst_228 {dimension_numbers = #tpu.dot_dimension_numbers<[1], [0], [0], [1], [0, 0, 1, 1], [], []>} : vector<8x32xbf16>, vector<32x128xbf16>, vector<8x128xf32> -> vector<8x128xf32>
    %960 = arith.addf %946, %959 : vector<8x128xf32>
    %961 = arith.negf %960 : vector<8x128xf32>
    %962 = math.exp %961 : vector<8x128xf32>
    %cst_229 = arith.constant 1.000000e+00 : f32
    %963 = vector.broadcast %cst_229 : f32 to vector<8x128xf32>
    %964 = arith.addf %963, %962 : vector<8x128xf32>
    %965 = arith.divf %963, %964 : vector<8x128xf32>
    %966 = vector.extract_strided_slice %965 {offsets = [0, 0], sizes = [8, 32], strides = [1, 1]} : vector<8x128xf32> to vector<8x32xf32>
    %967 = vector.extract_strided_slice %965 {offsets = [0, 32], sizes = [8, 32], strides = [1, 1]} : vector<8x128xf32> to vector<8x32xf32>
    %968 = vector.extract_strided_slice %965 {offsets = [0, 64], sizes = [8, 32], strides = [1, 1]} : vector<8x128xf32> to vector<8x32xf32>
    %cst_230 = arith.constant 2.000000e+00 : f32
    %969 = vector.broadcast %cst_230 : f32 to vector<8x32xf32>
    %970 = arith.mulf %969, %968 : vector<8x32xf32>
    %cst_231 = arith.constant 1.000000e+00 : f32
    %971 = vector.broadcast %cst_231 : f32 to vector<8x32xf32>
    %972 = arith.subf %970, %971 : vector<8x32xf32>
    %973 = vector.extract_strided_slice %965 {offsets = [0, 96], sizes = [8, 32], strides = [1, 1]} : vector<8x128xf32> to vector<8x32xf32>
    %974 = arith.mulf %967, %957 : vector<8x32xf32>
    %975 = arith.mulf %966, %972 : vector<8x32xf32>
    %976 = arith.addf %974, %975 : vector<8x32xf32>
    %977 = math.tanh %976 : vector<8x32xf32>
    %978 = arith.mulf %973, %977 : vector<8x32xf32>
    %979 = arith.truncf %978 : vector<8x32xf32> to vector<8x32xbf16>
    %cst_232 = arith.constant dense<0.000000e+00> : vector<8x128xf32>
    %980 = tpu.matmul %979, %955, %cst_232 {dimension_numbers = #tpu.dot_dimension_numbers<[1], [0], [0], [1], [0, 0, 1, 1], [], []>} : vector<8x32xbf16>, vector<32x128xbf16>, vector<8x128xf32> -> vector<8x128xf32>
    %981 = arith.addf %947, %980 : vector<8x128xf32>
    %982 = arith.negf %981 : vector<8x128xf32>
    %983 = math.exp %982 : vector<8x128xf32>
    %cst_233 = arith.constant 1.000000e+00 : f32
    %984 = vector.broadcast %cst_233 : f32 to vector<8x128xf32>
    %985 = arith.addf %984, %983 : vector<8x128xf32>
    %986 = arith.divf %984, %985 : vector<8x128xf32>
    %987 = vector.extract_strided_slice %986 {offsets = [0, 0], sizes = [8, 32], strides = [1, 1]} : vector<8x128xf32> to vector<8x32xf32>
    %988 = vector.extract_strided_slice %986 {offsets = [0, 32], sizes = [8, 32], strides = [1, 1]} : vector<8x128xf32> to vector<8x32xf32>
    %989 = vector.extract_strided_slice %986 {offsets = [0, 64], sizes = [8, 32], strides = [1, 1]} : vector<8x128xf32> to vector<8x32xf32>
    %cst_234 = arith.constant 2.000000e+00 : f32
    %990 = vector.broadcast %cst_234 : f32 to vector<8x32xf32>
    %991 = arith.mulf %990, %989 : vector<8x32xf32>
    %cst_235 = arith.constant 1.000000e+00 : f32
    %992 = vector.broadcast %cst_235 : f32 to vector<8x32xf32>
    %993 = arith.subf %991, %992 : vector<8x32xf32>
    %994 = vector.extract_strided_slice %986 {offsets = [0, 96], sizes = [8, 32], strides = [1, 1]} : vector<8x128xf32> to vector<8x32xf32>
    %995 = arith.mulf %988, %976 : vector<8x32xf32>
    %996 = arith.mulf %987, %993 : vector<8x32xf32>
    %997 = arith.addf %995, %996 : vector<8x32xf32>
    %998 = math.tanh %997 : vector<8x32xf32>
    %999 = arith.mulf %994, %998 : vector<8x32xf32>
    %1000 = arith.truncf %999 : vector<8x32xf32> to vector<8x32xbf16>
    %cst_236 = arith.constant dense<0.000000e+00> : vector<8x128xf32>
    %1001 = tpu.matmul %1000, %955, %cst_236 {dimension_numbers = #tpu.dot_dimension_numbers<[1], [0], [0], [1], [0, 0, 1, 1], [], []>} : vector<8x32xbf16>, vector<32x128xbf16>, vector<8x128xf32> -> vector<8x128xf32>
    %1002 = arith.addf %948, %1001 : vector<8x128xf32>
    %1003 = arith.negf %1002 : vector<8x128xf32>
    %1004 = math.exp %1003 : vector<8x128xf32>
    %cst_237 = arith.constant 1.000000e+00 : f32
    %1005 = vector.broadcast %cst_237 : f32 to vector<8x128xf32>
    %1006 = arith.addf %1005, %1004 : vector<8x128xf32>
    %1007 = arith.divf %1005, %1006 : vector<8x128xf32>
    %1008 = vector.extract_strided_slice %1007 {offsets = [0, 0], sizes = [8, 32], strides = [1, 1]} : vector<8x128xf32> to vector<8x32xf32>
    %1009 = vector.extract_strided_slice %1007 {offsets = [0, 32], sizes = [8, 32], strides = [1, 1]} : vector<8x128xf32> to vector<8x32xf32>
    %1010 = vector.extract_strided_slice %1007 {offsets = [0, 64], sizes = [8, 32], strides = [1, 1]} : vector<8x128xf32> to vector<8x32xf32>
    %cst_238 = arith.constant 2.000000e+00 : f32
    %1011 = vector.broadcast %cst_238 : f32 to vector<8x32xf32>
    %1012 = arith.mulf %1011, %1010 : vector<8x32xf32>
    %cst_239 = arith.constant 1.000000e+00 : f32
    %1013 = vector.broadcast %cst_239 : f32 to vector<8x32xf32>
    %1014 = arith.subf %1012, %1013 : vector<8x32xf32>
    %1015 = vector.extract_strided_slice %1007 {offsets = [0, 96], sizes = [8, 32], strides = [1, 1]} : vector<8x128xf32> to vector<8x32xf32>
    %1016 = arith.mulf %1009, %997 : vector<8x32xf32>
    %1017 = arith.mulf %1008, %1014 : vector<8x32xf32>
    %1018 = arith.addf %1016, %1017 : vector<8x32xf32>
    %1019 = math.tanh %1018 : vector<8x32xf32>
    %1020 = arith.mulf %1015, %1019 : vector<8x32xf32>
    %1021 = arith.truncf %1020 : vector<8x32xf32> to vector<8x32xbf16>
    %cst_240 = arith.constant dense<0.000000e+00> : vector<8x128xf32>
    %1022 = tpu.matmul %1021, %955, %cst_240 {dimension_numbers = #tpu.dot_dimension_numbers<[1], [0], [0], [1], [0, 0, 1, 1], [], []>} : vector<8x32xbf16>, vector<32x128xbf16>, vector<8x128xf32> -> vector<8x128xf32>
    %1023 = arith.addf %949, %1022 : vector<8x128xf32>
    %1024 = arith.negf %1023 : vector<8x128xf32>
    %1025 = math.exp %1024 : vector<8x128xf32>
    %cst_241 = arith.constant 1.000000e+00 : f32
    %1026 = vector.broadcast %cst_241 : f32 to vector<8x128xf32>
    %1027 = arith.addf %1026, %1025 : vector<8x128xf32>
    %1028 = arith.divf %1026, %1027 : vector<8x128xf32>
    %1029 = vector.extract_strided_slice %1028 {offsets = [0, 0], sizes = [8, 32], strides = [1, 1]} : vector<8x128xf32> to vector<8x32xf32>
    %1030 = vector.extract_strided_slice %1028 {offsets = [0, 32], sizes = [8, 32], strides = [1, 1]} : vector<8x128xf32> to vector<8x32xf32>
    %1031 = vector.extract_strided_slice %1028 {offsets = [0, 64], sizes = [8, 32], strides = [1, 1]} : vector<8x128xf32> to vector<8x32xf32>
    %cst_242 = arith.constant 2.000000e+00 : f32
    %1032 = vector.broadcast %cst_242 : f32 to vector<8x32xf32>
    %1033 = arith.mulf %1032, %1031 : vector<8x32xf32>
    %cst_243 = arith.constant 1.000000e+00 : f32
    %1034 = vector.broadcast %cst_243 : f32 to vector<8x32xf32>
    %1035 = arith.subf %1033, %1034 : vector<8x32xf32>
    %1036 = vector.extract_strided_slice %1028 {offsets = [0, 96], sizes = [8, 32], strides = [1, 1]} : vector<8x128xf32> to vector<8x32xf32>
    %1037 = arith.mulf %1030, %1018 : vector<8x32xf32>
    %1038 = arith.mulf %1029, %1035 : vector<8x32xf32>
    %1039 = arith.addf %1037, %1038 : vector<8x32xf32>
    %1040 = math.tanh %1039 : vector<8x32xf32>
    %1041 = arith.mulf %1036, %1040 : vector<8x32xf32>
    %1042 = arith.truncf %1041 : vector<8x32xf32> to vector<8x32xbf16>
    %cst_244 = arith.constant dense<0.000000e+00> : vector<8x128xf32>
    %1043 = tpu.matmul %1042, %955, %cst_244 {dimension_numbers = #tpu.dot_dimension_numbers<[1], [0], [0], [1], [0, 0, 1, 1], [], []>} : vector<8x32xbf16>, vector<32x128xbf16>, vector<8x128xf32> -> vector<8x128xf32>
    %1044 = arith.addf %950, %1043 : vector<8x128xf32>
    %1045 = arith.negf %1044 : vector<8x128xf32>
    %1046 = math.exp %1045 : vector<8x128xf32>
    %cst_245 = arith.constant 1.000000e+00 : f32
    %1047 = vector.broadcast %cst_245 : f32 to vector<8x128xf32>
    %1048 = arith.addf %1047, %1046 : vector<8x128xf32>
    %1049 = arith.divf %1047, %1048 : vector<8x128xf32>
    %1050 = vector.extract_strided_slice %1049 {offsets = [0, 0], sizes = [8, 32], strides = [1, 1]} : vector<8x128xf32> to vector<8x32xf32>
    %1051 = vector.extract_strided_slice %1049 {offsets = [0, 32], sizes = [8, 32], strides = [1, 1]} : vector<8x128xf32> to vector<8x32xf32>
    %1052 = vector.extract_strided_slice %1049 {offsets = [0, 64], sizes = [8, 32], strides = [1, 1]} : vector<8x128xf32> to vector<8x32xf32>
    %cst_246 = arith.constant 2.000000e+00 : f32
    %1053 = vector.broadcast %cst_246 : f32 to vector<8x32xf32>
    %1054 = arith.mulf %1053, %1052 : vector<8x32xf32>
    %cst_247 = arith.constant 1.000000e+00 : f32
    %1055 = vector.broadcast %cst_247 : f32 to vector<8x32xf32>
    %1056 = arith.subf %1054, %1055 : vector<8x32xf32>
    %1057 = vector.extract_strided_slice %1049 {offsets = [0, 96], sizes = [8, 32], strides = [1, 1]} : vector<8x128xf32> to vector<8x32xf32>
    %1058 = arith.mulf %1051, %1039 : vector<8x32xf32>
    %1059 = arith.mulf %1050, %1056 : vector<8x32xf32>
    %1060 = arith.addf %1058, %1059 : vector<8x32xf32>
    %1061 = math.tanh %1060 : vector<8x32xf32>
    %1062 = arith.mulf %1057, %1061 : vector<8x32xf32>
    %1063 = arith.truncf %1062 : vector<8x32xf32> to vector<8x32xbf16>
    %cst_248 = arith.constant dense<0.000000e+00> : vector<8x128xf32>
    %1064 = tpu.matmul %1063, %955, %cst_248 {dimension_numbers = #tpu.dot_dimension_numbers<[1], [0], [0], [1], [0, 0, 1, 1], [], []>} : vector<8x32xbf16>, vector<32x128xbf16>, vector<8x128xf32> -> vector<8x128xf32>
    %1065 = arith.addf %951, %1064 : vector<8x128xf32>
    %1066 = arith.negf %1065 : vector<8x128xf32>
    %1067 = math.exp %1066 : vector<8x128xf32>
    %cst_249 = arith.constant 1.000000e+00 : f32
    %1068 = vector.broadcast %cst_249 : f32 to vector<8x128xf32>
    %1069 = arith.addf %1068, %1067 : vector<8x128xf32>
    %1070 = arith.divf %1068, %1069 : vector<8x128xf32>
    %1071 = vector.extract_strided_slice %1070 {offsets = [0, 0], sizes = [8, 32], strides = [1, 1]} : vector<8x128xf32> to vector<8x32xf32>
    %1072 = vector.extract_strided_slice %1070 {offsets = [0, 32], sizes = [8, 32], strides = [1, 1]} : vector<8x128xf32> to vector<8x32xf32>
    %1073 = vector.extract_strided_slice %1070 {offsets = [0, 64], sizes = [8, 32], strides = [1, 1]} : vector<8x128xf32> to vector<8x32xf32>
    %cst_250 = arith.constant 2.000000e+00 : f32
    %1074 = vector.broadcast %cst_250 : f32 to vector<8x32xf32>
    %1075 = arith.mulf %1074, %1073 : vector<8x32xf32>
    %cst_251 = arith.constant 1.000000e+00 : f32
    %1076 = vector.broadcast %cst_251 : f32 to vector<8x32xf32>
    %1077 = arith.subf %1075, %1076 : vector<8x32xf32>
    %1078 = vector.extract_strided_slice %1070 {offsets = [0, 96], sizes = [8, 32], strides = [1, 1]} : vector<8x128xf32> to vector<8x32xf32>
    %1079 = arith.mulf %1072, %1060 : vector<8x32xf32>
    %1080 = arith.mulf %1071, %1077 : vector<8x32xf32>
    %1081 = arith.addf %1079, %1080 : vector<8x32xf32>
    %1082 = math.tanh %1081 : vector<8x32xf32>
    %1083 = arith.mulf %1078, %1082 : vector<8x32xf32>
    %1084 = arith.truncf %1083 : vector<8x32xf32> to vector<8x32xbf16>
    %cst_252 = arith.constant dense<0.000000e+00> : vector<8x128xf32>
    %1085 = tpu.matmul %1084, %955, %cst_252 {dimension_numbers = #tpu.dot_dimension_numbers<[1], [0], [0], [1], [0, 0, 1, 1], [], []>} : vector<8x32xbf16>, vector<32x128xbf16>, vector<8x128xf32> -> vector<8x128xf32>
    %1086 = arith.addf %952, %1085 : vector<8x128xf32>
    %1087 = arith.negf %1086 : vector<8x128xf32>
    %1088 = math.exp %1087 : vector<8x128xf32>
    %cst_253 = arith.constant 1.000000e+00 : f32
    %1089 = vector.broadcast %cst_253 : f32 to vector<8x128xf32>
    %1090 = arith.addf %1089, %1088 : vector<8x128xf32>
    %1091 = arith.divf %1089, %1090 : vector<8x128xf32>
    %1092 = vector.extract_strided_slice %1091 {offsets = [0, 0], sizes = [8, 32], strides = [1, 1]} : vector<8x128xf32> to vector<8x32xf32>
    %1093 = vector.extract_strided_slice %1091 {offsets = [0, 32], sizes = [8, 32], strides = [1, 1]} : vector<8x128xf32> to vector<8x32xf32>
    %1094 = vector.extract_strided_slice %1091 {offsets = [0, 64], sizes = [8, 32], strides = [1, 1]} : vector<8x128xf32> to vector<8x32xf32>
    %cst_254 = arith.constant 2.000000e+00 : f32
    %1095 = vector.broadcast %cst_254 : f32 to vector<8x32xf32>
    %1096 = arith.mulf %1095, %1094 : vector<8x32xf32>
    %cst_255 = arith.constant 1.000000e+00 : f32
    %1097 = vector.broadcast %cst_255 : f32 to vector<8x32xf32>
    %1098 = arith.subf %1096, %1097 : vector<8x32xf32>
    %1099 = vector.extract_strided_slice %1091 {offsets = [0, 96], sizes = [8, 32], strides = [1, 1]} : vector<8x128xf32> to vector<8x32xf32>
    %1100 = arith.mulf %1093, %1081 : vector<8x32xf32>
    %1101 = arith.mulf %1092, %1098 : vector<8x32xf32>
    %1102 = arith.addf %1100, %1101 : vector<8x32xf32>
    %1103 = math.tanh %1102 : vector<8x32xf32>
    %1104 = arith.mulf %1099, %1103 : vector<8x32xf32>
    %1105 = arith.truncf %1104 : vector<8x32xf32> to vector<8x32xbf16>
    %cst_256 = arith.constant dense<0.000000e+00> : vector<8x128xf32>
    %1106 = tpu.matmul %1105, %955, %cst_256 {dimension_numbers = #tpu.dot_dimension_numbers<[1], [0], [0], [1], [0, 0, 1, 1], [], []>} : vector<8x32xbf16>, vector<32x128xbf16>, vector<8x128xf32> -> vector<8x128xf32>
    %1107 = arith.addf %953, %1106 : vector<8x128xf32>
    %1108 = arith.negf %1107 : vector<8x128xf32>
    %1109 = math.exp %1108 : vector<8x128xf32>
    %cst_257 = arith.constant 1.000000e+00 : f32
    %1110 = vector.broadcast %cst_257 : f32 to vector<8x128xf32>
    %1111 = arith.addf %1110, %1109 : vector<8x128xf32>
    %1112 = arith.divf %1110, %1111 : vector<8x128xf32>
    %1113 = vector.extract_strided_slice %1112 {offsets = [0, 0], sizes = [8, 32], strides = [1, 1]} : vector<8x128xf32> to vector<8x32xf32>
    %1114 = vector.extract_strided_slice %1112 {offsets = [0, 32], sizes = [8, 32], strides = [1, 1]} : vector<8x128xf32> to vector<8x32xf32>
    %1115 = vector.extract_strided_slice %1112 {offsets = [0, 64], sizes = [8, 32], strides = [1, 1]} : vector<8x128xf32> to vector<8x32xf32>
    %cst_258 = arith.constant 2.000000e+00 : f32
    %1116 = vector.broadcast %cst_258 : f32 to vector<8x32xf32>
    %1117 = arith.mulf %1116, %1115 : vector<8x32xf32>
    %cst_259 = arith.constant 1.000000e+00 : f32
    %1118 = vector.broadcast %cst_259 : f32 to vector<8x32xf32>
    %1119 = arith.subf %1117, %1118 : vector<8x32xf32>
    %1120 = vector.extract_strided_slice %1112 {offsets = [0, 96], sizes = [8, 32], strides = [1, 1]} : vector<8x128xf32> to vector<8x32xf32>
    %1121 = arith.mulf %1114, %1102 : vector<8x32xf32>
    %1122 = arith.mulf %1113, %1119 : vector<8x32xf32>
    %1123 = arith.addf %1121, %1122 : vector<8x32xf32>
    %1124 = math.tanh %1123 : vector<8x32xf32>
    %1125 = arith.mulf %1120, %1124 : vector<8x32xf32>
    %1126 = tpu.concatenate %978, %999, %1020, %1041, %1062, %1083, %1104, %1125 in 0 : vector<8x32xf32>, vector<8x32xf32>, vector<8x32xf32>, vector<8x32xf32>, vector<8x32xf32>, vector<8x32xf32>, vector<8x32xf32>, vector<8x32xf32> -> vector<64x32xf32>
    %1127 = arith.truncf %1126 : vector<64x32xf32> to vector<64x32xbf16>
    %c0_260 = arith.constant 0 : index
    %c0_261 = arith.constant 0 : index
    %1128 = vector.load %arg4[%c0_260, %c0_261] : memref<32x128xbf16, #tpu.memory_space<vmem>>, vector<32x128xbf16>
    %cst_262 = arith.constant dense<0.000000e+00> : vector<64x128xf32>
    %1129 = tpu.matmul %1127, %1128, %cst_262 {dimension_numbers = #tpu.dot_dimension_numbers<[1], [0], [0], [1], [0, 0, 1, 1], [], []>} : vector<64x32xbf16>, vector<32x128xbf16>, vector<64x128xf32> -> vector<64x128xf32>
    %c0_263 = arith.constant 0 : index
    %c0_264 = arith.constant 0 : index
    %1130 = vector.load %arg5[%c0_263, %c0_264] : memref<1x128xf32, #tpu.memory_space<vmem>>, vector<1x128xf32>
    %1131 = vector.broadcast %1130 : vector<1x128xf32> to vector<64x128xf32>
    %1132 = arith.addf %1129, %1131 : vector<64x128xf32>
    %1133 = vector.shape_cast %1132 : vector<64x128xf32> to vector<8x8x128xf32>
    %c0_265 = arith.constant 0 : index
    %c0_266 = arith.constant 0 : index
    %c0_267 = arith.constant 0 : index
    %1134 = vector.load %arg6[%c0_265, %c0_266, %c0_267] : memref<8x8x128xf32, #tpu.memory_space<vmem>>, vector<8x8x128xf32>
    tpu.vector_store %arg6[%c0_265, %c0_266, %c0_267], %1133 {strides = array<i32>} : memref<8x8x128xf32, #tpu.memory_space<vmem>>, vector<8x8x128xf32>,
    return
  }
}

</mosaic_0001>

<bundles_post_ra>
// kernel: lstm_autoencoder_forward.1
= control target key start
LH: loop header
LB: loop body
LE: loop exit
PB: predicated region body
PF: predicated region fallthrough
CT: control target
= control target key end

     0   :  { %11 = vsyncpa [#allocation3], 0  ;;  %s5603_s21 = smov [#allocation2]   ;;  %s6697_s0 = inlined_call_operand.vmem [shape: f32[8,8,32], index: 0, kind: input, shape index: {}]   ;;  %s6698_s1 = inlined_call_operand.vmem [shape: bf16[6,32,128], index: 1, kind: input, shape index: {}]   ;;  %s6699_s2 = inlined_call_operand.hbm [shape: bf16[6,32,128], index: 2, kind: input, shape index: {}]   ;;  %s6700_s3 = inlined_call_operand.vmem [shape: f32[6,1,128], index: 3, kind: input, shape index: {}]   ;;  %s6701_s4 = inlined_call_operand.vmem [shape: bf16[32,128], index: 4, kind: input, shape index: {}]   ;;  %s6702_s5 = inlined_call_operand.vmem [shape: f32[1,128], index: 5, kind: input, shape index: {}]   ;;  %s6703_s6 = inlined_call_operand.vmem [shape: f32[8,8,128], index: 6, kind: output, shape index: {}]  }
   0x1   :  { %s21_s22 = sshll.u32 %s5603_s21, 4  ;;  %s5579_s25 = scalar_lea.hbm %s6699_s2, 1536  ;;  %s22_s22 = int_to_ptr.vmem [resolvable:$true] %s21_s22 }
   0x2   :  { %p5580_p0 = scmp.ne.s32.totalorder %s6699_s2, %s5579_s25  ;;  %p5583_p1 = scmp.lt.u32.totalorder %s5579_s25, %s6699_s2 }
   0x4   :  { %p5585_p2 = pnand %p5583_p1, %p5580_p0 }
   0x6   :  { %5588 = shalt.err (!%p5585_p2)
}
   0x7   :  { %s5589_s30 = scalar_lea.vmem %s22_s22, 1536  ;;  %p5594_p4 = scmp.lt.s32.totalorder %s22_s22, %s22_s22 }
   0x8   :  { %p5590_p3 = scmp.ne.s32.totalorder %s22_s22, %s5589_s30  ;;  %p5595_p5 = scmp.lt.s32.totalorder %s5589_s30, %s5589_s30 }
   0xa   :  { %p5596_p6 = por %p5595_p5, %p5594_p4 }
   0xc   :  { %p5597_p7 = pnand %p5596_p6, %p5590_p3 }
   0xe   :  { %5600 = shalt.err (!%p5597_p7)
}
   0xf   :  { %s5604_s7 = smov 64   ;;  %s5605_s8 = smov 4  }
  0x10   :  { %27 = dma.hbm_to_vmem [thread:$0]  %s6699_s2, 1536, %s22_s22, [#allocation3], %s5604_s7, %s5604_s7, %s5605_s8  }
  0x11   :  { %5601 = dma.done.wait [#allocation3], 1536  }
  0x12   :  { %5602 = vsyncadd [#allocation3], 4294965760  ;;  %v5606_v0 = vmov 0.0   ;;  %vm5607_vm0 = vmmov 0   ;;  %v5265_v1 = vld [vmem:[%s6698_s1] sm:$0xff]   ;;  %v5267_v3 = vld [vmem:[%s6698_s1 + $0x8] sm:$0xff]  }
  0x13   :  { %4806 = vmatprep.subr.bf16.mxu1 %v5606_v0  ;;  %4810 = vmatprep.mubr.msk.bf16.mxu1 %vm5607_vm0, %v5606_v0  ;;  %v5665_v2 = vld [vmem:[#allocation2] sm:$0xff]   ;;  %v5671_v4 = vld [vmem:[#allocation2 + $0x8] sm:$0xff]   ;;  %vm73_vm1 = vcmask 261120   ;;  %v40_v7 = vld [vmem:[%s6697_s0 + $0x10] sm:$0xff]  ;;  %v5608_v11 = vmov 0   ;;  %s5609_s24 = smov 32  }
  0x14   :  { %4794 = vmatprep.subr.bf16.mxu0 %v5265_v1  ;;  %4807 = vmatpush3.bf16.msra.mxu1 %v5665_v2  ;;  %v38_v5 = vld [vmem:[%s6697_s0] sm:$0xff]  ;;  %v39_v6 = vld [vmem:[%s6697_s0 + $0x8] sm:$0xff]  ;;  %v41_v9 = vld [vmem:[%s6697_s0 + $0x18] sm:$0xff] }
  0x15   :  { %4795 = vmatpush3.bf16.msra.mxu0 %v5265_v1  ;;  %4808 = vmatprep.subr.bf16.mxu1 %v5606_v0  ;;  %v46_v8 = vpack.c.bf16 %v39_v6, %v38_v5  ;;  %v47_v10 = vpack.c.bf16 %v41_v9, %v40_v7  ;;  %v5705_v12 = vld [vmem:[%s6700_s3] ss:$0 sm:$0xff]  ;;  %v43_v57 = vld [vmem:[%s6697_s0 + $0x28] sm:$0xff]  ;;  %v44_v58 = vld [vmem:[%s6697_s0 + $0x30] sm:$0xff] }
  0x16   :  { %4796 = vmatprep.subr.bf16.mxu0 %v5267_v3  ;;  %v42_v56 = vld [vmem:[%s6697_s0 + $0x20] sm:$0xff]  ;;  %v45_v60 = vld [vmem:[%s6697_s0 + $0x38] sm:$0xff] }
  0x17   :  { %4798 = vmatprep.mubr.msk.bf16.mxu0 %vm73_vm1, %v46_v8  ;;  %v48_v59 = vpack.c.bf16 %v43_v57, %v42_v56  ;;  %v49_v61 = vpack.c.bf16 %v45_v60, %v44_v58 }
  0x18   :  { %4809 = vmatpush3.bf16.msra.mxu1 %v5671_v4 }
  0x19   :  { %4797 = vmatpush3.bf16.msra.mxu0 %v5267_v3  ;;  %4814 = vmatprep.subr.bf16.mxu1 %v5606_v0 }
  0x1a   :  { %4822 = vmatprep.subr.bf16.mxu0 %v5606_v0 }
  0x1b   :  { %4811 = vmatmul.mubr.bf16.vlgmr.msra.gmra.mrb[0].mxu1 %v5608_v11 }
  0x1c   :  { %4799 = vmatmul.mubr.msk.bf16.vlgmr.msra.gmra.mrb[0].mxu0 %vm73_vm1, %v47_v10  ;;  %4815 = vmatpush3.bf16.msra.mxu1 %v5665_v2 }
  0x1d   :  { %4818 = vmatprep.mubr.msk.bf16.mxu1 %vm5607_vm0, %v5606_v0  ;;  %4816 = vmatprep.subr.bf16.mxu1 %v5606_v0 }
  0x1e   :  { %4823 = vmatpush3.bf16.msra.mxu0 %v5665_v2  ;;  %4802 = vmatprep.mubr.msk.bf16.mxu0 %vm73_vm1, %v48_v59 }
  0x1f   :  { %4824 = vmatprep.subr.bf16.mxu0 %v5606_v0 }
  0x20   :  { %4817 = vmatpush3.bf16.msra.mxu1 %v5671_v4 }
  0x21   :  { %4830 = vmatprep.subr.bf16.mxu1 %v5606_v0 }
  0x22   :  { %4825 = vmatpush3.bf16.msra.mxu0 %v5671_v4 }
  0x23   :  { %4838 = vmatprep.subr.bf16.mxu0 %v5606_v0 }
  0x24   :  { %4803 = vmatmul.mubr.msk.bf16.gmra.mrb[4].mxu0 %vm73_vm1, %v49_v61 }
  0x25   :  { %4826 = vmatprep.mubr.msk.bf16.mxu0 %vm5607_vm0, %v5606_v0 }
  0xee   :  { %v204_v14 = vpop.f32.mrb[0].mxu1 }
  0xef   :  { %v5707_v13 = vpop.f32.mrb[0].mxu0  ;;  %v4812_v16 = vpop.f32.mrb[1].mxu1 }
  0xf0   :  { %v120_v15 = vpop.f32.mrb[1].mxu0  ;;  %v207_v19 = vpop.f32.mrb[2].mxu1  ;;  %v129_v10 = vadd.f32 %v5707_v13, %v5705_v12 }
  0xf1   :  { %v121_v17 = vadd.f32 %v5705_v12, %v120_v15  ;;  %v5710_v18 = vpop.f32.mrb[2].mxu0  ;;  %v4813_v21 = vpop.f32.mrb[3].mxu1 }
  0xf2   :  { %v123_v20 = vpop.f32.mrb[3].mxu0 }
  0xf3   :  { %v210_v22 = vadd.f32 %v204_v14, %v121_v17  ;;  %v124_v39 = vadd.f32 %v5705_v12, %v123_v20 }
  0xf5   :  { %v4399_v23 = vmul.f32 -1.442695, %v210_v22 }
  0xf7   :  { %5291 = vpow2.f32 %v4399_v23  ;;  %v5752_v5 = vpop.f32.mrb[4].mxu0 }
  0xf8   :  { %v5754_v6 = vpop.f32.mrb[5].mxu0 }
  0xf9   :  { %v5756_v7 = vpop.f32.mrb[6].mxu0  ;;  %v137_v57 = vadd.f32 %v5705_v12, %v5754_v6 }
  0xfa   :  { %v5758_v8 = vpop.f32.mrb[7].mxu0 }
 0x101   :  { %v5292_v24 = vpop.eup %5291 }
 0x102   :  { %v214_v25 = vadd.f32 1.0, %v5292_v24 }
 0x104   :  { %5293 = vrcp.f32 %v214_v25 }
 0x10e   :  { %v5294_v26 = vpop.eup %5293 }
 0x10f   :  { %v217_v27 = vmul.f32 2.0, %v5294_v26  ;;  %v219_v31 = vmul.f32 0.0, %v5294_v26 }
 0x111   :  { %v4400_v28 = vadd.f32 -1.0, %v217_v27 }
 0x113   :  { %221 = vrot.lane.b32.xlu0 %v4400_v28, %s5604_s7 }
 0x185   :  { %v222_v29 = vpop.permute.xlu0 %221 }
 0x186   :  { %v224_v30 = vmul.f32 %v5294_v26, %v222_v29 }
 0x188   :  { %226 = vrot.lane.b32.xlu0 %v224_v30, %s5609_s24 }
 0x1fa   :  { %v227_v32 = vpop.permute.xlu0 %226 }
 0x1fb   :  { %v229_v33 = vadd.f32 %v227_v32, %v219_v31 }
 0x1fd   :  { %5295 = vtanh.f32 %v229_v33 }
 0x207   :  { %v5296_v34 = vpop.eup %5295 }
 0x208   :  { %232 = vrot.lane.b32.xlu1 %v5296_v34, %s5604_s7 }
 0x27a   :  { %v233_v35 = vpop.permute.xlu1 %232 }
 0x27b   :  { %v5715_v36 = vmul.f32 %v5294_v26, %v233_v35  ;;  %v132_v35 = vadd.f32 %v5710_v18, %v5705_v12 }
 0x27d   :  { %v236_v37 = vpack.c.bf16 %v5715_v36, %v5715_v36 }
 0x27f   :  { %238 = vrot.lane.b32.xlu1 %v236_v37, %s5609_s24 }
 0x2f1   :  { %v239_v38 = vpop.permute.xlu1 %238 }
 0x2f2   :  { %4819 = vmatmul.mubr.msk.bf16.vlgmr.msra.gmra.mrb[4].mxu1 %vm73_vm1, %v239_v38 }
 0x2f3   :  { %4831 = vmatpush3.bf16.msra.mxu1 %v5665_v2  ;;  %4834 = vmatprep.mubr.msk.bf16.mxu1 %vm5607_vm0, %v5606_v0 }
 0x2f4   :  { %4832 = vmatprep.subr.bf16.mxu1 %v5606_v0 }
 0x2f7   :  { %4833 = vmatpush3.bf16.msra.mxu1 %v5671_v4 }
 0x2f8   :  { %4846 = vmatprep.subr.bf16.mxu1 %v5606_v0 }
 0x3c5   :  { %v277_v40 = vpop.f32.mrb[4].mxu1 }
 0x3c6   :  { %v283_v41 = vadd.f32 %v277_v40, %v124_v39  ;;  %v4820_v42 = vpop.f32.mrb[5].mxu1 }
 0x3c7   :  { %v280_v43 = vpop.f32.mrb[6].mxu1 }
 0x3c8   :  { %v4402_v44 = vmul.f32 -1.442695, %v283_v41  ;;  %v4821_v45 = vpop.f32.mrb[7].mxu1 }
 0x3ca   :  { %5297 = vpow2.f32 %v4402_v44 }
 0x3d4   :  { %v5298_v46 = vpop.eup %5297 }
 0x3d5   :  { %v287_v47 = vadd.f32 1.0, %v5298_v46 }
 0x3d7   :  { %5299 = vrcp.f32 %v287_v47 }
 0x3e1   :  { %v5300_v48 = vpop.eup %5299 }
 0x3e2   :  { %v290_v49 = vmul.f32 2.0, %v5300_v48  ;;  %v292_v53 = vmul.f32 %v5300_v48, %v229_v33 }
 0x3e4   :  { %v4403_v50 = vadd.f32 -1.0, %v290_v49 }
 0x3e6   :  { %294 = vrot.lane.b32.xlu0 %v4403_v50, %s5604_s7 }
 0x458   :  { %v295_v51 = vpop.permute.xlu0 %294 }
 0x459   :  { %v297_v52 = vmul.f32 %v5300_v48, %v295_v51 }
 0x45b   :  { %299 = vrot.lane.b32.xlu1 %v297_v52, %s5609_s24 }
 0x4cd   :  { %v300_v54 = vpop.permute.xlu1 %299 }
 0x4ce   :  { %v302_v55 = vadd.f32 %v300_v54, %v292_v53 }
 0x4d0   :  { %5301 = vtanh.f32 %v302_v55 }
 0x4da   :  { %v5302_v62 = vpop.eup %5301 }
 0x4db   :  { %305 = vrot.lane.b32.xlu0 %v5302_v62, %s5604_s7 }
 0x54d   :  { %v306_v63 = vpop.permute.xlu0 %305 }
 0x54e   :  { %v5747_v1 = vmul.f32 %v5300_v48, %v306_v63 }
 0x550   :  { %v309_v3 = vpack.c.bf16 %v5747_v1, %v5747_v1 }
 0x552   :  { %311 = vrot.lane.b32.xlu1 %v309_v3, %s5609_s24 }
 0x5c4   :  { %v312_v9 = vpop.permute.xlu1 %311 }
 0x5c5   :  { %4827 = vmatmul.mubr.msk.bf16.vlgmr.msra.gmra.mrb[8].mxu0 %vm73_vm1, %v312_v9 }
 0x5c6   :  { %4839 = vmatpush3.bf16.msra.mxu0 %v5665_v2  ;;  %4842 = vmatprep.mubr.msk.bf16.mxu0 %vm5607_vm0, %v5606_v0 }
 0x5c7   :  { %4840 = vmatprep.subr.bf16.mxu0 %v5606_v0 }
 0x5ca   :  { %4841 = vmatpush3.bf16.msra.mxu0 %v5671_v4 }
 0x5cb   :  { %4854 = vmatprep.subr.bf16.mxu0 %v5606_v0 }
 0x698   :  { %v350_v14 = vpop.f32.mrb[8].mxu0 }
 0x699   :  { %v356_v15 = vadd.f32 %v350_v14, %v129_v10  ;;  %v4828_v16 = vpop.f32.mrb[9].mxu0 }
 0x69a   :  { %v353_v17 = vpop.f32.mrb[10].mxu0 }
 0x69b   :  { %v4405_v19 = vmul.f32 -1.442695, %v356_v15  ;;  %v4829_v20 = vpop.f32.mrb[11].mxu0 }
 0x69d   :  { %5303 = vpow2.f32 %v4405_v19 }
 0x6a7   :  { %v5304_v21 = vpop.eup %5303 }
 0x6a8   :  { %v360_v22 = vadd.f32 1.0, %v5304_v21 }
 0x6aa   :  { %5305 = vrcp.f32 %v360_v22 }
 0x6b4   :  { %v5306_v23 = vpop.eup %5305 }
 0x6b5   :  { %v363_v24 = vmul.f32 2.0, %v5306_v23  ;;  %v365_v13 = vmul.f32 %v5306_v23, %v302_v55 }
 0x6b7   :  { %v4406_v25 = vadd.f32 -1.0, %v363_v24 }
 0x6b9   :  { %367 = vrot.lane.b32.xlu0 %v4406_v25, %s5604_s7 }
 0x72b   :  { %v368_v26 = vpop.permute.xlu0 %367 }
 0x72c   :  { %v370_v27 = vmul.f32 %v5306_v23, %v368_v26  ;;  %v140_v26 = vadd.f32 %v5705_v12, %v5758_v8 }
 0x72e   :  { %372 = vrot.lane.b32.xlu1 %v370_v27, %s5609_s24 }
 0x7a0   :  { %v373_v28 = vpop.permute.xlu1 %372 }
 0x7a1   :  { %v375_v29 = vadd.f32 %v373_v28, %v365_v13 }
 0x7a3   :  { %5307 = vtanh.f32 %v375_v29 }
 0x7ad   :  { %v5308_v30 = vpop.eup %5307 }
 0x7ae   :  { %378 = vrot.lane.b32.xlu0 %v5308_v30, %s5604_s7 }
 0x820   :  { %v379_v31 = vpop.permute.xlu0 %378 }
 0x821   :  { %v5772_v32 = vmul.f32 %v5306_v23, %v379_v31 }
 0x823   :  { %v382_v33 = vpack.c.bf16 %v5772_v32, %v5772_v32 }
 0x825   :  { %384 = vrot.lane.b32.xlu1 %v382_v33, %s5609_s24 }
 0x897   :  { %v385_v34 = vpop.permute.xlu1 %384 }
 0x898   :  { %4835 = vmatmul.mubr.msk.bf16.vlgmr.msra.gmra.mrb[8].mxu1 %vm73_vm1, %v385_v34 }
 0x899   :  { %4847 = vmatpush3.bf16.msra.mxu1 %v5665_v2  ;;  %4850 = vmatprep.mubr.msk.bf16.mxu1 %vm5607_vm0, %v5606_v0 }
 0x89a   :  { %4848 = vmatprep.subr.bf16.mxu1 %v5606_v0 }
 0x89d   :  { %4849 = vmatpush3.bf16.msra.mxu1 %v5671_v4 }
 0x89e   :  { %4862 = vmatprep.subr.bf16.mxu1 %v5606_v0 }
 0x96b   :  { %v423_v37 = vpop.f32.mrb[8].mxu1 }
 0x96c   :  { %v429_v38 = vadd.f32 %v423_v37, %v132_v35  ;;  %v4836_v39 = vpop.f32.mrb[9].mxu1 }
 0x96d   :  { %v426_v40 = vpop.f32.mrb[10].mxu1 }
 0x96e   :  { %v4408_v41 = vmul.f32 -1.442695, %v429_v38  ;;  %v4837_v42 = vpop.f32.mrb[11].mxu1 }
 0x970   :  { %5309 = vpow2.f32 %v4408_v41 }
 0x97a   :  { %v5310_v43 = vpop.eup %5309 }
 0x97b   :  { %v433_v44 = vadd.f32 1.0, %v5310_v43 }
 0x97d   :  { %5311 = vrcp.f32 %v433_v44 }
 0x987   :  { %v5312_v45 = vpop.eup %5311 }
 0x988   :  { %v436_v46 = vmul.f32 2.0, %v5312_v45  ;;  %v438_v18 = vmul.f32 %v5312_v45, %v375_v29 }
 0x98a   :  { %v4409_v47 = vadd.f32 -1.0, %v436_v46  ;;  %v145_v46 = vadd.f32 %v5752_v5, %v5705_v12 }
 0x98c   :  { %440 = vrot.lane.b32.xlu0 %v4409_v47, %s5604_s7 }
 0x9fe   :  { %v441_v48 = vpop.permute.xlu0 %440 }
 0x9ff   :  { %v443_v49 = vmul.f32 %v5312_v45, %v441_v48 }
 0xa01   :  { %445 = vrot.lane.b32.xlu1 %v443_v49, %s5609_s24 }
 0xa73   :  { %v446_v50 = vpop.permute.xlu1 %445 }
 0xa74   :  { %v448_v51 = vadd.f32 %v446_v50, %v438_v18 }
 0xa76   :  { %5313 = vtanh.f32 %v448_v51 }
 0xa80   :  { %v5314_v52 = vpop.eup %5313 }
 0xa81   :  { %451 = vrot.lane.b32.xlu0 %v5314_v52, %s5604_s7 }
 0xaf3   :  { %v452_v53 = vpop.permute.xlu0 %451 }
 0xaf4   :  { %v5789_v54 = vmul.f32 %v5312_v45, %v452_v53 }
 0xaf6   :  { %v455_v55 = vpack.c.bf16 %v5789_v54, %v5789_v54 }
 0xaf8   :  { %457 = vrot.lane.b32.xlu1 %v455_v55, %s5609_s24 }
 0xb6a   :  { %v458_v56 = vpop.permute.xlu1 %457 }
 0xb6b   :  { %4843 = vmatmul.mubr.msk.bf16.vlgmr.msra.gmra.mrb[12].mxu0 %vm73_vm1, %v458_v56 }
 0xb6c   :  { %4855 = vmatpush3.bf16.msra.mxu0 %v5665_v2  ;;  %4858 = vmatprep.mubr.msk.bf16.mxu0 %vm5607_vm0, %v5606_v0 }
 0xb6d   :  { %4856 = vmatprep.subr.bf16.mxu0 %v5606_v0 }
 0xb70   :  { %4857 = vmatpush3.bf16.msra.mxu0 %v5671_v4 }
 0xc3e   :  { %v496_v58 = vpop.f32.mrb[12].mxu0 }
 0xc3f   :  { %v502_v59 = vadd.f32 %v496_v58, %v137_v57  ;;  %v4844_v60 = vpop.f32.mrb[13].mxu0 }
 0xc40   :  { %v499_v61 = vpop.f32.mrb[14].mxu0 }
 0xc41   :  { %v4411_v62 = vmul.f32 -1.442695, %v502_v59  ;;  %v4845_v63 = vpop.f32.mrb[15].mxu0 }
 0xc43   :  { %5315 = vpow2.f32 %v4411_v62  ;;  %v5269_v62 = vld [vmem:[%s6698_s1 + $0x10] sm:$0xff]  }
 0xc44   :  { %4870 = vmatprep.subr.bf16.mxu0 %v5269_v62 }
 0xc4d   :  { %v5316_v3 = vpop.eup %5315 }
 0xc4e   :  { %v506_v9 = vadd.f32 1.0, %v5316_v3  ;;  %v747_v3 = vpack.c.bf16 %v5747_v1, %v5715_v36  ;;  %v748_v36 = vpack.c.bf16 %v5789_v54, %v5772_v32  ;;  %v5855_v1 = vld [vmem:[#allocation2 + $0x10] sm:$0xff]   ;;  %v148_v32 = vadd.f32 %v5756_v7, %v5705_v12 }
 0xc50   :  { %5317 = vrcp.f32 %v506_v9  ;;  %v5270_v9 = vld [vmem:[%s6698_s1 + $0x18] sm:$0xff]  }
 0xc5a   :  { %v5318_v10 = vpop.eup %5317 }
 0xc5b   :  { %v509_v14 = vmul.f32 2.0, %v5318_v10  ;;  %v511_v6 = vmul.f32 %v5318_v10, %v448_v51 }
 0xc5d   :  { %v4412_v15 = vadd.f32 -1.0, %v509_v14 }
 0xc5f   :  { %513 = vrot.lane.b32.xlu0 %v4412_v15, %s5604_s7 }
 0xcd1   :  { %v514_v16 = vpop.permute.xlu0 %513 }
 0xcd2   :  { %v516_v17 = vmul.f32 %v5318_v10, %v514_v16 }
 0xcd4   :  { %518 = vrot.lane.b32.xlu1 %v516_v17, %s5609_s24 }
 0xd46   :  { %v519_v19 = vpop.permute.xlu1 %518 }
 0xd47   :  { %v521_v20 = vadd.f32 %v519_v19, %v511_v6  ;;  %v5859_v6 = vld [vmem:[#allocation2 + $0x18] sm:$0xff]  }
 0xd49   :  { %5319 = vtanh.f32 %v521_v20 }
 0xd53   :  { %v5320_v21 = vpop.eup %5319 }
 0xd54   :  { %524 = vrot.lane.b32.xlu0 %v5320_v21, %s5604_s7 }
 0xdc6   :  { %v525_v22 = vpop.permute.xlu0 %524 }
 0xdc7   :  { %v5805_v23 = vmul.f32 %v5318_v10, %v525_v22 }
 0xdc9   :  { %v528_v24 = vpack.c.bf16 %v5805_v23, %v5805_v23 }
 0xdcb   :  { %530 = vrot.lane.b32.xlu1 %v528_v24, %s5609_s24 }
 0xe3d   :  { %v531_v25 = vpop.permute.xlu1 %530 }
 0xe3e   :  { %4851 = vmatmul.mubr.msk.bf16.vlgmr.msra.gmra.mrb[12].mxu1 %vm73_vm1, %v531_v25  ;;  %v5883_v25 = vld [vmem:[%s6700_s3 + $0x1] ss:$0 sm:$0xff] }
 0xe3f   :  { %4863 = vmatpush3.bf16.msra.mxu1 %v5665_v2  ;;  %4866 = vmatprep.mubr.msk.bf16.mxu1 %vm5607_vm0, %v5606_v0 }
 0xe40   :  { %4864 = vmatprep.subr.bf16.mxu1 %v5606_v0 }
 0xe43   :  { %4865 = vmatpush3.bf16.msra.mxu1 %v5671_v4 }
 0xe44   :  { %4882 = vmatprep.subr.bf16.mxu1 %v5606_v0 }
 0xf11   :  { %v569_v27 = vpop.f32.mrb[12].mxu1 }
 0xf12   :  { %v575_v13 = vadd.f32 %v569_v27, %v140_v26  ;;  %v4852_v28 = vpop.f32.mrb[13].mxu1 }
 0xf13   :  { %v572_v29 = vpop.f32.mrb[14].mxu1 }
 0xf14   :  { %v4414_v30 = vmul.f32 -1.442695, %v575_v13  ;;  %v4853_v31 = vpop.f32.mrb[15].mxu1 }
 0xf16   :  { %5321 = vpow2.f32 %v4414_v30 }
 0xf20   :  { %v5322_v2 = vpop.eup %5321 }
 0xf21   :  { %v579_v33 = vadd.f32 1.0, %v5322_v2 }
 0xf23   :  { %5323 = vrcp.f32 %v579_v33 }
 0xf2d   :  { %v5324_v34 = vpop.eup %5323 }
 0xf2e   :  { %v582_v35 = vmul.f32 2.0, %v5324_v34  ;;  %v584_v8 = vmul.f32 %v5324_v34, %v521_v20 }
 0xf30   :  { %v4415_v37 = vadd.f32 -1.0, %v582_v35 }
 0xf32   :  { %586 = vrot.lane.b32.xlu0 %v4415_v37, %s5604_s7 }
 0xfa4   :  { %v587_v4 = vpop.permute.xlu0 %586 }
 0xfa5   :  { %v589_v38 = vmul.f32 %v5324_v34, %v587_v4 }
 0xfa7   :  { %591 = vrot.lane.b32.xlu1 %v589_v38, %s5609_s24 }
0x1019   :  { %v592_v39 = vpop.permute.xlu1 %591 }
0x101a   :  { %v594_v40 = vadd.f32 %v592_v39, %v584_v8 }
0x101c   :  { %5325 = vtanh.f32 %v594_v40 }
0x1026   :  { %v5326_v41 = vpop.eup %5325 }
0x1027   :  { %597 = vrot.lane.b32.xlu0 %v5326_v41, %s5604_s7 }
0x1099   :  { %v598_v42 = vpop.permute.xlu0 %597 }
0x109a   :  { %v5822_v43 = vmul.f32 %v5324_v34, %v598_v42 }
0x109c   :  { %v601_v44 = vpack.c.bf16 %v5822_v43, %v5822_v43 }
0x109e   :  { %603 = vrot.lane.b32.xlu1 %v601_v44, %s5609_s24 }
0x1110   :  { %v604_v45 = vpop.permute.xlu1 %603 }
0x1111   :  { %4859 = vmatmul.mubr.msk.bf16.vlgmr.msra.gmra.mrb[16].mxu0 %vm73_vm1, %v604_v45 }
0x1112   :  { %4871 = vmatpush3.bf16.msra.mxu0 %v5269_v62 }
0x1113   :  { %4872 = vmatprep.subr.bf16.mxu0 %v5270_v9 }
0x1116   :  { %4873 = vmatpush3.bf16.msra.mxu0 %v5270_v9 }
0x1117   :  { %4898 = vmatprep.subr.bf16.mxu0 %v5606_v0 }
0x11e4   :  { %v642_v47 = vpop.f32.mrb[16].mxu0 }
0x11e5   :  { %v648_v48 = vadd.f32 %v642_v47, %v145_v46  ;;  %v4860_v49 = vpop.f32.mrb[17].mxu0 }
0x11e6   :  { %v645_v18 = vpop.f32.mrb[18].mxu0 }
0x11e7   :  { %v4417_v50 = vmul.f32 -1.442695, %v648_v48  ;;  %v4861_v51 = vpop.f32.mrb[19].mxu0 }
0x11e9   :  { %5327 = vpow2.f32 %v4417_v50 }
0x11f3   :  { %v5328_v52 = vpop.eup %5327 }
0x11f4   :  { %v652_v53 = vadd.f32 1.0, %v5328_v52 }
0x11f6   :  { %5329 = vrcp.f32 %v652_v53 }
0x1200   :  { %v5330_v55 = vpop.eup %5329 }
0x1201   :  { %v655_v56 = vmul.f32 2.0, %v5330_v55  ;;  %v657_v5 = vmul.f32 %v5330_v55, %v594_v40 }
0x1203   :  { %v4418_v57 = vadd.f32 -1.0, %v655_v56 }
0x1205   :  { %659 = vrot.lane.b32.xlu0 %v4418_v57, %s5604_s7 }
0x1277   :  { %v660_v58 = vpop.permute.xlu0 %659 }
0x1278   :  { %v662_v59 = vmul.f32 %v5330_v55, %v660_v58 }
0x127a   :  { %664 = vrot.lane.b32.xlu1 %v662_v59, %s5609_s24 }
0x12ec   :  { %v665_v60 = vpop.permute.xlu1 %664 }
0x12ed   :  { %v5832_v61 = vadd.f32 %v665_v60, %v657_v5  ;;  %v749_v60 = vpack.c.bf16 %v5822_v43, %v5805_v23 }
0x12ef   :  { %5331 = vtanh.f32 %v5832_v61 }
0x12f9   :  { %v5332_v63 = vpop.eup %5331 }
0x12fa   :  { %670 = vrot.lane.b32.xlu0 %v5332_v63, %s5604_s7 }
0x12fe   :  { %768 = vrot.lane.b32.xlu0 %v747_v3, %s5609_s24 }
0x136c   :  { %v671_v10 = vpop.permute.xlu0 %670 }
0x136d   :  { %v5846_v14 = vmul.f32 %v5330_v55, %v671_v10 }
0x136f   :  { %v674_v15 = vpack.c.bf16 %v5846_v14, %v5846_v14 }
0x1370   :  { %v769_v16 = vpop.permute.xlu0 %768 }
0x1371   :  { %676 = vrot.lane.b32.xlu1 %v674_v15, %s5609_s24  ;;  %4874 = vmatprep.mubr.msk.bf16.mxu0 %vm73_vm1, %v769_v16 }
0x1375   :  { %770 = vrot.lane.b32.xlu1 %v748_v36, %s5609_s24 }
0x13e3   :  { %v677_v17 = vpop.permute.xlu1 %676 }
0x13e4   :  { %4867 = vmatmul.mubr.msk.bf16.vlgmr.msra.gmra.mrb[16].mxu1 %vm73_vm1, %v677_v17 }
0x13e5   :  { %4883 = vmatpush3.bf16.msra.mxu1 %v5855_v1  ;;  %4886 = vmatprep.mubr.msk.bf16.mxu1 %vm5607_vm0, %v5606_v0 }
0x13e6   :  { %4884 = vmatprep.subr.bf16.mxu1 %v5606_v0 }
0x13e7   :  { %v771_v19 = vpop.permute.xlu1 %770 }
0x13e8   :  { %4875 = vmatmul.mubr.msk.bf16.vlgmr.msra.gmra.mrb[20].mxu0 %vm73_vm1, %v771_v19 }
0x13e9   :  { %4885 = vmatpush3.bf16.msra.mxu1 %v5859_v6  ;;  %4899 = vmatpush3.bf16.msra.mxu0 %v5855_v1 }
0x13ea   :  { %4890 = vmatprep.subr.bf16.mxu1 %v5606_v0  ;;  %4900 = vmatprep.subr.bf16.mxu0 %v5606_v0 }
0x13ec   :  { %4887 = vmatmul.mubr.bf16.vlgmr.msra.gmra.mrb[20].mxu1 %v5608_v11 }
0x13ed   :  { %4891 = vmatpush3.bf16.msra.mxu1 %v5855_v1  ;;  %4894 = vmatprep.mubr.msk.bf16.mxu1 %vm5607_vm0, %v5606_v0 }
0x13ee   :  { %4892 = vmatprep.subr.bf16.mxu1 %v5606_v0  ;;  %4901 = vmatpush3.bf16.msra.mxu0 %v5859_v6 }
0x13ef   :  { %4914 = vmatprep.subr.bf16.mxu0 %v5606_v0 }
0x13f1   :  { %4893 = vmatpush3.bf16.msra.mxu1 %v5859_v6 }
0x13f2   :  { %4906 = vmatprep.subr.bf16.mxu1 %v5606_v0 }
0x14b7   :  { %v715_v54 = vpop.f32.mrb[16].mxu1 }
0x14b8   :  { %v721_v20 = vadd.f32 %v715_v54, %v148_v32  ;;  %v4868_v21 = vpop.f32.mrb[17].mxu1 }
0x14b9   :  { %v718_v22 = vpop.f32.mrb[18].mxu1 }
0x14ba   :  { %v4869_v24 = vpop.f32.mrb[19].mxu1  ;;  %v4420_v40 = vmul.f32 -1.442695, %v721_v20 }
0x14bb   :  { %v5885_v26 = vpop.f32.mrb[20].mxu0 }
0x14bc   :  { %v834_v27 = vpop.f32.mrb[21].mxu0 }
0x14bd   :  { %v835_v13 = vadd.f32 %v5883_v25, %v834_v27  ;;  %v5888_v28 = vpop.f32.mrb[22].mxu0 }
0x14be   :  { %v837_v29 = vpop.f32.mrb[23].mxu0 }
0x14bf   :  { %v916_v30 = vpop.f32.mrb[20].mxu1  ;;  %v838_v63 = vadd.f32 %v5883_v25, %v837_v29 }
0x14c0   :  { %v922_v12 = vadd.f32 %v916_v30, %v835_v13  ;;  %v4888_v7 = vpop.f32.mrb[21].mxu1 }
0x14c1   :  { %v919_v31 = vpop.f32.mrb[22].mxu1 }
0x14c2   :  { %v4436_v2 = vmul.f32 -1.442695, %v922_v12  ;;  %v4889_v33 = vpop.f32.mrb[23].mxu1 }
0x14c4   :  { %5333 = vpow2.f32 %v4436_v2 }
0x14ce   :  { %v5334_v34 = vpop.eup %5333 }
0x14cf   :  { %v926_v35 = vadd.f32 1.0, %v5334_v34 }
0x14d1   :  { %5335 = vrcp.f32 %v926_v35 }
0x14d2   :  { %5337 = vpow2.f32 %v4420_v40 }
0x14db   :  { %v5336_v37 = vpop.eup %5335 }
0x14dc   :  { %v929_v4 = vmul.f32 2.0, %v5336_v37  ;;  %v5338_v41 = vpop.eup %5337  ;;  %v931_v44 = vmul.f32 0.0, %v5336_v37 }
0x14dd   :  { %v725_v42 = vadd.f32 1.0, %v5338_v41 }
0x14de   :  { %v4437_v38 = vadd.f32 -1.0, %v929_v4 }
0x14df   :  { %5339 = vrcp.f32 %v725_v42 }
0x14e0   :  { %933 = vrot.lane.b32.xlu0 %v4437_v38, %s5604_s7 }
0x14e9   :  { %v5340_v47 = vpop.eup %5339 }
0x14ea   :  { %v728_v48 = vmul.f32 2.0, %v5340_v47  ;;  %v730_v57 = vmul.f32 %v5340_v47, %v5832_v61 }
0x14ec   :  { %v4421_v18 = vadd.f32 -1.0, %v728_v48 }
0x1552   :  { %v934_v8 = vpop.permute.xlu0 %933 }
0x1553   :  { %v936_v39 = vmul.f32 %v5336_v37, %v934_v8 }
0x1555   :  { %938 = vrot.lane.b32.xlu1 %v936_v39, %s5609_s24 }
0x15c7   :  { %v939_v45 = vpop.permute.xlu1 %938 }
0x15c8   :  { %v941_v46 = vadd.f32 %v939_v45, %v931_v44 }
0x15ca   :  { %5341 = vtanh.f32 %v941_v46 }
0x15d4   :  { %v5342_v49 = vpop.eup %5341 }
0x15d5   :  { %944 = vrot.lane.b32.xlu0 %v5342_v49, %s5604_s7 }
0x15d9   :  { %732 = vrot.lane.b32.xlu0 %v4421_v18, %s5604_s7 }
0x1647   :  { %v945_v50 = vpop.permute.xlu0 %944 }
0x1648   :  { %v5894_v51 = vmul.f32 %v5336_v37, %v945_v50  ;;  %v843_v37 = vadd.f32 %v5885_v26, %v5883_v25 }
0x164a   :  { %v948_v52 = vpack.c.bf16 %v5894_v51, %v5894_v51 }
0x164b   :  { %v733_v53 = vpop.permute.xlu0 %732 }
0x164c   :  { %v735_v55 = vmul.f32 %v5340_v47, %v733_v53  ;;  %950 = vrot.lane.b32.xlu1 %v948_v52, %s5609_s24 }
0x164e   :  { %737 = vrot.lane.b32.xlu0 %v735_v55, %s5609_s24 }
0x16be   :  { %v951_v56 = vpop.permute.xlu1 %950 }
0x16bf   :  { %4895 = vmatmul.mubr.msk.bf16.vlgmr.msra.gmra.mrb[24].mxu1 %vm73_vm1, %v951_v56 }
0x16c0   :  { %v738_v58 = vpop.permute.xlu0 %737  ;;  %4907 = vmatpush3.bf16.msra.mxu1 %v5855_v1  ;;  %4910 = vmatprep.mubr.msk.bf16.mxu1 %vm5607_vm0, %v5606_v0 }
0x16c1   :  { %v740_v59 = vadd.f32 %v738_v58, %v730_v57  ;;  %4908 = vmatprep.subr.bf16.mxu1 %v5606_v0  ;;  %v846_v58 = vadd.f32 %v5888_v28, %v5883_v25 }
0x16c3   :  { %5343 = vtanh.f32 %v740_v59 }
0x16c4   :  { %4909 = vmatpush3.bf16.msra.mxu1 %v5859_v6 }
0x16c5   :  { %4922 = vmatprep.subr.bf16.mxu1 %v5606_v0 }
0x16cd   :  { %v5344_v5 = vpop.eup %5343 }
0x16ce   :  { %743 = vrot.lane.b32.xlu0 %v5344_v5, %s5604_s7 }
0x16d2   :  { %772 = vrot.lane.b32.xlu0 %v749_v60, %s5609_s24 }
0x1740   :  { %v744_v61 = vpop.permute.xlu0 %743 }
0x1741   :  { %v746_v27 = vmul.f32 %v5340_v47, %v744_v61 }
0x1743   :  { %v750_v29 = vpack.c.bf16 %v746_v27, %v5846_v14 }
0x1744   :  { %v773_v62 = vpop.permute.xlu0 %772 }
0x1745   :  { %4878 = vmatprep.mubr.msk.bf16.mxu0 %vm73_vm1, %v773_v62 }
0x1792   :  { %v989_v3 = vpop.f32.mrb[24].mxu1 }
0x1793   :  { %v995_v9 = vadd.f32 %v989_v3, %v838_v63  ;;  %v4896_v10 = vpop.f32.mrb[25].mxu1 }
0x1794   :  { %v992_v15 = vpop.f32.mrb[26].mxu1 }
0x1795   :  { %v4439_v16 = vmul.f32 -1.442695, %v995_v9  ;;  %v4897_v36 = vpop.f32.mrb[27].mxu1 }
0x1797   :  { %5345 = vpow2.f32 %v4439_v16 }
0x17a1   :  { %v5346_v17 = vpop.eup %5345 }
0x17a2   :  { %v999_v19 = vadd.f32 1.0, %v5346_v17 }
0x17a4   :  { %5347 = vrcp.f32 %v999_v19 }
0x17ae   :  { %v5348_v32 = vpop.eup %5347 }
0x17af   :  { %v1002_v23 = vmul.f32 2.0, %v5348_v32  ;;  %v1004_v21 = vmul.f32 %v5348_v32, %v941_v46 }
0x17b1   :  { %v4440_v43 = vadd.f32 -1.0, %v1002_v23 }
0x17b3   :  { %1006 = vrot.lane.b32.xlu1 %v4440_v43, %s5604_s7 }
0x1825   :  { %v1007_v54 = vpop.permute.xlu1 %1006 }
0x1826   :  { %v1009_v20 = vmul.f32 %v5348_v32, %v1007_v54 }
0x1828   :  { %1011 = vrot.lane.b32.xlu1 %v1009_v20, %s5609_s24 }
0x189a   :  { %v1012_v22 = vpop.permute.xlu1 %1011 }
0x189b   :  { %v1014_v24 = vadd.f32 %v1012_v22, %v1004_v21 }
0x189d   :  { %5349 = vtanh.f32 %v1014_v24 }
0x18a7   :  { %v5350_v13 = vpop.eup %5349 }
0x18a8   :  { %1017 = vrot.lane.b32.xlu1 %v5350_v13, %s5604_s7 }
0x18ac   :  { %774 = vrot.lane.b32.xlu1 %v750_v29, %s5609_s24 }
0x191a   :  { %v1018_v30 = vpop.permute.xlu1 %1017 }
0x191b   :  { %v5919_v12 = vmul.f32 %v5348_v32, %v1018_v30 }
0x191d   :  { %v1021_v7 = vpack.c.bf16 %v5919_v12, %v5919_v12 }
0x191e   :  { %v775_v31 = vpop.permute.xlu1 %774 }
0x191f   :  { %1023 = vrot.lane.b32.xlu0 %v1021_v7, %s5609_s24  ;;  %4879 = vmatmul.mubr.msk.bf16.gmra.mrb[24].mxu0 %vm73_vm1, %v775_v31 }
0x1920   :  { %4902 = vmatprep.mubr.msk.bf16.mxu0 %vm5607_vm0, %v5606_v0 }
0x1991   :  { %v1024_v2 = vpop.permute.xlu0 %1023 }
0x1992   :  { %4903 = vmatmul.mubr.msk.bf16.vlgmr.msra.gmra.mrb[28].mxu0 %vm73_vm1, %v1024_v2 }
0x1993   :  { %4915 = vmatpush3.bf16.msra.mxu0 %v5855_v1  ;;  %4918 = vmatprep.mubr.msk.bf16.mxu0 %vm5607_vm0, %v5606_v0 }
0x1994   :  { %4916 = vmatprep.subr.bf16.mxu0 %v5606_v0 }
0x1997   :  { %4917 = vmatpush3.bf16.msra.mxu0 %v5859_v6 }
0x1998   :  { %4930 = vmatprep.subr.bf16.mxu0 %v5606_v0 }
0x19f2   :  { %v5934_v14 = vpop.f32.mrb[24].mxu0 }
0x19f3   :  { %v5936_v33 = vpop.f32.mrb[25].mxu0 }
0x19f4   :  { %v5938_v34 = vpop.f32.mrb[26].mxu0  ;;  %v851_v22 = vadd.f32 %v5883_v25, %v5936_v33 }
0x19f5   :  { %v5940_v35 = vpop.f32.mrb[27].mxu0 }
0x1a65   :  { %v1062_v4 = vpop.f32.mrb[28].mxu0 }
0x1a66   :  { %v1068_v38 = vadd.f32 %v1062_v4, %v843_v37  ;;  %v4904_v8 = vpop.f32.mrb[29].mxu0 }
0x1a67   :  { %v1065_v39 = vpop.f32.mrb[30].mxu0 }
0x1a68   :  { %v4442_v40 = vmul.f32 -1.442695, %v1068_v38  ;;  %v4905_v41 = vpop.f32.mrb[31].mxu0 }
0x1a6a   :  { %5351 = vpow2.f32 %v4442_v40 }
0x1a74   :  { %v5352_v42 = vpop.eup %5351 }
0x1a75   :  { %v1072_v44 = vadd.f32 1.0, %v5352_v42 }
0x1a77   :  { %5353 = vrcp.f32 %v1072_v44 }
0x1a81   :  { %v5354_v45 = vpop.eup %5353 }
0x1a82   :  { %v1075_v46 = vmul.f32 2.0, %v5354_v45  ;;  %v1077_v26 = vmul.f32 %v5354_v45, %v1014_v24 }
0x1a84   :  { %v4443_v47 = vadd.f32 -1.0, %v1075_v46 }
0x1a86   :  { %1079 = vrot.lane.b32.xlu1 %v4443_v47, %s5604_s7 }
0x1af8   :  { %v1080_v48 = vpop.permute.xlu1 %1079 }
0x1af9   :  { %v1082_v49 = vmul.f32 %v5354_v45, %v1080_v48  ;;  %v854_v48 = vadd.f32 %v5883_v25, %v5940_v35 }
0x1afb   :  { %1084 = vrot.lane.b32.xlu0 %v1082_v49, %s5609_s24 }
0x1b6d   :  { %v1085_v18 = vpop.permute.xlu0 %1084 }
0x1b6e   :  { %v1087_v50 = vadd.f32 %v1085_v18, %v1077_v26 }
0x1b70   :  { %5355 = vtanh.f32 %v1087_v50 }
0x1b7a   :  { %v5356_v52 = vpop.eup %5355 }
0x1b7b   :  { %1090 = vrot.lane.b32.xlu1 %v5356_v52, %s5604_s7 }
0x1bed   :  { %v1091_v53 = vpop.permute.xlu1 %1090 }
0x1bee   :  { %v5947_v55 = vmul.f32 %v5354_v45, %v1091_v53 }
0x1bf0   :  { %v1094_v56 = vpack.c.bf16 %v5947_v55, %v5947_v55 }
0x1bf2   :  { %1096 = vrot.lane.b32.xlu0 %v1094_v56, %s5609_s24 }
0x1c64   :  { %v1097_v57 = vpop.permute.xlu0 %1096 }
0x1c65   :  { %4911 = vmatmul.mubr.msk.bf16.vlgmr.msra.gmra.mrb[28].mxu1 %vm73_vm1, %v1097_v57 }
0x1c66   :  { %4923 = vmatpush3.bf16.msra.mxu1 %v5855_v1  ;;  %4926 = vmatprep.mubr.msk.bf16.mxu1 %vm5607_vm0, %v5606_v0 }
0x1c67   :  { %4924 = vmatprep.subr.bf16.mxu1 %v5606_v0 }
0x1c6a   :  { %4925 = vmatpush3.bf16.msra.mxu1 %v5859_v6 }
0x1c6b   :  { %4938 = vmatprep.subr.bf16.mxu1 %v5606_v0 }
0x1d38   :  { %v1135_v59 = vpop.f32.mrb[28].mxu1 }
0x1d39   :  { %v1141_v5 = vadd.f32 %v1135_v59, %v846_v58  ;;  %v4912_v60 = vpop.f32.mrb[29].mxu1 }
0x1d3a   :  { %v1138_v61 = vpop.f32.mrb[30].mxu1 }
0x1d3b   :  { %v4445_v62 = vmul.f32 -1.442695, %v1141_v5  ;;  %v4913_v63 = vpop.f32.mrb[31].mxu1 }
0x1d3d   :  { %5357 = vpow2.f32 %v4445_v62 }
0x1d47   :  { %v5358_v3 = vpop.eup %5357 }
0x1d48   :  { %v1145_v9 = vadd.f32 1.0, %v5358_v3 }
0x1d4a   :  { %5359 = vrcp.f32 %v1145_v9 }
0x1d54   :  { %v5360_v10 = vpop.eup %5359 }
0x1d55   :  { %v1148_v15 = vmul.f32 2.0, %v5360_v10  ;;  %v1150_v28 = vmul.f32 %v5360_v10, %v1087_v50 }
0x1d57   :  { %v4446_v16 = vadd.f32 -1.0, %v1148_v15  ;;  %v859_v15 = vadd.f32 %v5934_v14, %v5883_v25 }
0x1d59   :  { %1152 = vrot.lane.b32.xlu1 %v4446_v16, %s5604_s7 }
0x1dcb   :  { %v1153_v36 = vpop.permute.xlu1 %1152 }
0x1dcc   :  { %v1155_v17 = vmul.f32 %v5360_v10, %v1153_v36 }
0x1dce   :  { %1157 = vrot.lane.b32.xlu0 %v1155_v17, %s5609_s24 }
0x1e40   :  { %v1158_v19 = vpop.permute.xlu0 %1157 }
0x1e41   :  { %v1160_v32 = vadd.f32 %v1158_v19, %v1150_v28 }
0x1e43   :  { %5361 = vtanh.f32 %v1160_v32 }
0x1e4d   :  { %v5362_v23 = vpop.eup %5361 }
0x1e4e   :  { %1163 = vrot.lane.b32.xlu1 %v5362_v23, %s5604_s7 }
0x1ec0   :  { %v1164_v43 = vpop.permute.xlu1 %1163 }
0x1ec1   :  { %v5964_v54 = vmul.f32 %v5360_v10, %v1164_v43 }
0x1ec3   :  { %v1167_v20 = vpack.c.bf16 %v5964_v54, %v5964_v54 }
0x1ec5   :  { %1169 = vrot.lane.b32.xlu0 %v1167_v20, %s5609_s24 }
0x1f37   :  { %v1170_v21 = vpop.permute.xlu0 %1169 }
0x1f38   :  { %4919 = vmatmul.mubr.msk.bf16.vlgmr.msra.gmra.mrb[32].mxu0 %vm73_vm1, %v1170_v21 }
0x1f39   :  { %4931 = vmatpush3.bf16.msra.mxu0 %v5855_v1  ;;  %4934 = vmatprep.mubr.msk.bf16.mxu0 %vm5607_vm0, %v5606_v0 }
0x1f3a   :  { %4932 = vmatprep.subr.bf16.mxu0 %v5606_v0 }
0x1f3d   :  { %4933 = vmatpush3.bf16.msra.mxu0 %v5859_v6 }
0x200b   :  { %v1208_v24 = vpop.f32.mrb[32].mxu0 }
0x200c   :  { %v1214_v27 = vadd.f32 %v1208_v24, %v851_v22  ;;  %v4920_v13 = vpop.f32.mrb[33].mxu0 }
0x200d   :  { %v1211_v29 = vpop.f32.mrb[34].mxu0 }
0x200e   :  { %v4448_v30 = vmul.f32 -1.442695, %v1214_v27  ;;  %v4921_v7 = vpop.f32.mrb[35].mxu0 }
0x2010   :  { %5363 = vpow2.f32 %v4448_v30  ;;  %v5273_v30 = vld [vmem:[%s6698_s1 + $0x20] sm:$0xff]  }
0x2011   :  { %4946 = vmatprep.subr.bf16.mxu0 %v5273_v30 }
0x201a   :  { %v5364_v31 = vpop.eup %5363 }
0x201b   :  { %v1218_v2 = vadd.f32 1.0, %v5364_v31  ;;  %v1459_v31 = vpack.c.bf16 %v5919_v12, %v5894_v51  ;;  %v1460_v51 = vpack.c.bf16 %v5964_v54, %v5947_v55  ;;  %v6030_v12 = vld [vmem:[#allocation2 + $0x20] sm:$0xff]   ;;  %v862_v55 = vadd.f32 %v5938_v34, %v5883_v25 }
0x201d   :  { %5365 = vrcp.f32 %v1218_v2  ;;  %v5274_v2 = vld [vmem:[%s6698_s1 + $0x28] sm:$0xff]  }
0x2027   :  { %v5366_v37 = vpop.eup %5365 }
0x2028   :  { %v1221_v4 = vmul.f32 2.0, %v5366_v37  ;;  %v1223_v33 = vmul.f32 %v5366_v37, %v1160_v32 }
0x202a   :  { %v4449_v38 = vadd.f32 -1.0, %v1221_v4 }
0x202c   :  { %1225 = vrot.lane.b32.xlu1 %v4449_v38, %s5604_s7 }
0x209e   :  { %v1226_v8 = vpop.permute.xlu1 %1225 }
0x209f   :  { %v1228_v39 = vmul.f32 %v5366_v37, %v1226_v8 }
0x20a1   :  { %1230 = vrot.lane.b32.xlu0 %v1228_v39, %s5609_s24 }
0x2113   :  { %v1231_v40 = vpop.permute.xlu0 %1230 }
0x2114   :  { %v1233_v41 = vadd.f32 %v1231_v40, %v1223_v33  ;;  %v6034_v33 = vld [vmem:[#allocation2 + $0x28] sm:$0xff]  }
0x2116   :  { %5367 = vtanh.f32 %v1233_v41 }
0x2120   :  { %v5368_v42 = vpop.eup %5367 }
0x2121   :  { %1236 = vrot.lane.b32.xlu1 %v5368_v42, %s5604_s7 }
0x2193   :  { %v1237_v44 = vpop.permute.xlu1 %1236 }
0x2194   :  { %v5980_v45 = vmul.f32 %v5366_v37, %v1237_v44 }
0x2196   :  { %v1240_v46 = vpack.c.bf16 %v5980_v45, %v5980_v45 }
0x2198   :  { %1242 = vrot.lane.b32.xlu0 %v1240_v46, %s5609_s24 }
0x220a   :  { %v1243_v47 = vpop.permute.xlu0 %1242 }
0x220b   :  { %4927 = vmatmul.mubr.msk.bf16.vlgmr.msra.gmra.mrb[32].mxu1 %vm73_vm1, %v1243_v47  ;;  %v6058_v47 = vld [vmem:[%s6700_s3 + $0x2] ss:$0 sm:$0xff] }
0x220c   :  { %4939 = vmatpush3.bf16.msra.mxu1 %v5855_v1  ;;  %4942 = vmatprep.mubr.msk.bf16.mxu1 %vm5607_vm0, %v5606_v0 }
0x220d   :  { %4940 = vmatprep.subr.bf16.mxu1 %v5606_v0 }
0x2210   :  { %4941 = vmatpush3.bf16.msra.mxu1 %v5859_v6 }
0x2211   :  { %4958 = vmatprep.subr.bf16.mxu1 %v5606_v0 }
0x22de   :  { %v1281_v49 = vpop.f32.mrb[32].mxu1 }
0x22df   :  { %v1287_v26 = vadd.f32 %v1281_v49, %v854_v48  ;;  %v4928_v18 = vpop.f32.mrb[33].mxu1 }
0x22e0   :  { %v1284_v50 = vpop.f32.mrb[34].mxu1 }
0x22e1   :  { %v4451_v52 = vmul.f32 -1.442695, %v1287_v26  ;;  %v4929_v53 = vpop.f32.mrb[35].mxu1 }
0x22e3   :  { %5369 = vpow2.f32 %v4451_v52 }
0x22ed   :  { %v5370_v1 = vpop.eup %5369 }
0x22ee   :  { %v1291_v56 = vadd.f32 1.0, %v5370_v1 }
0x22f0   :  { %5371 = vrcp.f32 %v1291_v56 }
0x22fa   :  { %v5372_v57 = vpop.eup %5371 }
0x22fb   :  { %v1294_v58 = vmul.f32 2.0, %v5372_v57  ;;  %v1296_v35 = vmul.f32 %v5372_v57, %v1233_v41 }
0x22fd   :  { %v4452_v59 = vadd.f32 -1.0, %v1294_v58 }
0x22ff   :  { %1298 = vrot.lane.b32.xlu1 %v4452_v59, %s5604_s7 }
0x2371   :  { %v1299_v6 = vpop.permute.xlu1 %1298 }
0x2372   :  { %v1301_v5 = vmul.f32 %v5372_v57, %v1299_v6 }
0x2374   :  { %1303 = vrot.lane.b32.xlu0 %v1301_v5, %s5609_s24 }
0x23e6   :  { %v1304_v60 = vpop.permute.xlu0 %1303 }
0x23e7   :  { %v1306_v61 = vadd.f32 %v1304_v60, %v1296_v35 }
0x23e9   :  { %5373 = vtanh.f32 %v1306_v61 }
0x23f3   :  { %v5374_v62 = vpop.eup %5373 }
0x23f4   :  { %1309 = vrot.lane.b32.xlu1 %v5374_v62, %s5604_s7 }
0x2466   :  { %v1310_v63 = vpop.permute.xlu1 %1309 }
0x2467   :  { %v5997_v3 = vmul.f32 %v5372_v57, %v1310_v63 }
0x2469   :  { %v1313_v9 = vpack.c.bf16 %v5997_v3, %v5997_v3 }
0x246b   :  { %1315 = vrot.lane.b32.xlu0 %v1313_v9, %s5609_s24 }
0x24dd   :  { %v1316_v10 = vpop.permute.xlu0 %1315 }
0x24de   :  { %4935 = vmatmul.mubr.msk.bf16.vlgmr.msra.gmra.mrb[36].mxu0 %vm73_vm1, %v1316_v10 }
0x24df   :  { %4947 = vmatpush3.bf16.msra.mxu0 %v5273_v30 }
0x24e0   :  { %4948 = vmatprep.subr.bf16.mxu0 %v5274_v2 }
0x24e3   :  { %4949 = vmatpush3.bf16.msra.mxu0 %v5274_v2 }
0x24e4   :  { %4974 = vmatprep.subr.bf16.mxu0 %v5606_v0 }
0x25b1   :  { %v1354_v16 = vpop.f32.mrb[36].mxu0 }
0x25b2   :  { %v1360_v36 = vadd.f32 %v1354_v16, %v859_v15  ;;  %v4936_v17 = vpop.f32.mrb[37].mxu0 }
0x25b3   :  { %v1357_v28 = vpop.f32.mrb[38].mxu0 }
0x25b4   :  { %v4454_v19 = vmul.f32 -1.442695, %v1360_v36  ;;  %v4937_v32 = vpop.f32.mrb[39].mxu0 }
0x25b6   :  { %5375 = vpow2.f32 %v4454_v19 }
0x25c0   :  { %v5376_v23 = vpop.eup %5375 }
0x25c1   :  { %v1364_v43 = vadd.f32 1.0, %v5376_v23 }
0x25c3   :  { %5377 = vrcp.f32 %v1364_v43 }
0x25cd   :  { %v5378_v20 = vpop.eup %5377 }
0x25ce   :  { %v1367_v21 = vmul.f32 2.0, %v5378_v20  ;;  %v1369_v14 = vmul.f32 %v5378_v20, %v1306_v61 }
0x25d0   :  { %v4455_v22 = vadd.f32 -1.0, %v1367_v21 }
0x25d2   :  { %1371 = vrot.lane.b32.xlu1 %v4455_v22, %s5604_s7 }
0x2644   :  { %v1372_v24 = vpop.permute.xlu1 %1371 }
0x2645   :  { %v1374_v27 = vmul.f32 %v5378_v20, %v1372_v24 }
0x2647   :  { %1376 = vrot.lane.b32.xlu0 %v1374_v27, %s5609_s24 }
0x26b9   :  { %v1377_v13 = vpop.permute.xlu0 %1376 }
0x26ba   :  { %v6007_v29 = vadd.f32 %v1377_v13, %v1369_v14  ;;  %v1461_v13 = vpack.c.bf16 %v5997_v3, %v5980_v45 }
0x26bc   :  { %5379 = vtanh.f32 %v6007_v29 }
0x26c6   :  { %v5380_v7 = vpop.eup %5379 }
0x26c7   :  { %1382 = vrot.lane.b32.xlu1 %v5380_v7, %s5604_s7 }
0x26cb   :  { %1480 = vrot.lane.b32.xlu1 %v1459_v31, %s5609_s24 }
0x2739   :  { %v1383_v37 = vpop.permute.xlu1 %1382 }
0x273a   :  { %v6021_v4 = vmul.f32 %v5378_v20, %v1383_v37 }
0x273c   :  { %v1386_v38 = vpack.c.bf16 %v6021_v4, %v6021_v4 }
0x273d   :  { %v1481_v8 = vpop.permute.xlu1 %1480 }
0x273e   :  { %1388 = vrot.lane.b32.xlu0 %v1386_v38, %s5609_s24  ;;  %4950 = vmatprep.mubr.msk.bf16.mxu0 %vm73_vm1, %v1481_v8 }
0x2742   :  { %1482 = vrot.lane.b32.xlu0 %v1460_v51, %s5609_s24 }
0x27b0   :  { %v1389_v39 = vpop.permute.xlu0 %1388 }
0x27b1   :  { %4943 = vmatmul.mubr.msk.bf16.vlgmr.msra.gmra.mrb[36].mxu1 %vm73_vm1, %v1389_v39 }
0x27b2   :  { %4959 = vmatpush3.bf16.msra.mxu1 %v6030_v12  ;;  %4962 = vmatprep.mubr.msk.bf16.mxu1 %vm5607_vm0, %v5606_v0 }
0x27b3   :  { %4960 = vmatprep.subr.bf16.mxu1 %v5606_v0 }
0x27b4   :  { %v1483_v40 = vpop.permute.xlu0 %1482 }
0x27b5   :  { %4951 = vmatmul.mubr.msk.bf16.vlgmr.msra.gmra.mrb[40].mxu0 %vm73_vm1, %v1483_v40 }
0x27b6   :  { %4961 = vmatpush3.bf16.msra.mxu1 %v6034_v33  ;;  %4975 = vmatpush3.bf16.msra.mxu0 %v6030_v12 }
0x27b7   :  { %4966 = vmatprep.subr.bf16.mxu1 %v5606_v0  ;;  %4976 = vmatprep.subr.bf16.mxu0 %v5606_v0 }
0x27b9   :  { %4963 = vmatmul.mubr.bf16.vlgmr.msra.gmra.mrb[40].mxu1 %v5608_v11 }
0x27ba   :  { %4967 = vmatpush3.bf16.msra.mxu1 %v6030_v12  ;;  %4970 = vmatprep.mubr.msk.bf16.mxu1 %vm5607_vm0, %v5606_v0 }
0x27bb   :  { %4968 = vmatprep.subr.bf16.mxu1 %v5606_v0  ;;  %4977 = vmatpush3.bf16.msra.mxu0 %v6034_v33 }
0x27bc   :  { %4990 = vmatprep.subr.bf16.mxu0 %v5606_v0 }
0x27be   :  { %4969 = vmatpush3.bf16.msra.mxu1 %v6034_v33 }
0x27bf   :  { %4982 = vmatprep.subr.bf16.mxu1 %v5606_v0 }
0x2884   :  { %v1427_v54 = vpop.f32.mrb[36].mxu1 }
0x2885   :  { %v1433_v41 = vadd.f32 %v1427_v54, %v862_v55  ;;  %v4944_v42 = vpop.f32.mrb[37].mxu1 }
0x2886   :  { %v1430_v44 = vpop.f32.mrb[38].mxu1 }
0x2887   :  { %v4945_v46 = vpop.f32.mrb[39].mxu1  ;;  %v4457_v61 = vmul.f32 -1.442695, %v1433_v41 }
0x2888   :  { %v6060_v48 = vpop.f32.mrb[40].mxu0 }
0x2889   :  { %v1546_v49 = vpop.f32.mrb[41].mxu0 }
0x288a   :  { %v1547_v26 = vadd.f32 %v6058_v47, %v1546_v49  ;;  %v6063_v18 = vpop.f32.mrb[42].mxu0 }
0x288b   :  { %v1549_v50 = vpop.f32.mrb[43].mxu0 }
0x288c   :  { %v1628_v52 = vpop.f32.mrb[40].mxu1  ;;  %v1550_v7 = vadd.f32 %v6058_v47, %v1549_v50 }
0x288d   :  { %v1634_v25 = vadd.f32 %v1628_v52, %v1547_v26  ;;  %v4964_v34 = vpop.f32.mrb[41].mxu1 }
0x288e   :  { %v1631_v53 = vpop.f32.mrb[42].mxu1 }
0x288f   :  { %v4473_v1 = vmul.f32 -1.442695, %v1634_v25  ;;  %v4965_v56 = vpop.f32.mrb[43].mxu1 }
0x2891   :  { %5381 = vpow2.f32 %v4473_v1 }
0x289b   :  { %v5382_v57 = vpop.eup %5381 }
0x289c   :  { %v1638_v58 = vadd.f32 1.0, %v5382_v57 }
0x289e   :  { %5383 = vrcp.f32 %v1638_v58 }
0x289f   :  { %5385 = vpow2.f32 %v4457_v61 }
0x28a8   :  { %v5384_v59 = vpop.eup %5383 }
0x28a9   :  { %v1641_v6 = vmul.f32 2.0, %v5384_v59  ;;  %v5386_v62 = vpop.eup %5385  ;;  %v1643_v9 = vmul.f32 0.0, %v5384_v59 }
0x28aa   :  { %v1437_v63 = vadd.f32 1.0, %v5386_v62 }
0x28ab   :  { %v4474_v5 = vadd.f32 -1.0, %v1641_v6 }
0x28ac   :  { %5387 = vrcp.f32 %v1437_v63 }
0x28ad   :  { %1645 = vrot.lane.b32.xlu1 %v4474_v5, %s5604_s7 }
0x28b6   :  { %v5388_v16 = vpop.eup %5387 }
0x28b7   :  { %v1440_v36 = vmul.f32 2.0, %v5388_v16  ;;  %v1442_v22 = vmul.f32 %v5388_v16, %v6007_v29 }
0x28b9   :  { %v4458_v28 = vadd.f32 -1.0, %v1440_v36 }
0x291f   :  { %v1646_v35 = vpop.permute.xlu1 %1645 }
0x2920   :  { %v1648_v60 = vmul.f32 %v5384_v59, %v1646_v35 }
0x2922   :  { %1650 = vrot.lane.b32.xlu0 %v1648_v60, %s5609_s24 }
0x2994   :  { %v1651_v10 = vpop.permute.xlu0 %1650 }
0x2995   :  { %v1653_v15 = vadd.f32 %v1651_v10, %v1643_v9 }
0x2997   :  { %5389 = vtanh.f32 %v1653_v15 }
0x29a1   :  { %v5390_v17 = vpop.eup %5389 }
0x29a2   :  { %1656 = vrot.lane.b32.xlu1 %v5390_v17, %s5604_s7 }
0x29a6   :  { %1444 = vrot.lane.b32.xlu1 %v4458_v28, %s5604_s7 }
0x2a14   :  { %v1657_v19 = vpop.permute.xlu1 %1656 }
0x2a15   :  { %v1659_v32 = vmul.f32 %v5384_v59, %v1657_v19  ;;  %v1555_v59 = vadd.f32 %v6060_v48, %v6058_v47 }
0x2a17   :  { %v1660_v23 = vpack.c.bf16 %v1659_v32, %v1659_v32 }
0x2a18   :  { %v1445_v43 = vpop.permute.xlu1 %1444 }
0x2a19   :  { %v1447_v20 = vmul.f32 %v5388_v16, %v1445_v43  ;;  %1662 = vrot.lane.b32.xlu0 %v1660_v23, %s5609_s24 }
0x2a1b   :  { %1449 = vrot.lane.b32.xlu1 %v1447_v20, %s5609_s24 }
0x2a8b   :  { %v1663_v21 = vpop.permute.xlu0 %1662 }
0x2a8c   :  { %4971 = vmatmul.mubr.msk.bf16.vlgmr.msra.gmra.mrb[44].mxu1 %vm73_vm1, %v1663_v21 }
0x2a8d   :  { %v1450_v24 = vpop.permute.xlu1 %1449  ;;  %4983 = vmatpush3.bf16.msra.mxu1 %v6030_v12  ;;  %4986 = vmatprep.mubr.msk.bf16.mxu1 %vm5607_vm0, %v5606_v0 }
0x2a8e   :  { %v1452_v27 = vadd.f32 %v1450_v24, %v1442_v22  ;;  %4984 = vmatprep.subr.bf16.mxu1 %v5606_v0  ;;  %v1558_v22 = vadd.f32 %v6063_v18, %v6058_v47 }
0x2a90   :  { %5391 = vtanh.f32 %v1452_v27 }
0x2a91   :  { %4985 = vmatpush3.bf16.msra.mxu1 %v6034_v33 }
0x2a92   :  { %4998 = vmatprep.subr.bf16.mxu1 %v5606_v0 }
0x2a9a   :  { %v5392_v14 = vpop.eup %5391 }
0x2a9b   :  { %1455 = vrot.lane.b32.xlu1 %v5392_v14, %s5604_s7 }
0x2a9f   :  { %1484 = vrot.lane.b32.xlu1 %v1461_v13, %s5609_s24 }
0x2b0d   :  { %v1456_v29 = vpop.permute.xlu1 %1455 }
0x2b0e   :  { %v1458_v49 = vmul.f32 %v5388_v16, %v1456_v29 }
0x2b10   :  { %v1462_v50 = vpack.c.bf16 %v1458_v49, %v6021_v4 }
0x2b11   :  { %v1485_v30 = vpop.permute.xlu1 %1484 }
0x2b12   :  { %4954 = vmatprep.mubr.msk.bf16.mxu0 %vm73_vm1, %v1485_v30 }
0x2b5f   :  { %v1701_v31 = vpop.f32.mrb[44].mxu1 }
0x2b60   :  { %v1707_v2 = vadd.f32 %v1701_v31, %v1550_v7  ;;  %v4972_v37 = vpop.f32.mrb[45].mxu1 }
0x2b61   :  { %v1704_v38 = vpop.f32.mrb[46].mxu1 }
0x2b62   :  { %v4476_v8 = vmul.f32 -1.442695, %v1707_v2  ;;  %v4973_v51 = vpop.f32.mrb[47].mxu1 }
0x2b64   :  { %5393 = vpow2.f32 %v4476_v8 }
0x2b6e   :  { %v5394_v39 = vpop.eup %5393 }
0x2b6f   :  { %v1711_v40 = vadd.f32 1.0, %v5394_v39 }
0x2b71   :  { %5395 = vrcp.f32 %v1711_v40 }
0x2b7b   :  { %v5396_v55 = vpop.eup %5395 }
0x2b7c   :  { %v1714_v45 = vmul.f32 2.0, %v5396_v55  ;;  %v1716_v42 = vmul.f32 %v5396_v55, %v1653_v15 }
0x2b7e   :  { %v4477_v3 = vadd.f32 -1.0, %v1714_v45 }
0x2b80   :  { %1718 = vrot.lane.b32.xlu0 %v4477_v3, %s5604_s7 }
0x2bf2   :  { %v1719_v54 = vpop.permute.xlu0 %1718 }
0x2bf3   :  { %v1721_v41 = vmul.f32 %v5396_v55, %v1719_v54 }
0x2bf5   :  { %1723 = vrot.lane.b32.xlu0 %v1721_v41, %s5609_s24 }
0x2c67   :  { %v1724_v44 = vpop.permute.xlu0 %1723 }
0x2c68   :  { %v1726_v46 = vadd.f32 %v1724_v44, %v1716_v42 }
0x2c6a   :  { %5397 = vtanh.f32 %v1726_v46 }
0x2c74   :  { %v5398_v26 = vpop.eup %5397 }
0x2c75   :  { %1729 = vrot.lane.b32.xlu0 %v5398_v26, %s5604_s7 }
0x2c79   :  { %1486 = vrot.lane.b32.xlu0 %v1462_v50, %s5609_s24 }
0x2ce7   :  { %v1730_v52 = vpop.permute.xlu0 %1729 }
0x2ce8   :  { %v1732_v25 = vmul.f32 %v5396_v55, %v1730_v52 }
0x2cea   :  { %v1733_v34 = vpack.c.bf16 %v1732_v25, %v1732_v25 }
0x2ceb   :  { %v1487_v53 = vpop.permute.xlu0 %1486 }
0x2cec   :  { %1735 = vrot.lane.b32.xlu1 %v1733_v34, %s5609_s24  ;;  %4955 = vmatmul.mubr.msk.bf16.gmra.mrb[44].mxu0 %vm73_vm1, %v1487_v53 }
0x2ced   :  { %4978 = vmatprep.mubr.msk.bf16.mxu0 %vm5607_vm0, %v5606_v0 }
0x2d5e   :  { %v1736_v1 = vpop.permute.xlu1 %1735 }
0x2d5f   :  { %4979 = vmatmul.mubr.msk.bf16.vlgmr.msra.gmra.mrb[48].mxu0 %vm73_vm1, %v1736_v1 }
0x2d60   :  { %4991 = vmatpush3.bf16.msra.mxu0 %v6030_v12  ;;  %4994 = vmatprep.mubr.msk.bf16.mxu0 %vm5607_vm0, %v5606_v0 }
0x2d61   :  { %4992 = vmatprep.subr.bf16.mxu0 %v5606_v0 }
0x2d64   :  { %4993 = vmatpush3.bf16.msra.mxu0 %v6034_v33 }
0x2d65   :  { %5006 = vmatprep.subr.bf16.mxu0 %v5606_v0 }
0x2dbf   :  { %v6101_v4 = vpop.f32.mrb[44].mxu0 }
0x2dc0   :  { %v6103_v56 = vpop.f32.mrb[45].mxu0 }
0x2dc1   :  { %v6105_v57 = vpop.f32.mrb[46].mxu0  ;;  %v1563_v42 = vadd.f32 %v6058_v47, %v6103_v56 }
0x2dc2   :  { %v6107_v58 = vpop.f32.mrb[47].mxu0 }
0x2e32   :  { %v1774_v6 = vpop.f32.mrb[48].mxu0 }
0x2e33   :  { %v1780_v5 = vadd.f32 %v1774_v6, %v1555_v59  ;;  %v4980_v35 = vpop.f32.mrb[49].mxu0 }
0x2e34   :  { %v1777_v60 = vpop.f32.mrb[50].mxu0 }
0x2e35   :  { %v4479_v61 = vmul.f32 -1.442695, %v1780_v5  ;;  %v4981_v62 = vpop.f32.mrb[51].mxu0 }
0x2e37   :  { %5399 = vpow2.f32 %v4479_v61 }
0x2e41   :  { %v5400_v63 = vpop.eup %5399 }
0x2e42   :  { %v1784_v9 = vadd.f32 1.0, %v5400_v63 }
0x2e44   :  { %5401 = vrcp.f32 %v1784_v9 }
0x2e4e   :  { %v5402_v10 = vpop.eup %5401 }
0x2e4f   :  { %v1787_v15 = vmul.f32 2.0, %v5402_v10  ;;  %v1789_v48 = vmul.f32 %v5402_v10, %v1726_v46 }
0x2e51   :  { %v4480_v16 = vadd.f32 -1.0, %v1787_v15  ;;  %v1566_v15 = vadd.f32 %v6058_v47, %v6107_v58 }
0x2e53   :  { %1791 = vrot.lane.b32.xlu0 %v4480_v16, %s5604_s7 }
0x2ec5   :  { %v1792_v36 = vpop.permute.xlu0 %1791 }
0x2ec6   :  { %v1794_v17 = vmul.f32 %v5402_v10, %v1792_v36 }
0x2ec8   :  { %1796 = vrot.lane.b32.xlu1 %v1794_v17, %s5609_s24 }
0x2f3a   :  { %v1797_v28 = vpop.permute.xlu1 %1796 }
0x2f3b   :  { %v1799_v19 = vadd.f32 %v1797_v28, %v1789_v48 }
0x2f3d   :  { %5403 = vtanh.f32 %v1799_v19 }
0x2f47   :  { %v5404_v32 = vpop.eup %5403 }
0x2f48   :  { %1802 = vrot.lane.b32.xlu0 %v5404_v32, %s5604_s7 }
0x2fba   :  { %v1803_v23 = vpop.permute.xlu0 %1802 }
0x2fbb   :  { %v1805_v43 = vmul.f32 %v5402_v10, %v1803_v23 }
0x2fbd   :  { %v1806_v20 = vpack.c.bf16 %v1805_v43, %v1805_v43 }
0x2fbf   :  { %1808 = vrot.lane.b32.xlu1 %v1806_v20, %s5609_s24 }
0x3031   :  { %v1809_v21 = vpop.permute.xlu1 %1808 }
0x3032   :  { %4987 = vmatmul.mubr.msk.bf16.vlgmr.msra.gmra.mrb[48].mxu1 %vm73_vm1, %v1809_v21 }
0x3033   :  { %4999 = vmatpush3.bf16.msra.mxu1 %v6030_v12  ;;  %5002 = vmatprep.mubr.msk.bf16.mxu1 %vm5607_vm0, %v5606_v0 }
0x3034   :  { %5000 = vmatprep.subr.bf16.mxu1 %v5606_v0 }
0x3037   :  { %5001 = vmatpush3.bf16.msra.mxu1 %v6034_v33 }
0x3038   :  { %5014 = vmatprep.subr.bf16.mxu1 %v5606_v0 }
0x3105   :  { %v1847_v24 = vpop.f32.mrb[48].mxu1 }
0x3106   :  { %v1853_v27 = vadd.f32 %v1847_v24, %v1558_v22  ;;  %v4988_v14 = vpop.f32.mrb[49].mxu1 }
0x3107   :  { %v1850_v13 = vpop.f32.mrb[50].mxu1 }
0x3108   :  { %v4482_v29 = vmul.f32 -1.442695, %v1853_v27  ;;  %v4989_v30 = vpop.f32.mrb[51].mxu1 }
0x310a   :  { %5405 = vpow2.f32 %v4482_v29 }
0x3114   :  { %v5406_v7 = vpop.eup %5405 }
0x3115   :  { %v1857_v31 = vadd.f32 1.0, %v5406_v7  ;;  %v1571_v7 = vadd.f32 %v6101_v4, %v6058_v47 }
0x3117   :  { %5407 = vrcp.f32 %v1857_v31 }
0x3121   :  { %v5408_v2 = vpop.eup %5407 }
0x3122   :  { %v1860_v37 = vmul.f32 2.0, %v5408_v2  ;;  %v1862_v18 = vmul.f32 %v5408_v2, %v1799_v19 }
0x3124   :  { %v4483_v38 = vadd.f32 -1.0, %v1860_v37 }
0x3126   :  { %1864 = vrot.lane.b32.xlu0 %v4483_v38, %s5604_s7 }
0x3198   :  { %v1865_v8 = vpop.permute.xlu0 %1864 }
0x3199   :  { %v1867_v51 = vmul.f32 %v5408_v2, %v1865_v8 }
0x319b   :  { %1869 = vrot.lane.b32.xlu1 %v1867_v51, %s5609_s24 }
0x320d   :  { %v1870_v39 = vpop.permute.xlu1 %1869 }
0x320e   :  { %v1872_v40 = vadd.f32 %v1870_v39, %v1862_v18 }
0x3210   :  { %5409 = vtanh.f32 %v1872_v40 }
0x321a   :  { %v5410_v55 = vpop.eup %5409 }
0x321b   :  { %1875 = vrot.lane.b32.xlu0 %v5410_v55, %s5604_s7 }
0x328d   :  { %v1876_v45 = vpop.permute.xlu0 %1875 }
0x328e   :  { %v1878_v3 = vmul.f32 %v5408_v2, %v1876_v45 }
0x3290   :  { %v1879_v54 = vpack.c.bf16 %v1878_v3, %v1878_v3 }
0x3292   :  { %1881 = vrot.lane.b32.xlu1 %v1879_v54, %s5609_s24 }
0x3304   :  { %v1882_v41 = vpop.permute.xlu1 %1881 }
0x3305   :  { %4995 = vmatmul.mubr.msk.bf16.vlgmr.msra.gmra.mrb[52].mxu0 %vm73_vm1, %v1882_v41 }
0x3306   :  { %5007 = vmatpush3.bf16.msra.mxu0 %v6030_v12  ;;  %5010 = vmatprep.mubr.msk.bf16.mxu0 %vm5607_vm0, %v5606_v0 }
0x3307   :  { %5008 = vmatprep.subr.bf16.mxu0 %v5606_v0 }
0x330a   :  { %5009 = vmatpush3.bf16.msra.mxu0 %v6034_v33 }
0x330b   :  { %5022 = vmatprep.subr.bf16.mxu0 %v5606_v0 }
0x33d8   :  { %v1920_v44 = vpop.f32.mrb[52].mxu0 }
0x33d9   :  { %v1926_v46 = vadd.f32 %v1920_v44, %v1563_v42  ;;  %v4996_v49 = vpop.f32.mrb[53].mxu0 }
0x33da   :  { %v1923_v26 = vpop.f32.mrb[54].mxu0 }
0x33db   :  { %v4485_v50 = vmul.f32 -1.442695, %v1926_v46  ;;  %v4997_v52 = vpop.f32.mrb[55].mxu0 }
0x33dc   :  { %v1574_v52 = vadd.f32 %v6105_v57, %v6058_v47 }
0x33dd   :  { %5411 = vpow2.f32 %v4485_v50 }
0x33e7   :  { %v5412_v25 = vpop.eup %5411 }
0x33e8   :  { %v1930_v34 = vadd.f32 1.0, %v5412_v25 }
0x33ea   :  { %5413 = vrcp.f32 %v1930_v34 }
0x33f4   :  { %v5414_v53 = vpop.eup %5413 }
0x33f5   :  { %v1933_v1 = vmul.f32 2.0, %v5414_v53  ;;  %v1935_v56 = vmul.f32 %v5414_v53, %v1872_v40 }
0x33f7   :  { %v4486_v59 = vadd.f32 -1.0, %v1933_v1 }
0x33f9   :  { %1937 = vrot.lane.b32.xlu0 %v4486_v59, %s5604_s7 }
0x346b   :  { %v1938_v6 = vpop.permute.xlu0 %1937 }
0x346c   :  { %v1940_v5 = vmul.f32 %v5414_v53, %v1938_v6 }
0x346e   :  { %1942 = vrot.lane.b32.xlu1 %v1940_v5, %s5609_s24 }
0x34e0   :  { %v1943_v35 = vpop.permute.xlu1 %1942 }
0x34e1   :  { %v1945_v60 = vadd.f32 %v1943_v35, %v1935_v56 }
0x34e3   :  { %5415 = vtanh.f32 %v1945_v60 }
0x34ed   :  { %v5416_v61 = vpop.eup %5415 }
0x34ee   :  { %1948 = vrot.lane.b32.xlu0 %v5416_v61, %s5604_s7 }
0x3560   :  { %v1949_v62 = vpop.permute.xlu0 %1948 }
0x3561   :  { %v1951_v63 = vmul.f32 %v5414_v53, %v1949_v62 }
0x3563   :  { %v1952_v9 = vpack.c.bf16 %v1951_v63, %v1951_v63 }
0x3565   :  { %1954 = vrot.lane.b32.xlu1 %v1952_v9, %s5609_s24 }
0x35d7   :  { %v1955_v10 = vpop.permute.xlu1 %1954 }
0x35d8   :  { %5003 = vmatmul.mubr.msk.bf16.vlgmr.msra.gmra.mrb[52].mxu1 %vm73_vm1, %v1955_v10  ;;  %v5277_v10 = vld [vmem:[%s6698_s1 + $0x30] sm:$0xff]  }
0x35d9   :  { %5015 = vmatpush3.bf16.msra.mxu1 %v6030_v12  ;;  %5018 = vmatprep.mubr.msk.bf16.mxu1 %vm5607_vm0, %v5606_v0 }
0x35da   :  { %5016 = vmatprep.subr.bf16.mxu1 %v5606_v0 }
0x35dd   :  { %5017 = vmatpush3.bf16.msra.mxu1 %v6034_v33 }
0x35de   :  { %5030 = vmatprep.subr.bf16.mxu1 %v5606_v0 }
0x36ab   :  { %v1993_v16 = vpop.f32.mrb[52].mxu1 }
0x36ac   :  { %v1999_v36 = vadd.f32 %v1993_v16, %v1566_v15  ;;  %v5004_v17 = vpop.f32.mrb[53].mxu1  ;;  %v6173_v15 = vld [vmem:[#allocation2 + $0x30] sm:$0xff]   ;;  %v5279_v16 = vld [vmem:[%s6698_s1 + $0x38] sm:$0xff]  }
0x36ad   :  { %v1996_v48 = vpop.f32.mrb[54].mxu1 }
0x36ae   :  { %v4488_v28 = vmul.f32 -1.442695, %v1999_v36  ;;  %v5005_v19 = vpop.f32.mrb[55].mxu1  ;;  %v6179_v36 = vld [vmem:[#allocation2 + $0x38] sm:$0xff]  }
0x36b0   :  { %5417 = vpow2.f32 %v4488_v28 }
0x36ba   :  { %v5418_v12 = vpop.eup %5417 }
0x36bb   :  { %v2003_v32 = vadd.f32 1.0, %v5418_v12 }
0x36bd   :  { %5419 = vrcp.f32 %v2003_v32 }
0x36c7   :  { %v5420_v23 = vpop.eup %5419 }
0x36c8   :  { %v2006_v43 = vmul.f32 2.0, %v5420_v23  ;;  %v2008_v58 = vmul.f32 %v5420_v23, %v1945_v60 }
0x36ca   :  { %v4489_v20 = vadd.f32 -1.0, %v2006_v43 }
0x36cc   :  { %2010 = vrot.lane.b32.xlu0 %v4489_v20, %s5604_s7 }
0x373e   :  { %v2011_v33 = vpop.permute.xlu0 %2010 }
0x373f   :  { %v2013_v21 = vmul.f32 %v5420_v23, %v2011_v33  ;;  %v4501_v33 = vld [vmem:[%s6700_s3 + $0x3] ss:$0 sm:$0xff] }
0x3741   :  { %2015 = vrot.lane.b32.xlu1 %v2013_v21, %s5609_s24 }
0x37b3   :  { %v2016_v22 = vpop.permute.xlu1 %2015 }
0x37b4   :  { %v2018_v24 = vadd.f32 %v2016_v22, %v2008_v58 }
0x37b6   :  { %5421 = vtanh.f32 %v2018_v24 }
0x37c0   :  { %v5422_v27 = vpop.eup %5421 }
0x37c1   :  { %2021 = vrot.lane.b32.xlu0 %v5422_v27, %s5604_s7 }
0x3833   :  { %v2022_v14 = vpop.permute.xlu0 %2021 }
0x3834   :  { %v2024_v13 = vmul.f32 %v5420_v23, %v2022_v14 }
0x3836   :  { %v2025_v29 = vpack.c.bf16 %v2024_v13, %v2024_v13 }
0x3838   :  { %2027 = vrot.lane.b32.xlu1 %v2025_v29, %s5609_s24 }
0x38aa   :  { %v2028_v30 = vpop.permute.xlu1 %2027 }
0x38ab   :  { %5011 = vmatmul.mubr.msk.bf16.vlgmr.msra.gmra.mrb[56].mxu0 %vm73_vm1, %v2028_v30 }
0x38ac   :  { %5026 = vmatprep.mubr.msk.bf16.mxu0 %vm5607_vm0, %v5606_v0  ;;  %5023 = vmatpush3.bf16.msra.mxu0 %v5277_v10 }
0x38ad   :  { %5024 = vmatprep.subr.bf16.mxu0 %v5606_v0 }
0x38b0   :  { %5025 = vmatpush3.bf16.msra.mxu0 %v5279_v16 }
0x38b1   :  { %5038 = vmatprep.subr.bf16.mxu0 %v5606_v0 }
0x397e   :  { %v2066_v31 = vpop.f32.mrb[56].mxu0 }
0x397f   :  { %v2072_v2 = vadd.f32 %v2066_v31, %v1571_v7  ;;  %v5012_v37 = vpop.f32.mrb[57].mxu0 }
0x3980   :  { %v2069_v38 = vpop.f32.mrb[58].mxu0 }
0x3981   :  { %v4491_v8 = vmul.f32 -1.442695, %v2072_v2  ;;  %v5013_v51 = vpop.f32.mrb[59].mxu0 }
0x3983   :  { %5423 = vpow2.f32 %v4491_v8 }
0x398d   :  { %v5424_v18 = vpop.eup %5423 }
0x398e   :  { %v2076_v39 = vadd.f32 1.0, %v5424_v18 }
0x3990   :  { %5425 = vrcp.f32 %v2076_v39 }
0x399a   :  { %v5426_v40 = vpop.eup %5425 }
0x399b   :  { %v2079_v55 = vmul.f32 2.0, %v5426_v40  ;;  %v2081_v4 = vmul.f32 %v5426_v40, %v2018_v24 }
0x399d   :  { %v4492_v45 = vadd.f32 -1.0, %v2079_v55 }
0x399f   :  { %2083 = vrot.lane.b32.xlu0 %v4492_v45, %s5604_s7 }
0x3a11   :  { %v2084_v3 = vpop.permute.xlu0 %2083 }
0x3a12   :  { %v2086_v54 = vmul.f32 %v5426_v40, %v2084_v3 }
0x3a14   :  { %2088 = vrot.lane.b32.xlu1 %v2086_v54, %s5609_s24 }
0x3a86   :  { %v2089_v41 = vpop.permute.xlu1 %2088 }
0x3a87   :  { %v2091_v42 = vadd.f32 %v2089_v41, %v2081_v4 }
0x3a89   :  { %5427 = vtanh.f32 %v2091_v42 }
0x3a93   :  { %v5428_v44 = vpop.eup %5427 }
0x3a94   :  { %2094 = vrot.lane.b32.xlu0 %v5428_v44, %s5604_s7 }
0x3b06   :  { %v2095_v46 = vpop.permute.xlu0 %2094 }
0x3b07   :  { %v2097_v49 = vmul.f32 %v5426_v40, %v2095_v46 }
0x3b09   :  { %v2098_v26 = vpack.c.bf16 %v2097_v49, %v2097_v49 }
0x3b0b   :  { %2100 = vrot.lane.b32.xlu1 %v2098_v26, %s5609_s24 }
0x3b7d   :  { %v2101_v50 = vpop.permute.xlu1 %2100 }
0x3b7e   :  { %5019 = vmatmul.mubr.msk.bf16.vlgmr.msra.gmra.mrb[56].mxu1 %vm73_vm1, %v2101_v50 }
0x3b7f   :  { %5034 = vmatprep.mubr.msk.bf16.mxu1 %vm5607_vm0, %v5606_v0  ;;  %5031 = vmatpush3.bf16.msra.mxu1 %v6173_v15 }
0x3b80   :  { %5032 = vmatprep.subr.bf16.mxu1 %v5606_v0 }
0x3b83   :  { %5033 = vmatpush3.bf16.msra.mxu1 %v6179_v36 }
0x3b84   :  { %5046 = vmatprep.subr.bf16.mxu1 %v5606_v0 }
0x3b86   :  { %5035 = vmatmul.mubr.bf16.vlgmr.msra.gmra.mrb[60].mxu1 %v5608_v11 }
0x3b87   :  { %5047 = vmatpush3.bf16.msra.mxu1 %v6173_v15  ;;  %5050 = vmatprep.mubr.msk.bf16.mxu1 %vm5607_vm0, %v5606_v0 }
0x3b88   :  { %5048 = vmatprep.subr.bf16.mxu1 %v5606_v0 }
0x3b8b   :  { %5049 = vmatpush3.bf16.msra.mxu1 %v6179_v36 }
0x3b8c   :  { %5062 = vmatprep.subr.bf16.mxu1 %v5606_v0 }
0x3c51   :  { %v2139_v25 = vpop.f32.mrb[56].mxu1 }
0x3c52   :  { %v2145_v34 = vadd.f32 %v2139_v25, %v1574_v52  ;;  %v5020_v53 = vpop.f32.mrb[57].mxu1 }
0x3c53   :  { %v2142_v1 = vpop.f32.mrb[58].mxu1 }
0x3c54   :  { %v4494_v59 = vmul.f32 -1.442695, %v2145_v34  ;;  %v5021_v6 = vpop.f32.mrb[59].mxu1 }
0x3c56   :  { %5429 = vpow2.f32 %v4494_v59 }
0x3c59   :  { %v2294_v12 = vpop.f32.mrb[60].mxu1 }
0x3c5a   :  { %v5036_v32 = vpop.f32.mrb[61].mxu1 }
0x3c5b   :  { %v2297_v23 = vpop.f32.mrb[62].mxu1 }
0x3c5c   :  { %v5037_v43 = vpop.f32.mrb[63].mxu1 }
0x3c60   :  { %v5430_v5 = vpop.eup %5429 }
0x3c61   :  { %v2149_v56 = vadd.f32 1.0, %v5430_v5 }
0x3c63   :  { %5431 = vrcp.f32 %v2149_v56 }
0x3c6d   :  { %v5432_v35 = vpop.eup %5431 }
0x3c6e   :  { %v2152_v60 = vmul.f32 2.0, %v5432_v35  ;;  %v2154_v47 = vmul.f32 %v5432_v35, %v2091_v42 }
0x3c70   :  { %v4495_v61 = vadd.f32 -1.0, %v2152_v60 }
0x3c72   :  { %2156 = vrot.lane.b32.xlu0 %v4495_v61, %s5604_s7 }
0x3ce4   :  { %v2157_v62 = vpop.permute.xlu0 %2156 }
0x3ce5   :  { %v2159_v63 = vmul.f32 %v5432_v35, %v2157_v62 }
0x3ce7   :  { %2161 = vrot.lane.b32.xlu1 %v2159_v63, %s5609_s24 }
0x3d59   :  { %v2162_v57 = vpop.permute.xlu1 %2161 }
0x3d5a   :  { %v2164_v9 = vadd.f32 %v2162_v57, %v2154_v47 }
0x3d5c   :  { %5433 = vtanh.f32 %v2164_v9 }
0x3d66   :  { %v5434_v17 = vpop.eup %5433 }
0x3d67   :  { %2167 = vrot.lane.b32.xlu0 %v5434_v17, %s5604_s7 }
0x3dd9   :  { %v2168_v48 = vpop.permute.xlu0 %2167 }
0x3dda   :  { %v2170_v28 = vmul.f32 %v5432_v35, %v2168_v48 }
0x3ddc   :  { %v2171_v19 = vpack.c.bf16 %v2170_v28, %v2170_v28 }
0x3dde   :  { %2186 = vrot.lane.b32.xlu1 %v2171_v19, %s5609_s24 }
0x3e50   :  { %v2187_v20 = vpop.permute.xlu1 %2186 }
0x3e51   :  { %5027 = vmatmul.mubr.msk.bf16.vlgmr.msra.gmra.mrb[60].mxu0 %vm73_vm1, %v2187_v20 }
0x3e52   :  { %5039 = vmatpush3.bf16.msra.mxu0 %v6173_v15  ;;  %5042 = vmatprep.mubr.msk.bf16.mxu0 %vm5607_vm0, %v5606_v0 }
0x3e53   :  { %5040 = vmatprep.subr.bf16.mxu0 %v5606_v0 }
0x3e56   :  { %5041 = vmatpush3.bf16.msra.mxu0 %v6179_v36 }
0x3e57   :  { %5054 = vmatprep.subr.bf16.mxu0 %v5606_v0 }
0x3f24   :  { %v2237_v21 = vpop.f32.mrb[60].mxu0 }
0x3f25   :  { %v6205_v58 = vadd.f32 %v4501_v33, %v2237_v21  ;;  %v5028_v22 = vpop.f32.mrb[61].mxu0 }
0x3f26   :  { %v2240_v24 = vpop.f32.mrb[62].mxu0 }
0x3f27   :  { %v2300_v27 = vadd.f32 %v2294_v12, %v6205_v58  ;;  %v5029_v14 = vpop.f32.mrb[63].mxu0 }
0x3f29   :  { %v4507_v13 = vmul.f32 -1.442695, %v2300_v27 }
0x3f2b   :  { %5435 = vpow2.f32 %v4507_v13 }
0x3f35   :  { %v5436_v29 = vpop.eup %5435 }
0x3f36   :  { %v2304_v30 = vadd.f32 1.0, %v5436_v29 }
0x3f38   :  { %5437 = vrcp.f32 %v2304_v30 }
0x3f42   :  { %v5438_v7 = vpop.eup %5437 }
0x3f43   :  { %v2307_v31 = vmul.f32 2.0, %v5438_v7  ;;  %v2309_v8 = vmul.f32 0.0, %v5438_v7 }
0x3f45   :  { %v4508_v2 = vadd.f32 -1.0, %v2307_v31 }
0x3f47   :  { %2311 = vrot.lane.b32.xlu0 %v4508_v2, %s5604_s7 }
0x3fb9   :  { %v2312_v37 = vpop.permute.xlu0 %2311 }
0x3fba   :  { %v2314_v38 = vmul.f32 %v5438_v7, %v2312_v37 }
0x3fbc   :  { %2316 = vrot.lane.b32.xlu1 %v2314_v38, %s5609_s24 }
0x402e   :  { %v2317_v51 = vpop.permute.xlu1 %2316 }
0x402f   :  { %v2319_v18 = vadd.f32 %v2317_v51, %v2309_v8 }
0x4031   :  { %5439 = vtanh.f32 %v2319_v18 }
0x403b   :  { %v5440_v39 = vpop.eup %5439 }
0x403c   :  { %2322 = vrot.lane.b32.xlu0 %v5440_v39, %s5604_s7 }
0x40ae   :  { %v2323_v40 = vpop.permute.xlu0 %2322 }
0x40af   :  { %v6211_v55 = vmul.f32 %v5438_v7, %v2323_v40 }
0x40b1   :  { %v2326_v45 = vpack.c.bf16 %v6211_v55, %v6211_v55 }
0x40b3   :  { %2328 = vrot.lane.b32.xlu1 %v2326_v45, %s5609_s24 }
0x4125   :  { %v2329_v3 = vpop.permute.xlu1 %2328 }
0x4126   :  { %5043 = vmatmul.mubr.msk.bf16.vlgmr.msra.gmra.mrb[64].mxu0 %vm73_vm1, %v2329_v3 }
0x4127   :  { %5055 = vmatpush3.bf16.msra.mxu0 %v6173_v15  ;;  %5058 = vmatprep.mubr.msk.bf16.mxu0 %vm5607_vm0, %v5606_v0 }
0x4128   :  { %5056 = vmatprep.subr.bf16.mxu0 %v5606_v0 }
0x412b   :  { %5057 = vmatpush3.bf16.msra.mxu0 %v6179_v36 }
0x412c   :  { %5070 = vmatprep.subr.bf16.mxu0 %v5606_v0 }
0x41f9   :  { %v2367_v54 = vpop.f32.mrb[64].mxu0 }
0x41fa   :  { %v2373_v4 = vadd.f32 %v2367_v54, %v6205_v58  ;;  %v5044_v41 = vpop.f32.mrb[65].mxu0 }
0x41fb   :  { %v2370_v42 = vpop.f32.mrb[66].mxu0 }
0x41fc   :  { %v4510_v44 = vmul.f32 -1.442695, %v2373_v4  ;;  %v5045_v46 = vpop.f32.mrb[67].mxu0 }
0x41fe   :  { %5441 = vpow2.f32 %v4510_v44 }
0x4208   :  { %v5442_v49 = vpop.eup %5441 }
0x4209   :  { %v2377_v26 = vadd.f32 1.0, %v5442_v49 }
0x420b   :  { %5443 = vrcp.f32 %v2377_v26 }
0x4215   :  { %v5444_v50 = vpop.eup %5443 }
0x4216   :  { %v2380_v52 = vmul.f32 2.0, %v5444_v50  ;;  %v2382_v1 = vmul.f32 %v5444_v50, %v2319_v18 }
0x4218   :  { %v4511_v25 = vadd.f32 -1.0, %v2380_v52 }
0x421a   :  { %2384 = vrot.lane.b32.xlu0 %v4511_v25, %s5604_s7 }
0x428c   :  { %v2385_v34 = vpop.permute.xlu0 %2384 }
0x428d   :  { %v2387_v53 = vmul.f32 %v5444_v50, %v2385_v34 }
0x428f   :  { %2389 = vrot.lane.b32.xlu1 %v2387_v53, %s5609_s24 }
0x4301   :  { %v2390_v59 = vpop.permute.xlu1 %2389 }
0x4302   :  { %v2392_v6 = vadd.f32 %v2390_v59, %v2382_v1 }
0x4304   :  { %5445 = vtanh.f32 %v2392_v6 }
0x430e   :  { %v5446_v5 = vpop.eup %5445 }
0x430f   :  { %2395 = vrot.lane.b32.xlu0 %v5446_v5, %s5604_s7 }
0x4381   :  { %v2396_v56 = vpop.permute.xlu0 %2395 }
0x4382   :  { %v6227_v35 = vmul.f32 %v5444_v50, %v2396_v56 }
0x4384   :  { %v2399_v60 = vpack.c.bf16 %v6227_v35, %v6227_v35 }
0x4386   :  { %2401 = vrot.lane.b32.xlu1 %v2399_v60, %s5609_s24 }
0x43f8   :  { %v2402_v61 = vpop.permute.xlu1 %2401 }
0x43f9   :  { %5051 = vmatmul.mubr.msk.bf16.vlgmr.msra.gmra.mrb[64].mxu1 %vm73_vm1, %v2402_v61 }
0x43fa   :  { %5063 = vmatpush3.bf16.msra.mxu1 %v6173_v15  ;;  %5066 = vmatprep.mubr.msk.bf16.mxu1 %vm5607_vm0, %v5606_v0 }
0x43fb   :  { %5064 = vmatprep.subr.bf16.mxu1 %v5606_v0 }
0x43fe   :  { %5065 = vmatpush3.bf16.msra.mxu1 %v6179_v36 }
0x43ff   :  { %5078 = vmatprep.subr.bf16.mxu1 %v5606_v0 }
0x44cc   :  { %v2440_v62 = vpop.f32.mrb[64].mxu1 }
0x44cd   :  { %v2446_v63 = vadd.f32 %v2440_v62, %v6205_v58  ;;  %v5052_v47 = vpop.f32.mrb[65].mxu1 }
0x44ce   :  { %v2443_v57 = vpop.f32.mrb[66].mxu1 }
0x44cf   :  { %v4513_v9 = vmul.f32 -1.442695, %v2446_v63  ;;  %v5053_v10 = vpop.f32.mrb[67].mxu1 }
0x44d1   :  { %5447 = vpow2.f32 %v4513_v9 }
0x44db   :  { %v5448_v16 = vpop.eup %5447 }
0x44dc   :  { %v2450_v17 = vadd.f32 1.0, %v5448_v16 }
0x44de   :  { %5449 = vrcp.f32 %v2450_v17 }
0x44e8   :  { %v5450_v48 = vpop.eup %5449 }
0x44e9   :  { %v2453_v28 = vmul.f32 2.0, %v5450_v48  ;;  %v2455_v23 = vmul.f32 %v5450_v48, %v2392_v6 }
0x44eb   :  { %v4514_v19 = vadd.f32 -1.0, %v2453_v28 }
0x44ed   :  { %2457 = vrot.lane.b32.xlu0 %v4514_v19, %s5604_s7 }
0x455f   :  { %v2458_v12 = vpop.permute.xlu0 %2457 }
0x4560   :  { %v2460_v32 = vmul.f32 %v5450_v48, %v2458_v12 }
0x4562   :  { %2462 = vrot.lane.b32.xlu1 %v2460_v32, %s5609_s24 }
0x45d4   :  { %v2463_v43 = vpop.permute.xlu1 %2462 }
0x45d5   :  { %v2465_v20 = vadd.f32 %v2463_v43, %v2455_v23 }
0x45d7   :  { %5451 = vtanh.f32 %v2465_v20 }
0x45e1   :  { %v5452_v33 = vpop.eup %5451 }
0x45e2   :  { %2468 = vrot.lane.b32.xlu0 %v5452_v33, %s5604_s7 }
0x4654   :  { %v2469_v21 = vpop.permute.xlu0 %2468 }
0x4655   :  { %v6243_v22 = vmul.f32 %v5450_v48, %v2469_v21 }
0x4657   :  { %v2472_v24 = vpack.c.bf16 %v6243_v22, %v6243_v22 }
0x4659   :  { %2474 = vrot.lane.b32.xlu1 %v2472_v24, %s5609_s24 }
0x46cb   :  { %v2475_v27 = vpop.permute.xlu1 %2474 }
0x46cc   :  { %5059 = vmatmul.mubr.msk.bf16.vlgmr.msra.gmra.mrb[68].mxu0 %vm73_vm1, %v2475_v27 }
0x46cd   :  { %5071 = vmatpush3.bf16.msra.mxu0 %v6173_v15  ;;  %5074 = vmatprep.mubr.msk.bf16.mxu0 %vm5607_vm0, %v5606_v0 }
0x46ce   :  { %5072 = vmatprep.subr.bf16.mxu0 %v5606_v0 }
0x46d1   :  { %5073 = vmatpush3.bf16.msra.mxu0 %v6179_v36 }
0x46d2   :  { %5086 = vmatprep.subr.bf16.mxu0 %v5606_v0 }
0x479f   :  { %v2513_v14 = vpop.f32.mrb[68].mxu0 }
0x47a0   :  { %v2519_v13 = vadd.f32 %v2513_v14, %v6205_v58  ;;  %v5060_v29 = vpop.f32.mrb[69].mxu0 }
0x47a1   :  { %v2516_v30 = vpop.f32.mrb[70].mxu0 }
0x47a2   :  { %v4516_v7 = vmul.f32 -1.442695, %v2519_v13  ;;  %v5061_v31 = vpop.f32.mrb[71].mxu0 }
0x47a4   :  { %5453 = vpow2.f32 %v4516_v7 }
0x47ae   :  { %v5454_v2 = vpop.eup %5453 }
0x47af   :  { %v2523_v37 = vadd.f32 1.0, %v5454_v2 }
0x47b1   :  { %5455 = vrcp.f32 %v2523_v37 }
0x47bb   :  { %v5456_v38 = vpop.eup %5455 }
0x47bc   :  { %v2526_v8 = vmul.f32 2.0, %v5456_v38  ;;  %v2528_v40 = vmul.f32 %v5456_v38, %v2465_v20 }
0x47be   :  { %v4517_v51 = vadd.f32 -1.0, %v2526_v8 }
0x47c0   :  { %2530 = vrot.lane.b32.xlu0 %v4517_v51, %s5604_s7 }
0x4832   :  { %v2531_v18 = vpop.permute.xlu0 %2530 }
0x4833   :  { %v2533_v39 = vmul.f32 %v5456_v38, %v2531_v18 }
0x4835   :  { %2535 = vrot.lane.b32.xlu1 %v2533_v39, %s5609_s24 }
0x48a7   :  { %v2536_v45 = vpop.permute.xlu1 %2535 }
0x48a8   :  { %v2538_v3 = vadd.f32 %v2536_v45, %v2528_v40 }
0x48aa   :  { %5457 = vtanh.f32 %v2538_v3 }
0x48b4   :  { %v5458_v54 = vpop.eup %5457 }
0x48b5   :  { %2541 = vrot.lane.b32.xlu0 %v5458_v54, %s5604_s7 }
0x4927   :  { %v2542_v4 = vpop.permute.xlu0 %2541 }
0x4928   :  { %v6259_v41 = vmul.f32 %v5456_v38, %v2542_v4 }
0x492a   :  { %v2545_v42 = vpack.c.bf16 %v6259_v41, %v6259_v41 }
0x492c   :  { %2547 = vrot.lane.b32.xlu1 %v2545_v42, %s5609_s24 }
0x499e   :  { %v2548_v44 = vpop.permute.xlu1 %2547 }
0x499f   :  { %5067 = vmatmul.mubr.msk.bf16.vlgmr.msra.gmra.mrb[68].mxu1 %vm73_vm1, %v2548_v44 }
0x49a0   :  { %5079 = vmatpush3.bf16.msra.mxu1 %v6173_v15  ;;  %5082 = vmatprep.mubr.msk.bf16.mxu1 %vm5607_vm0, %v5606_v0 }
0x49a1   :  { %5080 = vmatprep.subr.bf16.mxu1 %v5606_v0 }
0x49a4   :  { %5081 = vmatpush3.bf16.msra.mxu1 %v6179_v36 }
0x4a72   :  { %v2586_v46 = vpop.f32.mrb[68].mxu1 }
0x4a73   :  { %v2592_v49 = vadd.f32 %v2586_v46, %v6205_v58  ;;  %v5068_v26 = vpop.f32.mrb[69].mxu1 }
0x4a74   :  { %v2589_v50 = vpop.f32.mrb[70].mxu1 }
0x4a75   :  { %v4519_v52 = vmul.f32 -1.442695, %v2592_v49  ;;  %v5069_v25 = vpop.f32.mrb[71].mxu1  ;;  %v5281_v49 = vld [vmem:[%s6698_s1 + $0x40] sm:$0xff]   ;;  %v2837_v50 = vpack.c.bf16 %v6227_v35, %v6211_v55  ;;  %v2838_v55 = vpack.c.bf16 %v6259_v41, %v6243_v22 }
0x4a76   :  { %5094 = vmatprep.subr.bf16.mxu1 %v5281_v49  ;;  %v6322_v35 = vld [vmem:[#allocation2 + $0x40] sm:$0xff]  }
0x4a77   :  { %5459 = vpow2.f32 %v4519_v52  ;;  %v5282_v52 = vld [vmem:[%s6698_s1 + $0x48] sm:$0xff]  }
0x4a81   :  { %v5460_v34 = vpop.eup %5459 }
0x4a82   :  { %v2596_v53 = vadd.f32 1.0, %v5460_v34 }
0x4a84   :  { %5461 = vrcp.f32 %v2596_v53 }
0x4a8e   :  { %v5462_v1 = vpop.eup %5461 }
0x4a8f   :  { %v2599_v59 = vmul.f32 2.0, %v5462_v1  ;;  %v2601_v60 = vmul.f32 %v5462_v1, %v2538_v3 }
0x4a91   :  { %v4520_v6 = vadd.f32 -1.0, %v2599_v59 }
0x4a93   :  { %2603 = vrot.lane.b32.xlu0 %v4520_v6, %s5604_s7  ;;  %v6326_v6 = vld [vmem:[#allocation2 + $0x48] sm:$0xff]  }
0x4b05   :  { %v2604_v5 = vpop.permute.xlu0 %2603 }
0x4b06   :  { %v2606_v56 = vmul.f32 %v5462_v1, %v2604_v5 }
0x4b08   :  { %2608 = vrot.lane.b32.xlu1 %v2606_v56, %s5609_s24 }
0x4b7a   :  { %v2609_v61 = vpop.permute.xlu1 %2608 }
0x4b7b   :  { %v2611_v62 = vadd.f32 %v2609_v61, %v2601_v60  ;;  %v6348_v61 = vld [vmem:[%s6700_s3 + $0x4] ss:$0 sm:$0xff] }
0x4b7d   :  { %5463 = vtanh.f32 %v2611_v62 }
0x4b87   :  { %v5464_v63 = vpop.eup %5463 }
0x4b88   :  { %2614 = vrot.lane.b32.xlu0 %v5464_v63, %s5604_s7 }
0x4bfa   :  { %v2615_v47 = vpop.permute.xlu0 %2614 }
0x4bfb   :  { %v6274_v57 = vmul.f32 %v5462_v1, %v2615_v47 }
0x4bfd   :  { %v2618_v9 = vpack.c.bf16 %v6274_v57, %v6274_v57 }
0x4bff   :  { %2620 = vrot.lane.b32.xlu1 %v2618_v9, %s5609_s24 }
0x4c71   :  { %v2621_v10 = vpop.permute.xlu1 %2620 }
0x4c72   :  { %5075 = vmatmul.mubr.msk.bf16.vlgmr.msra.gmra.mrb[72].mxu0 %vm73_vm1, %v2621_v10 }
0x4c73   :  { %5087 = vmatpush3.bf16.msra.mxu0 %v6173_v15  ;;  %5090 = vmatprep.mubr.msk.bf16.mxu0 %vm5607_vm0, %v5606_v0 }
0x4c74   :  { %5088 = vmatprep.subr.bf16.mxu0 %v5606_v0 }
0x4c77   :  { %5089 = vmatpush3.bf16.msra.mxu0 %v6179_v36 }
0x4c78   :  { %5106 = vmatprep.subr.bf16.mxu0 %v5606_v0 }
0x4d45   :  { %v2659_v16 = vpop.f32.mrb[72].mxu0 }
0x4d46   :  { %v2665_v17 = vadd.f32 %v2659_v16, %v6205_v58  ;;  %v5076_v48 = vpop.f32.mrb[73].mxu0 }
0x4d47   :  { %v2662_v28 = vpop.f32.mrb[74].mxu0 }
0x4d48   :  { %v4522_v19 = vmul.f32 -1.442695, %v2665_v17  ;;  %v5077_v12 = vpop.f32.mrb[75].mxu0 }
0x4d4a   :  { %5465 = vpow2.f32 %v4522_v19 }
0x4d54   :  { %v5466_v32 = vpop.eup %5465 }
0x4d55   :  { %v2669_v23 = vadd.f32 1.0, %v5466_v32 }
0x4d57   :  { %5467 = vrcp.f32 %v2669_v23 }
0x4d61   :  { %v5468_v15 = vpop.eup %5467 }
0x4d62   :  { %v2672_v43 = vmul.f32 2.0, %v5468_v15  ;;  %v2674_v21 = vmul.f32 %v5468_v15, %v2611_v62 }
0x4d64   :  { %v4523_v20 = vadd.f32 -1.0, %v2672_v43 }
0x4d66   :  { %2676 = vrot.lane.b32.xlu0 %v4523_v20, %s5604_s7 }
0x4dd8   :  { %v2677_v33 = vpop.permute.xlu0 %2676 }
0x4dd9   :  { %v2679_v36 = vmul.f32 %v5468_v15, %v2677_v33 }
0x4ddb   :  { %2681 = vrot.lane.b32.xlu1 %v2679_v36, %s5609_s24 }
0x4e4d   :  { %v2682_v24 = vpop.permute.xlu1 %2681 }
0x4e4e   :  { %v2684_v27 = vadd.f32 %v2682_v24, %v2674_v21 }
0x4e50   :  { %5469 = vtanh.f32 %v2684_v27 }
0x4e5a   :  { %v5470_v14 = vpop.eup %5469 }
0x4e5b   :  { %2687 = vrot.lane.b32.xlu0 %v5470_v14, %s5604_s7 }
0x4ecd   :  { %v2688_v13 = vpop.permute.xlu0 %2687 }
0x4ece   :  { %v6290_v29 = vmul.f32 %v5468_v15, %v2688_v13 }
0x4ed0   :  { %v2691_v30 = vpack.c.bf16 %v6290_v29, %v6290_v29 }
0x4ed2   :  { %2693 = vrot.lane.b32.xlu1 %v2691_v30, %s5609_s24 }
0x4f44   :  { %v2694_v7 = vpop.permute.xlu1 %2693 }
0x4f45   :  { %5083 = vmatmul.mubr.msk.bf16.vlgmr.msra.gmra.mrb[72].mxu1 %vm73_vm1, %v2694_v7 }
0x4f46   :  { %5095 = vmatpush3.bf16.msra.mxu1 %v5281_v49 }
0x4f47   :  { %5096 = vmatprep.subr.bf16.mxu1 %v5282_v52 }
0x4f4a   :  { %5097 = vmatpush3.bf16.msra.mxu1 %v5282_v52 }
0x4f4b   :  { %5122 = vmatprep.subr.bf16.mxu1 %v5606_v0 }
0x5018   :  { %v2732_v31 = vpop.f32.mrb[72].mxu1 }
0x5019   :  { %v2738_v2 = vadd.f32 %v2732_v31, %v6205_v58  ;;  %v5084_v37 = vpop.f32.mrb[73].mxu1 }
0x501a   :  { %v2735_v38 = vpop.f32.mrb[74].mxu1 }
0x501b   :  { %v4525_v8 = vmul.f32 -1.442695, %v2738_v2  ;;  %v5085_v51 = vpop.f32.mrb[75].mxu1 }
0x501d   :  { %5471 = vpow2.f32 %v4525_v8 }
0x5027   :  { %v5472_v18 = vpop.eup %5471 }
0x5028   :  { %v2742_v39 = vadd.f32 1.0, %v5472_v18 }
0x502a   :  { %5473 = vrcp.f32 %v2742_v39 }
0x5034   :  { %v5474_v40 = vpop.eup %5473 }
0x5035   :  { %v2745_v45 = vmul.f32 2.0, %v5474_v40  ;;  %v2747_v42 = vmul.f32 %v5474_v40, %v2684_v27 }
0x5037   :  { %v4526_v3 = vadd.f32 -1.0, %v2745_v45 }
0x5039   :  { %2749 = vrot.lane.b32.xlu0 %v4526_v3, %s5604_s7 }
0x50ab   :  { %v2750_v54 = vpop.permute.xlu0 %2749 }
0x50ac   :  { %v2752_v4 = vmul.f32 %v5474_v40, %v2750_v54 }
0x50ae   :  { %2754 = vrot.lane.b32.xlu1 %v2752_v4, %s5609_s24 }
0x5120   :  { %v2755_v44 = vpop.permute.xlu1 %2754 }
0x5121   :  { %v6299_v46 = vadd.f32 %v2755_v44, %v2747_v42  ;;  %v2839_v42 = vpack.c.bf16 %v6290_v29, %v6274_v57 }
0x5123   :  { %5475 = vtanh.f32 %v6299_v46 }
0x512d   :  { %v5476_v26 = vpop.eup %5475 }
0x512e   :  { %2760 = vrot.lane.b32.xlu0 %v5476_v26, %s5604_s7 }
0x5132   :  { %2858 = vrot.lane.b32.xlu0 %v2837_v50, %s5609_s24 }
0x51a0   :  { %v2761_v25 = vpop.permute.xlu0 %2760 }
0x51a1   :  { %v6313_v34 = vmul.f32 %v5474_v40, %v2761_v25 }
0x51a3   :  { %v2764_v53 = vpack.c.bf16 %v6313_v34, %v6313_v34 }
0x51a4   :  { %v2859_v1 = vpop.permute.xlu0 %2858 }
0x51a5   :  { %2766 = vrot.lane.b32.xlu1 %v2764_v53, %s5609_s24  ;;  %5098 = vmatprep.mubr.msk.bf16.mxu1 %vm73_vm1, %v2859_v1 }
0x51a9   :  { %2860 = vrot.lane.b32.xlu1 %v2838_v55, %s5609_s24 }
0x5217   :  { %v2767_v59 = vpop.permute.xlu1 %2766 }
0x5218   :  { %5091 = vmatmul.mubr.msk.bf16.vlgmr.msra.gmra.mrb[76].mxu0 %vm73_vm1, %v2767_v59 }
0x5219   :  { %5107 = vmatpush3.bf16.msra.mxu0 %v6322_v35  ;;  %5110 = vmatprep.mubr.msk.bf16.mxu0 %vm5607_vm0, %v5606_v0 }
0x521a   :  { %5108 = vmatprep.subr.bf16.mxu0 %v5606_v0 }
0x521b   :  { %v2861_v5 = vpop.permute.xlu1 %2860 }
0x521c   :  { %5099 = vmatmul.mubr.msk.bf16.vlgmr.msra.gmra.mrb[76].mxu1 %vm73_vm1, %v2861_v5 }
0x521d   :  { %5109 = vmatpush3.bf16.msra.mxu0 %v6326_v6  ;;  %5123 = vmatpush3.bf16.msra.mxu1 %v6322_v35 }
0x521e   :  { %5114 = vmatprep.subr.bf16.mxu0 %v5606_v0  ;;  %5124 = vmatprep.subr.bf16.mxu1 %v5606_v0 }
0x5220   :  { %5111 = vmatmul.mubr.bf16.vlgmr.msra.gmra.mrb[80].mxu0 %v5608_v11 }
0x5221   :  { %5115 = vmatpush3.bf16.msra.mxu0 %v6322_v35  ;;  %5118 = vmatprep.mubr.msk.bf16.mxu0 %vm5607_vm0, %v5606_v0 }
0x5222   :  { %5116 = vmatprep.subr.bf16.mxu0 %v5606_v0  ;;  %5125 = vmatpush3.bf16.msra.mxu1 %v6326_v6 }
0x5223   :  { %5138 = vmatprep.subr.bf16.mxu1 %v5606_v0 }
0x5225   :  { %5117 = vmatpush3.bf16.msra.mxu0 %v6326_v6 }
0x5226   :  { %5130 = vmatprep.subr.bf16.mxu0 %v5606_v0 }
0x52eb   :  { %v2805_v22 = vpop.f32.mrb[76].mxu0 }
0x52ec   :  { %v5092_v41 = vpop.f32.mrb[77].mxu0  ;;  %v2811_v21 = vadd.f32 %v2805_v22, %v6205_v58 }
0x52ed   :  { %v2808_v56 = vpop.f32.mrb[78].mxu0 }
0x52ee   :  { %v5093_v60 = vpop.f32.mrb[79].mxu0  ;;  %v4528_v24 = vmul.f32 -1.442695, %v2811_v21 }
0x52ef   :  { %v6350_v62 = vpop.f32.mrb[76].mxu1 }
0x52f0   :  { %v2924_v63 = vpop.f32.mrb[77].mxu1 }
0x52f1   :  { %v2925_v47 = vadd.f32 %v6348_v61, %v2924_v63  ;;  %v6353_v9 = vpop.f32.mrb[78].mxu1 }
0x52f2   :  { %v2927_v10 = vpop.f32.mrb[79].mxu1 }
0x52f3   :  { %v3006_v16 = vpop.f32.mrb[80].mxu0  ;;  %v2928_v49 = vadd.f32 %v6348_v61, %v2927_v10 }
0x52f4   :  { %v3012_v17 = vadd.f32 %v3006_v16, %v2925_v47  ;;  %v5112_v48 = vpop.f32.mrb[81].mxu0 }
0x52f5   :  { %v3009_v28 = vpop.f32.mrb[82].mxu0 }
0x52f6   :  { %v4544_v19 = vmul.f32 -1.442695, %v3012_v17  ;;  %v5113_v12 = vpop.f32.mrb[83].mxu0 }
0x52f8   :  { %5477 = vpow2.f32 %v4544_v19 }
0x5302   :  { %v5478_v32 = vpop.eup %5477 }
0x5303   :  { %v3016_v23 = vadd.f32 1.0, %v5478_v32 }
0x5305   :  { %5479 = vrcp.f32 %v3016_v23 }
0x5306   :  { %5481 = vpow2.f32 %v4528_v24 }
0x530f   :  { %v5480_v15 = vpop.eup %5479 }
0x5310   :  { %v3019_v43 = vmul.f32 2.0, %v5480_v15  ;;  %v5482_v27 = vpop.eup %5481  ;;  %v3021_v13 = vmul.f32 0.0, %v5480_v15 }
0x5311   :  { %v2815_v14 = vadd.f32 1.0, %v5482_v27 }
0x5312   :  { %v4545_v20 = vadd.f32 -1.0, %v3019_v43  ;;  %v2933_v43 = vadd.f32 %v6350_v62, %v6348_v61 }
0x5313   :  { %5483 = vrcp.f32 %v2815_v14 }
0x5314   :  { %3023 = vrot.lane.b32.xlu0 %v4545_v20, %s5604_s7 }
0x531d   :  { %v5484_v31 = vpop.eup %5483 }
0x531e   :  { %v2818_v2 = vmul.f32 2.0, %v5484_v31  ;;  %v2820_v45 = vmul.f32 %v5484_v31, %v6299_v46 }
0x5320   :  { %v4529_v38 = vadd.f32 -1.0, %v2818_v2 }
0x5386   :  { %v3024_v33 = vpop.permute.xlu0 %3023 }
0x5387   :  { %v3026_v36 = vmul.f32 %v5480_v15, %v3024_v33 }
0x5389   :  { %3028 = vrot.lane.b32.xlu1 %v3026_v36, %s5609_s24 }
0x53fb   :  { %v3029_v30 = vpop.permute.xlu1 %3028 }
0x53fc   :  { %v3031_v7 = vadd.f32 %v3029_v30, %v3021_v13 }
0x53fe   :  { %5485 = vtanh.f32 %v3031_v7 }
0x5408   :  { %v5486_v37 = vpop.eup %5485 }
0x5409   :  { %3034 = vrot.lane.b32.xlu0 %v5486_v37, %s5604_s7 }
0x540d   :  { %2822 = vrot.lane.b32.xlu0 %v4529_v38, %s5604_s7 }
0x547b   :  { %v3035_v8 = vpop.permute.xlu0 %3034 }
0x547c   :  { %v6360_v51 = vmul.f32 %v5480_v15, %v3035_v8 }
0x547e   :  { %v3038_v58 = vpack.c.bf16 %v6360_v51, %v6360_v51 }
0x547f   :  { %v2823_v18 = vpop.permute.xlu0 %2822 }
0x5480   :  { %v2825_v39 = vmul.f32 %v5484_v31, %v2823_v18  ;;  %3040 = vrot.lane.b32.xlu1 %v3038_v58, %s5609_s24 }
0x5482   :  { %2827 = vrot.lane.b32.xlu0 %v2825_v39, %s5609_s24 }
0x54f2   :  { %v3041_v40 = vpop.permute.xlu1 %3040 }
0x54f3   :  { %5119 = vmatmul.mubr.msk.bf16.vlgmr.msra.gmra.mrb[84].mxu0 %vm73_vm1, %v3041_v40 }
0x54f4   :  { %v2828_v3 = vpop.permute.xlu0 %2827  ;;  %5131 = vmatpush3.bf16.msra.mxu0 %v6322_v35  ;;  %5134 = vmatprep.mubr.msk.bf16.mxu0 %vm5607_vm0, %v5606_v0 }
0x54f5   :  { %v2830_v54 = vadd.f32 %v2828_v3, %v2820_v45  ;;  %5132 = vmatprep.subr.bf16.mxu0 %v5606_v0  ;;  %v2936_v3 = vadd.f32 %v6353_v9, %v6348_v61 }
0x54f7   :  { %5487 = vtanh.f32 %v2830_v54 }
0x54f8   :  { %5133 = vmatpush3.bf16.msra.mxu0 %v6326_v6 }
0x54f9   :  { %5146 = vmatprep.subr.bf16.mxu0 %v5606_v0 }
0x5501   :  { %v5488_v4 = vpop.eup %5487 }
0x5502   :  { %2833 = vrot.lane.b32.xlu0 %v5488_v4, %s5604_s7 }
0x5506   :  { %2862 = vrot.lane.b32.xlu0 %v2839_v42, %s5609_s24 }
0x5574   :  { %v2834_v44 = vpop.permute.xlu0 %2833 }
0x5575   :  { %v2836_v47 = vmul.f32 %v5484_v31, %v2834_v44 }
0x5577   :  { %v2840_v16 = vpack.c.bf16 %v2836_v47, %v6313_v34 }
0x5578   :  { %v2863_v46 = vpop.permute.xlu0 %2862 }
0x5579   :  { %5102 = vmatprep.mubr.msk.bf16.mxu1 %vm73_vm1, %v2863_v46 }
0x55c6   :  { %v3079_v26 = vpop.f32.mrb[84].mxu0 }
0x55c7   :  { %v3085_v50 = vadd.f32 %v3079_v26, %v2928_v49  ;;  %v5120_v52 = vpop.f32.mrb[85].mxu0 }
0x55c8   :  { %v3082_v25 = vpop.f32.mrb[86].mxu0 }
0x55c9   :  { %v4547_v53 = vmul.f32 -1.442695, %v3085_v50  ;;  %v5121_v1 = vpop.f32.mrb[87].mxu0 }
0x55cb   :  { %5489 = vpow2.f32 %v4547_v53 }
0x55d5   :  { %v5490_v55 = vpop.eup %5489 }
0x55d6   :  { %v3089_v59 = vadd.f32 1.0, %v5490_v55 }
0x55d8   :  { %5491 = vrcp.f32 %v3089_v59 }
0x55e2   :  { %v5492_v5 = vpop.eup %5491 }
0x55e3   :  { %v3092_v57 = vmul.f32 2.0, %v5492_v5  ;;  %v3094_v56 = vmul.f32 %v5492_v5, %v3031_v7 }
0x55e5   :  { %v4548_v29 = vadd.f32 -1.0, %v3092_v57 }
0x55e7   :  { %3096 = vrot.lane.b32.xlu1 %v4548_v29, %s5604_s7 }
0x5659   :  { %v3097_v22 = vpop.permute.xlu1 %3096 }
0x565a   :  { %v3099_v41 = vmul.f32 %v5492_v5, %v3097_v22 }
0x565c   :  { %3101 = vrot.lane.b32.xlu1 %v3099_v41, %s5609_s24 }
0x56ce   :  { %v3102_v60 = vpop.permute.xlu1 %3101 }
0x56cf   :  { %v3104_v63 = vadd.f32 %v3102_v60, %v3094_v56 }
0x56d1   :  { %5493 = vtanh.f32 %v3104_v63 }
0x56db   :  { %v5494_v10 = vpop.eup %5493 }
0x56dc   :  { %3107 = vrot.lane.b32.xlu1 %v5494_v10, %s5604_s7 }
0x56e0   :  { %2864 = vrot.lane.b32.xlu1 %v2840_v16, %s5609_s24 }
0x574e   :  { %v3108_v17 = vpop.permute.xlu1 %3107 }
0x574f   :  { %v6385_v48 = vmul.f32 %v5492_v5, %v3108_v17 }
0x5751   :  { %v3111_v28 = vpack.c.bf16 %v6385_v48, %v6385_v48 }
0x5752   :  { %v2865_v19 = vpop.permute.xlu1 %2864 }
0x5753   :  { %3113 = vrot.lane.b32.xlu0 %v3111_v28, %s5609_s24  ;;  %5103 = vmatmul.mubr.msk.bf16.gmra.mrb[80].mxu1 %vm73_vm1, %v2865_v19 }
0x5754   :  { %5126 = vmatprep.mubr.msk.bf16.mxu1 %vm5607_vm0, %v5606_v0 }
0x57c5   :  { %v3114_v12 = vpop.permute.xlu0 %3113 }
0x57c6   :  { %5127 = vmatmul.mubr.msk.bf16.vlgmr.msra.gmra.mrb[84].mxu1 %vm73_vm1, %v3114_v12 }
0x57c7   :  { %5139 = vmatpush3.bf16.msra.mxu1 %v6322_v35  ;;  %5142 = vmatprep.mubr.msk.bf16.mxu1 %vm5607_vm0, %v5606_v0 }
0x57c8   :  { %5140 = vmatprep.subr.bf16.mxu1 %v5606_v0 }
0x57cb   :  { %5141 = vmatpush3.bf16.msra.mxu1 %v6326_v6 }
0x57cc   :  { %5154 = vmatprep.subr.bf16.mxu1 %v5606_v0 }
0x5826   :  { %v6400_v34 = vpop.f32.mrb[80].mxu1 }
0x5827   :  { %v6402_v32 = vpop.f32.mrb[81].mxu1 }
0x5828   :  { %v6404_v23 = vpop.f32.mrb[82].mxu1  ;;  %v2941_v60 = vadd.f32 %v6348_v61, %v6402_v32 }
0x5829   :  { %v6406_v15 = vpop.f32.mrb[83].mxu1 }
0x5899   :  { %v3152_v20 = vpop.f32.mrb[84].mxu1 }
0x589a   :  { %v3158_v33 = vadd.f32 %v3152_v20, %v2933_v43  ;;  %v5128_v36 = vpop.f32.mrb[85].mxu1 }
0x589b   :  { %v3155_v21 = vpop.f32.mrb[86].mxu1 }
0x589c   :  { %v4550_v24 = vmul.f32 -1.442695, %v3158_v33  ;;  %v5129_v27 = vpop.f32.mrb[87].mxu1 }
0x589e   :  { %5495 = vpow2.f32 %v4550_v24 }
0x58a8   :  { %v5496_v14 = vpop.eup %5495 }
0x58a9   :  { %v3162_v13 = vadd.f32 1.0, %v5496_v14 }
0x58ab   :  { %5497 = vrcp.f32 %v3162_v13 }
0x58b5   :  { %v5498_v30 = vpop.eup %5497 }
0x58b6   :  { %v3165_v7 = vmul.f32 2.0, %v5498_v30  ;;  %v3167_v62 = vmul.f32 %v5498_v30, %v3104_v63 }
0x58b8   :  { %v4551_v31 = vadd.f32 -1.0, %v3165_v7 }
0x58ba   :  { %3169 = vrot.lane.b32.xlu1 %v4551_v31, %s5604_s7 }
0x592c   :  { %v3170_v2 = vpop.permute.xlu1 %3169 }
0x592d   :  { %v3172_v37 = vmul.f32 %v5498_v30, %v3170_v2  ;;  %v2944_v2 = vadd.f32 %v6348_v61, %v6406_v15 }
0x592f   :  { %3174 = vrot.lane.b32.xlu0 %v3172_v37, %s5609_s24 }
0x59a1   :  { %v3175_v38 = vpop.permute.xlu0 %3174 }
0x59a2   :  { %v3177_v8 = vadd.f32 %v3175_v38, %v3167_v62 }
0x59a4   :  { %5499 = vtanh.f32 %v3177_v8 }
0x59ae   :  { %v5500_v58 = vpop.eup %5499 }
0x59af   :  { %3180 = vrot.lane.b32.xlu1 %v5500_v58, %s5604_s7 }
0x5a21   :  { %v3181_v18 = vpop.permute.xlu1 %3180 }
0x5a22   :  { %v6413_v39 = vmul.f32 %v5498_v30, %v3181_v18 }
0x5a24   :  { %v3184_v40 = vpack.c.bf16 %v6413_v39, %v6413_v39 }
0x5a26   :  { %3186 = vrot.lane.b32.xlu0 %v3184_v40, %s5609_s24 }
0x5a98   :  { %v3187_v45 = vpop.permute.xlu0 %3186 }
0x5a99   :  { %5135 = vmatmul.mubr.msk.bf16.vlgmr.msra.gmra.mrb[88].mxu0 %vm73_vm1, %v3187_v45 }
0x5a9a   :  { %5147 = vmatpush3.bf16.msra.mxu0 %v6322_v35  ;;  %5150 = vmatprep.mubr.msk.bf16.mxu0 %vm5607_vm0, %v5606_v0 }
0x5a9b   :  { %5148 = vmatprep.subr.bf16.mxu0 %v5606_v0 }
0x5a9e   :  { %5149 = vmatpush3.bf16.msra.mxu0 %v6326_v6 }
0x5a9f   :  { %5162 = vmatprep.subr.bf16.mxu0 %v5606_v0 }
0x5b6c   :  { %v3225_v54 = vpop.f32.mrb[88].mxu0 }
0x5b6d   :  { %v3231_v4 = vadd.f32 %v3225_v54, %v2936_v3  ;;  %v5136_v42 = vpop.f32.mrb[89].mxu0 }
0x5b6e   :  { %v3228_v44 = vpop.f32.mrb[90].mxu0 }
0x5b6f   :  { %v4553_v46 = vmul.f32 -1.442695, %v3231_v4  ;;  %v5137_v49 = vpop.f32.mrb[91].mxu0 }
0x5b71   :  { %5501 = vpow2.f32 %v4553_v46 }
0x5b7b   :  { %v5502_v26 = vpop.eup %5501 }
0x5b7c   :  { %v3235_v50 = vadd.f32 1.0, %v5502_v26 }
0x5b7e   :  { %5503 = vrcp.f32 %v3235_v50 }
0x5b88   :  { %v5504_v52 = vpop.eup %5503 }
0x5b89   :  { %v3238_v25 = vmul.f32 2.0, %v5504_v52  ;;  %v3240_v9 = vmul.f32 %v5504_v52, %v3177_v8 }
0x5b8b   :  { %v4554_v53 = vadd.f32 -1.0, %v3238_v25  ;;  %v2949_v25 = vadd.f32 %v6400_v34, %v6348_v61 }
0x5b8d   :  { %3242 = vrot.lane.b32.xlu1 %v4554_v53, %s5604_s7 }
0x5bff   :  { %v3243_v1 = vpop.permute.xlu1 %3242 }
0x5c00   :  { %v3245_v55 = vmul.f32 %v5504_v52, %v3243_v1 }
0x5c02   :  { %3247 = vrot.lane.b32.xlu0 %v3245_v55, %s5609_s24 }
0x5c74   :  { %v3248_v59 = vpop.permute.xlu0 %3247 }
0x5c75   :  { %v3250_v5 = vadd.f32 %v3248_v59, %v3240_v9 }
0x5c77   :  { %5505 = vtanh.f32 %v3250_v5 }
0x5c81   :  { %v5506_v57 = vpop.eup %5505 }
0x5c82   :  { %3253 = vrot.lane.b32.xlu1 %v5506_v57, %s5604_s7 }
0x5cf4   :  { %v3254_v29 = vpop.permute.xlu1 %3253 }
0x5cf5   :  { %v6430_v22 = vmul.f32 %v5504_v52, %v3254_v29 }
0x5cf7   :  { %v3257_v41 = vpack.c.bf16 %v6430_v22, %v6430_v22 }
0x5cf9   :  { %3259 = vrot.lane.b32.xlu0 %v3257_v41, %s5609_s24 }
0x5d6b   :  { %v3260_v56 = vpop.permute.xlu0 %3259 }
0x5d6c   :  { %5143 = vmatmul.mubr.msk.bf16.vlgmr.msra.gmra.mrb[88].mxu1 %vm73_vm1, %v3260_v56 }
0x5d6d   :  { %5155 = vmatpush3.bf16.msra.mxu1 %v6322_v35  ;;  %5158 = vmatprep.mubr.msk.bf16.mxu1 %vm5607_vm0, %v5606_v0 }
0x5d6e   :  { %5156 = vmatprep.subr.bf16.mxu1 %v5606_v0 }
0x5d71   :  { %5157 = vmatpush3.bf16.msra.mxu1 %v6326_v6 }
0x5e3f   :  { %v3298_v63 = vpop.f32.mrb[88].mxu1 }
0x5e40   :  { %v3304_v47 = vadd.f32 %v3298_v63, %v2941_v60  ;;  %v5144_v10 = vpop.f32.mrb[89].mxu1 }
0x5e41   :  { %v3301_v16 = vpop.f32.mrb[90].mxu1 }
0x5e42   :  { %v4556_v17 = vmul.f32 -1.442695, %v3304_v47  ;;  %v5145_v28 = vpop.f32.mrb[91].mxu1 }
0x5e44   :  { %5507 = vpow2.f32 %v4556_v17  ;;  %v5285_v17 = vld [vmem:[%s6698_s1 + $0x50] sm:$0xff]  }
0x5e45   :  { %5170 = vmatprep.subr.bf16.mxu1 %v5285_v17 }
0x5e4e   :  { %v5508_v19 = vpop.eup %5507 }
0x5e4f   :  { %v3308_v12 = vadd.f32 1.0, %v5508_v19  ;;  %v3549_v19 = vpack.c.bf16 %v6385_v48, %v6360_v51  ;;  %v3550_v51 = vpack.c.bf16 %v6430_v22, %v6413_v39  ;;  %v6496_v48 = vld [vmem:[#allocation2 + $0x50] sm:$0xff]   ;;  %v2952_v39 = vadd.f32 %v6404_v23, %v6348_v61 }
0x5e51   :  { %5509 = vrcp.f32 %v3308_v12  ;;  %v5286_v12 = vld [vmem:[%s6698_s1 + $0x58] sm:$0xff]  }
0x5e5b   :  { %v5510_v43 = vpop.eup %5509 }
0x5e5c   :  { %v3311_v20 = vmul.f32 2.0, %v5510_v43  ;;  %v3313_v32 = vmul.f32 %v5510_v43, %v3250_v5 }
0x5e5e   :  { %v4557_v33 = vadd.f32 -1.0, %v3311_v20 }
0x5e60   :  { %3315 = vrot.lane.b32.xlu1 %v4557_v33, %s5604_s7 }
0x5ed2   :  { %v3316_v36 = vpop.permute.xlu1 %3315 }
0x5ed3   :  { %v3318_v21 = vmul.f32 %v5510_v43, %v3316_v36 }
0x5ed5   :  { %3320 = vrot.lane.b32.xlu0 %v3318_v21, %s5609_s24 }
0x5f47   :  { %v3321_v24 = vpop.permute.xlu0 %3320 }
0x5f48   :  { %v3323_v27 = vadd.f32 %v3321_v24, %v3313_v32  ;;  %v6500_v32 = vld [vmem:[#allocation2 + $0x58] sm:$0xff]  }
0x5f4a   :  { %5511 = vtanh.f32 %v3323_v27 }
0x5f54   :  { %v5512_v14 = vpop.eup %5511 }
0x5f55   :  { %3326 = vrot.lane.b32.xlu1 %v5512_v14, %s5604_s7 }
0x5fc7   :  { %v3327_v13 = vpop.permute.xlu1 %3326 }
0x5fc8   :  { %v6446_v30 = vmul.f32 %v5510_v43, %v3327_v13 }
0x5fca   :  { %v3330_v7 = vpack.c.bf16 %v6446_v30, %v6446_v30 }
0x5fcc   :  { %3332 = vrot.lane.b32.xlu0 %v3330_v7, %s5609_s24  ;;  %v6524_v7 = vld [vmem:[%s6700_s3 + $0x5] ss:$0 sm:$0xff] }
0x603e   :  { %v3333_v31 = vpop.permute.xlu0 %3332 }
0x603f   :  { %5151 = vmatmul.mubr.msk.bf16.vlgmr.msra.gmra.mrb[92].mxu0 %vm73_vm1, %v3333_v31 }
0x6040   :  { %5163 = vmatpush3.bf16.msra.mxu0 %v6322_v35  ;;  %5166 = vmatprep.mubr.msk.bf16.mxu0 %vm5607_vm0, %v5606_v0 }
0x6041   :  { %5164 = vmatprep.subr.bf16.mxu0 %v5606_v0 }
0x6044   :  { %5165 = vmatpush3.bf16.msra.mxu0 %v6326_v6 }
0x6045   :  { %5182 = vmatprep.subr.bf16.mxu0 %v5606_v0 }
0x6112   :  { %v3371_v37 = vpop.f32.mrb[92].mxu0 }
0x6113   :  { %v3377_v62 = vadd.f32 %v3371_v37, %v2944_v2  ;;  %v5152_v38 = vpop.f32.mrb[93].mxu0 }
0x6114   :  { %v3374_v8 = vpop.f32.mrb[94].mxu0 }
0x6115   :  { %v4559_v58 = vmul.f32 -1.442695, %v3377_v62  ;;  %v5153_v18 = vpop.f32.mrb[95].mxu0 }
0x6117   :  { %5513 = vpow2.f32 %v4559_v58 }
0x6121   :  { %v5514_v35 = vpop.eup %5513 }
0x6122   :  { %v3381_v40 = vadd.f32 1.0, %v5514_v35 }
0x6124   :  { %5515 = vrcp.f32 %v3381_v40 }
0x612e   :  { %v5516_v45 = vpop.eup %5515 }
0x612f   :  { %v3384_v3 = vmul.f32 2.0, %v5516_v45  ;;  %v3386_v15 = vmul.f32 %v5516_v45, %v3323_v27 }
0x6131   :  { %v4560_v54 = vadd.f32 -1.0, %v3384_v3 }
0x6133   :  { %3388 = vrot.lane.b32.xlu1 %v4560_v54, %s5604_s7 }
0x61a5   :  { %v3389_v6 = vpop.permute.xlu1 %3388 }
0x61a6   :  { %v3391_v4 = vmul.f32 %v5516_v45, %v3389_v6 }
0x61a8   :  { %3393 = vrot.lane.b32.xlu0 %v3391_v4, %s5609_s24 }
0x621a   :  { %v3394_v42 = vpop.permute.xlu0 %3393 }
0x621b   :  { %v3396_v44 = vadd.f32 %v3394_v42, %v3386_v15 }
0x621d   :  { %5517 = vtanh.f32 %v3396_v44 }
0x6227   :  { %v5518_v46 = vpop.eup %5517 }
0x6228   :  { %3399 = vrot.lane.b32.xlu1 %v5518_v46, %s5604_s7 }
0x629a   :  { %v3400_v49 = vpop.permute.xlu1 %3399 }
0x629b   :  { %v6463_v26 = vmul.f32 %v5516_v45, %v3400_v49 }
0x629d   :  { %v3403_v50 = vpack.c.bf16 %v6463_v26, %v6463_v26 }
0x629f   :  { %3405 = vrot.lane.b32.xlu0 %v3403_v50, %s5609_s24 }
0x6311   :  { %v3406_v52 = vpop.permute.xlu0 %3405 }
0x6312   :  { %5159 = vmatmul.mubr.msk.bf16.vlgmr.msra.gmra.mrb[92].mxu1 %vm73_vm1, %v3406_v52 }
0x6313   :  { %5171 = vmatpush3.bf16.msra.mxu1 %v5285_v17 }
0x6314   :  { %5172 = vmatprep.subr.bf16.mxu1 %v5286_v12 }
0x6317   :  { %5173 = vmatpush3.bf16.msra.mxu1 %v5286_v12 }
0x6318   :  { %5198 = vmatprep.subr.bf16.mxu1 %v5606_v0 }
0x63e5   :  { %v3444_v53 = vpop.f32.mrb[92].mxu1 }
0x63e6   :  { %v3450_v1 = vadd.f32 %v3444_v53, %v2949_v25  ;;  %v5160_v55 = vpop.f32.mrb[93].mxu1 }
0x63e7   :  { %v3447_v9 = vpop.f32.mrb[94].mxu1 }
0x63e8   :  { %v4562_v59 = vmul.f32 -1.442695, %v3450_v1  ;;  %v5161_v5 = vpop.f32.mrb[95].mxu1 }
0x63ea   :  { %5519 = vpow2.f32 %v4562_v59 }
0x63f4   :  { %v5520_v57 = vpop.eup %5519 }
0x63f5   :  { %v3454_v29 = vadd.f32 1.0, %v5520_v57 }
0x63f7   :  { %5521 = vrcp.f32 %v3454_v29 }
0x6401   :  { %v5522_v41 = vpop.eup %5521 }
0x6402   :  { %v3457_v56 = vmul.f32 2.0, %v5522_v41  ;;  %v3459_v34 = vmul.f32 %v5522_v41, %v3396_v44 }
0x6404   :  { %v4563_v60 = vadd.f32 -1.0, %v3457_v56 }
0x6406   :  { %3461 = vrot.lane.b32.xlu1 %v4563_v60, %s5604_s7 }
0x6478   :  { %v3462_v63 = vpop.permute.xlu1 %3461 }
0x6479   :  { %v3464_v47 = vmul.f32 %v5522_v41, %v3462_v63 }
0x647b   :  { %3466 = vrot.lane.b32.xlu0 %v3464_v47, %s5609_s24 }
0x64ed   :  { %v3467_v10 = vpop.permute.xlu0 %3466 }
0x64ee   :  { %v6473_v16 = vadd.f32 %v3467_v10, %v3459_v34  ;;  %v3551_v34 = vpack.c.bf16 %v6463_v26, %v6446_v30 }
0x64f0   :  { %5523 = vtanh.f32 %v6473_v16 }
0x64fa   :  { %v5524_v28 = vpop.eup %5523 }
0x64fb   :  { %3472 = vrot.lane.b32.xlu1 %v5524_v28, %s5604_s7 }
0x64ff   :  { %3570 = vrot.lane.b32.xlu1 %v3549_v19, %s5609_s24 }
0x656d   :  { %v3473_v43 = vpop.permute.xlu1 %3472 }
0x656e   :  { %v6487_v20 = vmul.f32 %v5522_v41, %v3473_v43 }
0x6570   :  { %v3476_v33 = vpack.c.bf16 %v6487_v20, %v6487_v20 }
0x6571   :  { %v3571_v36 = vpop.permute.xlu1 %3570 }
0x6572   :  { %3478 = vrot.lane.b32.xlu0 %v3476_v33, %s5609_s24  ;;  %5174 = vmatprep.mubr.msk.bf16.mxu1 %vm73_vm1, %v3571_v36 }
0x6576   :  { %3572 = vrot.lane.b32.xlu0 %v3550_v51, %s5609_s24 }
0x65e4   :  { %v3479_v21 = vpop.permute.xlu0 %3478 }
0x65e5   :  { %5167 = vmatmul.mubr.msk.bf16.vlgmr.msra.gmra.mrb[96].mxu0 %vm73_vm1, %v3479_v21 }
0x65e6   :  { %5183 = vmatpush3.bf16.msra.mxu0 %v6496_v48  ;;  %5186 = vmatprep.mubr.msk.bf16.mxu0 %vm5607_vm0, %v5606_v0 }
0x65e7   :  { %5184 = vmatprep.subr.bf16.mxu0 %v5606_v0 }
0x65e8   :  { %v3573_v24 = vpop.permute.xlu0 %3572 }
0x65e9   :  { %5175 = vmatmul.mubr.msk.bf16.vlgmr.msra.gmra.mrb[96].mxu1 %vm73_vm1, %v3573_v24 }
0x65ea   :  { %5185 = vmatpush3.bf16.msra.mxu0 %v6500_v32  ;;  %5199 = vmatpush3.bf16.msra.mxu1 %v6496_v48 }
0x65eb   :  { %5190 = vmatprep.subr.bf16.mxu0 %v5606_v0  ;;  %5200 = vmatprep.subr.bf16.mxu1 %v5606_v0 }
0x65ed   :  { %5187 = vmatmul.mubr.bf16.vlgmr.msra.gmra.mrb[100].mxu0 %v5608_v11 }
0x65ee   :  { %5191 = vmatpush3.bf16.msra.mxu0 %v6496_v48  ;;  %5194 = vmatprep.mubr.msk.bf16.mxu0 %vm5607_vm0, %v5606_v0 }
0x65ef   :  { %5192 = vmatprep.subr.bf16.mxu0 %v5606_v0  ;;  %5201 = vmatpush3.bf16.msra.mxu1 %v6500_v32 }
0x65f0   :  { %5214 = vmatprep.subr.bf16.mxu1 %v5606_v0 }
0x65f2   :  { %5193 = vmatpush3.bf16.msra.mxu0 %v6500_v32 }
0x65f3   :  { %5206 = vmatprep.subr.bf16.mxu0 %v5606_v0 }
0x66b8   :  { %v3517_v22 = vpop.f32.mrb[96].mxu0 }
0x66b9   :  { %v3523_v11 = vadd.f32 %v3517_v22, %v2952_v39  ;;  %v5168_v27 = vpop.f32.mrb[97].mxu0 }
0x66ba   :  { %v3520_v14 = vpop.f32.mrb[98].mxu0 }
0x66bb   :  { %v5169_v13 = vpop.f32.mrb[99].mxu0  ;;  %v4565_v42 = vmul.f32 -1.442695, %v3523_v11 }
0x66bc   :  { %v6526_v31 = vpop.f32.mrb[96].mxu1 }
0x66bd   :  { %v3636_v2 = vpop.f32.mrb[97].mxu1 }
0x66be   :  { %v3637_v37 = vadd.f32 %v6524_v7, %v3636_v2  ;;  %v6529_v62 = vpop.f32.mrb[98].mxu1 }
0x66bf   :  { %v3639_v38 = vpop.f32.mrb[99].mxu1 }
0x66c0   :  { %v3718_v8 = vpop.f32.mrb[100].mxu0  ;;  %v3640_v17 = vadd.f32 %v6524_v7, %v3639_v38 }
0x66c1   :  { %v3724_v61 = vadd.f32 %v3718_v8, %v3637_v37  ;;  %v5188_v23 = vpop.f32.mrb[101].mxu0 }
0x66c2   :  { %v3721_v58 = vpop.f32.mrb[102].mxu0 }
0x66c3   :  { %v4581_v18 = vmul.f32 -1.442695, %v3724_v61  ;;  %v5189_v35 = vpop.f32.mrb[103].mxu0 }
0x66c5   :  { %5525 = vpow2.f32 %v4581_v18 }
0x66cf   :  { %v5526_v40 = vpop.eup %5525 }
0x66d0   :  { %v3728_v45 = vadd.f32 1.0, %v5526_v40 }
0x66d2   :  { %5527 = vrcp.f32 %v3728_v45  ;;  %v3645_v45 = vadd.f32 %v6526_v31, %v6524_v7 }
0x66d3   :  { %5529 = vpow2.f32 %v4565_v42 }
0x66dc   :  { %v5528_v3 = vpop.eup %5527 }
0x66dd   :  { %v3731_v54 = vmul.f32 2.0, %v5528_v3  ;;  %v5530_v44 = vpop.eup %5529  ;;  %v3733_v49 = vmul.f32 0.0, %v5528_v3 }
0x66de   :  { %v3527_v46 = vadd.f32 1.0, %v5530_v44 }
0x66df   :  { %v4582_v6 = vadd.f32 -1.0, %v3731_v54 }
0x66e0   :  { %5531 = vrcp.f32 %v3527_v46 }
0x66e1   :  { %3735 = vrot.lane.b32.xlu1 %v4582_v6, %s5604_s7 }
0x66ea   :  { %v5532_v25 = vpop.eup %5531 }
0x66eb   :  { %v3530_v53 = vmul.f32 2.0, %v5532_v25  ;;  %v3532_v56 = vmul.f32 %v5532_v25, %v6473_v16 }
0x66ed   :  { %v4566_v55 = vadd.f32 -1.0, %v3530_v53 }
0x6753   :  { %v3736_v4 = vpop.permute.xlu1 %3735 }
0x6754   :  { %v3738_v15 = vmul.f32 %v5528_v3, %v3736_v4 }
0x6756   :  { %3740 = vrot.lane.b32.xlu0 %v3738_v15, %s5609_s24 }
0x67c8   :  { %v3741_v50 = vpop.permute.xlu0 %3740 }
0x67c9   :  { %v3743_v52 = vadd.f32 %v3741_v50, %v3733_v49 }
0x67cb   :  { %5533 = vtanh.f32 %v3743_v52 }
0x67d5   :  { %v5534_v1 = vpop.eup %5533 }
0x67d6   :  { %3746 = vrot.lane.b32.xlu1 %v5534_v1, %s5604_s7 }
0x67da   :  { %3534 = vrot.lane.b32.xlu1 %v4566_v55, %s5604_s7 }
0x6848   :  { %v3747_v9 = vpop.permute.xlu1 %3746 }
0x6849   :  { %v6535_v59 = vmul.f32 %v5528_v3, %v3747_v9 }
0x684b   :  { %v3750_v5 = vpack.c.bf16 %v6535_v59, %v6535_v59 }
0x684c   :  { %v3535_v57 = vpop.permute.xlu1 %3534 }
0x684d   :  { %v3537_v29 = vmul.f32 %v5532_v25, %v3535_v57  ;;  %3752 = vrot.lane.b32.xlu0 %v3750_v5, %s5609_s24 }
0x684f   :  { %3539 = vrot.lane.b32.xlu1 %v3537_v29, %s5609_s24 }
0x68bf   :  { %v3753_v41 = vpop.permute.xlu0 %3752 }
0x68c0   :  { %5195 = vmatmul.mubr.msk.bf16.vlgmr.msra.gmra.mrb[104].mxu0 %vm73_vm1, %v3753_v41 }
0x68c1   :  { %v3540_v60 = vpop.permute.xlu1 %3539  ;;  %5207 = vmatpush3.bf16.msra.mxu0 %v6496_v48  ;;  %5210 = vmatprep.mubr.msk.bf16.mxu0 %vm5607_vm0, %v5606_v0 }
0x68c2   :  { %v3542_v63 = vadd.f32 %v3540_v60, %v3532_v56  ;;  %5208 = vmatprep.subr.bf16.mxu0 %v5606_v0  ;;  %v3648_v56 = vadd.f32 %v6529_v62, %v6524_v7 }
0x68c4   :  { %5535 = vtanh.f32 %v3542_v63 }
0x68c5   :  { %5209 = vmatpush3.bf16.msra.mxu0 %v6500_v32 }
0x68c6   :  { %5222 = vmatprep.subr.bf16.mxu0 %v5606_v0 }
0x68ce   :  { %v5536_v47 = vpop.eup %5535 }
0x68cf   :  { %3545 = vrot.lane.b32.xlu1 %v5536_v47, %s5604_s7 }
0x68d3   :  { %3574 = vrot.lane.b32.xlu1 %v3551_v34, %s5609_s24 }
0x6941   :  { %v3546_v10 = vpop.permute.xlu1 %3545 }
0x6942   :  { %v3548_v13 = vmul.f32 %v5532_v25, %v3546_v10 }
0x6944   :  { %v3552_v37 = vpack.c.bf16 %v3548_v13, %v6487_v20 }
0x6945   :  { %v3575_v16 = vpop.permute.xlu1 %3574 }
0x6946   :  { %5178 = vmatprep.mubr.msk.bf16.mxu1 %vm73_vm1, %v3575_v16 }
0x6993   :  { %v3791_v28 = vpop.f32.mrb[104].mxu0 }
0x6994   :  { %v3797_v19 = vadd.f32 %v3791_v28, %v3640_v17  ;;  %v5196_v12 = vpop.f32.mrb[105].mxu0 }
0x6995   :  { %v3794_v43 = vpop.f32.mrb[106].mxu0 }
0x6996   :  { %v4584_v33 = vmul.f32 -1.442695, %v3797_v19  ;;  %v5197_v36 = vpop.f32.mrb[107].mxu0 }
0x6998   :  { %5537 = vpow2.f32 %v4584_v33 }
0x69a2   :  { %v5538_v51 = vpop.eup %5537 }
0x69a3   :  { %v3801_v21 = vadd.f32 1.0, %v5538_v51 }
0x69a5   :  { %5539 = vrcp.f32 %v3801_v21 }
0x69af   :  { %v5540_v24 = vpop.eup %5539 }
0x69b0   :  { %v3804_v30 = vmul.f32 2.0, %v5540_v24  ;;  %v3806_v11 = vmul.f32 %v5540_v24, %v3743_v52 }
0x69b2   :  { %v4585_v26 = vadd.f32 -1.0, %v3804_v30 }
0x69b4   :  { %3808 = vrot.lane.b32.xlu0 %v4585_v26, %s5604_s7 }
0x6a26   :  { %v3809_v39 = vpop.permute.xlu0 %3808 }
0x6a27   :  { %v3811_v22 = vmul.f32 %v5540_v24, %v3809_v39 }
0x6a29   :  { %3813 = vrot.lane.b32.xlu0 %v3811_v22, %s5609_s24 }
0x6a9b   :  { %v3814_v27 = vpop.permute.xlu0 %3813 }
0x6a9c   :  { %v3816_v14 = vadd.f32 %v3814_v27, %v3806_v11 }
0x6a9e   :  { %5541 = vtanh.f32 %v3816_v14 }
0x6aa8   :  { %v5542_v2 = vpop.eup %5541 }
0x6aa9   :  { %3819 = vrot.lane.b32.xlu0 %v5542_v2, %s5604_s7 }
0x6aad   :  { %3576 = vrot.lane.b32.xlu0 %v3552_v37, %s5609_s24 }
0x6b1b   :  { %v3820_v38 = vpop.permute.xlu0 %3819 }
0x6b1c   :  { %v6560_v8 = vmul.f32 %v5540_v24, %v3820_v38 }
0x6b1e   :  { %v3823_v61 = vpack.c.bf16 %v6560_v8, %v6560_v8 }
0x6b1f   :  { %v3577_v23 = vpop.permute.xlu0 %3576 }
0x6b20   :  { %3825 = vrot.lane.b32.xlu1 %v3823_v61, %s5609_s24  ;;  %5179 = vmatmul.mubr.msk.bf16.gmra.mrb[100].mxu1 %vm73_vm1, %v3577_v23 }
0x6b21   :  { %5202 = vmatprep.mubr.msk.bf16.mxu1 %vm5607_vm0, %v5606_v0 }
0x6b92   :  { %v3826_v58 = vpop.permute.xlu1 %3825 }
0x6b93   :  { %5203 = vmatmul.mubr.msk.bf16.vlgmr.msra.gmra.mrb[104].mxu1 %vm73_vm1, %v3826_v58 }
0x6b94   :  { %5215 = vmatpush3.bf16.msra.mxu1 %v6496_v48  ;;  %5218 = vmatprep.mubr.msk.bf16.mxu1 %vm5607_vm0, %v5606_v0 }
0x6b95   :  { %5216 = vmatprep.subr.bf16.mxu1 %v5606_v0 }
0x6b98   :  { %5217 = vmatpush3.bf16.msra.mxu1 %v6500_v32 }
0x6b99   :  { %5230 = vmatprep.subr.bf16.mxu1 %v5606_v0 }
0x6bf3   :  { %v6575_v20 = vpop.f32.mrb[100].mxu1 }
0x6bf4   :  { %v6577_v18 = vpop.f32.mrb[101].mxu1 }
0x6bf5   :  { %v6579_v35 = vpop.f32.mrb[102].mxu1  ;;  %v3653_v11 = vadd.f32 %v6524_v7, %v6577_v18 }
0x6bf6   :  { %v6581_v40 = vpop.f32.mrb[103].mxu1 }
0x6c66   :  { %v3864_v3 = vpop.f32.mrb[104].mxu1 }
0x6c67   :  { %v3870_v54 = vadd.f32 %v3864_v3, %v3645_v45  ;;  %v5204_v6 = vpop.f32.mrb[105].mxu1 }
0x6c68   :  { %v3867_v4 = vpop.f32.mrb[106].mxu1 }
0x6c69   :  { %v4587_v15 = vmul.f32 -1.442695, %v3870_v54  ;;  %v5205_v42 = vpop.f32.mrb[107].mxu1 }
0x6c6b   :  { %5543 = vpow2.f32 %v4587_v15 }
0x6c75   :  { %v5544_v44 = vpop.eup %5543 }
0x6c76   :  { %v3874_v46 = vadd.f32 1.0, %v5544_v44 }
0x6c78   :  { %5545 = vrcp.f32 %v3874_v46 }
0x6c82   :  { %v5546_v49 = vpop.eup %5545 }
0x6c83   :  { %v3877_v50 = vmul.f32 2.0, %v5546_v49  ;;  %v3879_v31 = vmul.f32 %v5546_v49, %v3816_v14 }
0x6c85   :  { %v4588_v52 = vadd.f32 -1.0, %v3877_v50 }
0x6c87   :  { %3881 = vrot.lane.b32.xlu0 %v4588_v52, %s5604_s7  ;;  %v3656_v52 = vadd.f32 %v6524_v7, %v6581_v40 }
0x6cf9   :  { %v3882_v25 = vpop.permute.xlu0 %3881 }
0x6cfa   :  { %v3884_v53 = vmul.f32 %v5546_v49, %v3882_v25 }
0x6cfc   :  { %3886 = vrot.lane.b32.xlu1 %v3884_v53, %s5609_s24 }
0x6d6e   :  { %v3887_v1 = vpop.permute.xlu1 %3886 }
0x6d6f   :  { %v3889_v55 = vadd.f32 %v3887_v1, %v3879_v31 }
0x6d71   :  { %5547 = vtanh.f32 %v3889_v55 }
0x6d7b   :  { %v5548_v9 = vpop.eup %5547 }
0x6d7c   :  { %3892 = vrot.lane.b32.xlu0 %v5548_v9, %s5604_s7 }
0x6dee   :  { %v3893_v5 = vpop.permute.xlu0 %3892 }
0x6def   :  { %v6588_v57 = vmul.f32 %v5546_v49, %v3893_v5 }
0x6df1   :  { %v3896_v29 = vpack.c.bf16 %v6588_v57, %v6588_v57 }
0x6df3   :  { %3898 = vrot.lane.b32.xlu1 %v3896_v29, %s5609_s24 }
0x6e65   :  { %v3899_v41 = vpop.permute.xlu1 %3898 }
0x6e66   :  { %5211 = vmatmul.mubr.msk.bf16.vlgmr.msra.gmra.mrb[108].mxu0 %vm73_vm1, %v3899_v41 }
0x6e67   :  { %5223 = vmatpush3.bf16.msra.mxu0 %v6496_v48  ;;  %5226 = vmatprep.mubr.msk.bf16.mxu0 %vm5607_vm0, %v5606_v0 }
0x6e68   :  { %5224 = vmatprep.subr.bf16.mxu0 %v5606_v0 }
0x6e6b   :  { %5225 = vmatpush3.bf16.msra.mxu0 %v6500_v32 }
0x6e6c   :  { %5238 = vmatprep.subr.bf16.mxu0 %v5606_v0 }
0x6f39   :  { %v3937_v60 = vpop.f32.mrb[108].mxu0 }
0x6f3a   :  { %v3943_v63 = vadd.f32 %v3937_v60, %v3648_v56  ;;  %v5212_v47 = vpop.f32.mrb[109].mxu0 }
0x6f3b   :  { %v3940_v34 = vpop.f32.mrb[110].mxu0 }
0x6f3c   :  { %v4590_v10 = vmul.f32 -1.442695, %v3943_v63  ;;  %v5213_v16 = vpop.f32.mrb[111].mxu0 }
0x6f3e   :  { %5549 = vpow2.f32 %v4590_v10 }
0x6f48   :  { %v5550_v17 = vpop.eup %5549 }
0x6f49   :  { %v3947_v28 = vadd.f32 1.0, %v5550_v17 }
0x6f4b   :  { %5551 = vrcp.f32 %v3947_v28  ;;  %v3661_v28 = vadd.f32 %v6575_v20, %v6524_v7 }
0x6f55   :  { %v5552_v19 = vpop.eup %5551 }
0x6f56   :  { %v3950_v12 = vmul.f32 2.0, %v5552_v19  ;;  %v3952_v62 = vmul.f32 %v5552_v19, %v3889_v55 }
0x6f58   :  { %v4591_v43 = vadd.f32 -1.0, %v3950_v12 }
0x6f5a   :  { %3954 = vrot.lane.b32.xlu0 %v4591_v43, %s5604_s7 }
0x6fcc   :  { %v3955_v33 = vpop.permute.xlu0 %3954 }
0x6fcd   :  { %v3957_v36 = vmul.f32 %v5552_v19, %v3955_v33 }
0x6fcf   :  { %3959 = vrot.lane.b32.xlu1 %v3957_v36, %s5609_s24 }
0x7041   :  { %v3960_v51 = vpop.permute.xlu1 %3959 }
0x7042   :  { %v3962_v21 = vadd.f32 %v3960_v51, %v3952_v62 }
0x7044   :  { %5553 = vtanh.f32 %v3962_v21 }
0x704e   :  { %v5554_v24 = vpop.eup %5553 }
0x704f   :  { %3965 = vrot.lane.b32.xlu0 %v5554_v24, %s5604_s7 }
0x70c1   :  { %v3966_v30 = vpop.permute.xlu0 %3965 }
0x70c2   :  { %v6605_v26 = vmul.f32 %v5552_v19, %v3966_v30 }
0x70c4   :  { %v3969_v39 = vpack.c.bf16 %v6605_v26, %v6605_v26 }
0x70c6   :  { %3971 = vrot.lane.b32.xlu1 %v3969_v39, %s5609_s24 }
0x7138   :  { %v3972_v22 = vpop.permute.xlu1 %3971 }
0x7139   :  { %5219 = vmatmul.mubr.msk.bf16.vlgmr.msra.gmra.mrb[108].mxu1 %vm73_vm1, %v3972_v22 }
0x713a   :  { %5231 = vmatpush3.bf16.msra.mxu1 %v6496_v48  ;;  %5234 = vmatprep.mubr.msk.bf16.mxu1 %vm5607_vm0, %v5606_v0 }
0x713b   :  { %5232 = vmatprep.subr.bf16.mxu1 %v5606_v0 }
0x713e   :  { %5233 = vmatpush3.bf16.msra.mxu1 %v6500_v32 }
0x720c   :  { %v4010_v27 = vpop.f32.mrb[108].mxu1 }
0x720d   :  { %v4016_v14 = vadd.f32 %v4010_v27, %v3653_v11  ;;  %v5220_v13 = vpop.f32.mrb[109].mxu1 }
0x720e   :  { %v4013_v2 = vpop.f32.mrb[110].mxu1 }
0x720f   :  { %v4593_v37 = vmul.f32 -1.442695, %v4016_v14  ;;  %v5221_v38 = vpop.f32.mrb[111].mxu1 }
0x7211   :  { %5555 = vpow2.f32 %v4593_v37 }
0x721b   :  { %v5556_v61 = vpop.eup %5555 }
0x721c   :  { %v4020_v23 = vadd.f32 1.0, %v5556_v61 }
0x721e   :  { %5557 = vrcp.f32 %v4020_v23  ;;  %v3664_v23 = vadd.f32 %v6579_v35, %v6524_v7  ;;  %v4261_v7 = vpack.c.bf16 %v6560_v8, %v6535_v59  ;;  %v5289_v35 = vld [vmem:[%s6701_s4] sm:$0xff]  }
0x721f   :  { %5246 = vmatprep.subr.bf16.mxu1 %v5289_v35 }
0x7228   :  { %v5558_v58 = vpop.eup %5557 }
0x7229   :  { %v4023_v45 = vmul.f32 2.0, %v5558_v58  ;;  %v4025_v18 = vmul.f32 %v5558_v58, %v3962_v21 }
0x722b   :  { %v4594_v3 = vadd.f32 -1.0, %v4023_v45 }
0x722d   :  { %4027 = vrot.lane.b32.xlu0 %v4594_v3, %s5604_s7 }
0x729f   :  { %v4028_v54 = vpop.permute.xlu0 %4027 }
0x72a0   :  { %v4030_v6 = vmul.f32 %v5558_v58, %v4028_v54 }
0x72a2   :  { %4032 = vrot.lane.b32.xlu1 %v4030_v6, %s5609_s24 }
0x7314   :  { %v4033_v4 = vpop.permute.xlu1 %4032 }
0x7315   :  { %v4035_v15 = vadd.f32 %v4033_v4, %v4025_v18 }
0x7317   :  { %5559 = vtanh.f32 %v4035_v15 }
0x7321   :  { %v5560_v42 = vpop.eup %5559 }
0x7322   :  { %4038 = vrot.lane.b32.xlu0 %v5560_v42, %s5604_s7 }
0x7394   :  { %v4039_v44 = vpop.permute.xlu0 %4038 }
0x7395   :  { %v6621_v46 = vmul.f32 %v5558_v58, %v4039_v44 }
0x7397   :  { %v4042_v49 = vpack.c.bf16 %v6621_v46, %v6621_v46 }
0x7399   :  { %4044 = vrot.lane.b32.xlu1 %v4042_v49, %s5609_s24 }
0x740b   :  { %v4045_v50 = vpop.permute.xlu1 %4044 }
0x740c   :  { %5227 = vmatmul.mubr.msk.bf16.vlgmr.msra.gmra.mrb[112].mxu0 %vm73_vm1, %v4045_v50 }
0x740d   :  { %5239 = vmatpush3.bf16.msra.mxu0 %v6496_v48  ;;  %5242 = vmatprep.mubr.msk.bf16.mxu0 %vm5607_vm0, %v5606_v0 }
0x740e   :  { %5240 = vmatprep.subr.bf16.mxu0 %v5606_v0 }
0x7411   :  { %5241 = vmatpush3.bf16.msra.mxu0 %v6500_v32 }
0x74df   :  { %v4083_v25 = vpop.f32.mrb[112].mxu0 }
0x74e0   :  { %v4089_v53 = vadd.f32 %v4083_v25, %v3656_v52  ;;  %v5228_v31 = vpop.f32.mrb[113].mxu0 }
0x74e1   :  { %v4086_v1 = vpop.f32.mrb[114].mxu0  ;;  %v5290_v31 = vld [vmem:[%s6701_s4 + $0x8] sm:$0xff]  }
0x74e2   :  { %v4596_v55 = vmul.f32 -1.442695, %v4089_v53  ;;  %v5229_v9 = vpop.f32.mrb[115].mxu0 }
0x74e4   :  { %5561 = vpow2.f32 %v4596_v55 }
0x74ee   :  { %v5562_v5 = vpop.eup %5561 }
0x74ef   :  { %v4093_v29 = vadd.f32 1.0, %v5562_v5 }
0x74f1   :  { %5563 = vrcp.f32 %v4093_v29 }
0x74fb   :  { %v5564_v48 = vpop.eup %5563 }
0x74fc   :  { %v4096_v41 = vmul.f32 2.0, %v5564_v48  ;;  %v4098_v40 = vmul.f32 %v5564_v48, %v4035_v15 }
0x74fe   :  { %v4597_v56 = vadd.f32 -1.0, %v4096_v41 }
0x7500   :  { %4100 = vrot.lane.b32.xlu0 %v4597_v56, %s5604_s7 }
0x7572   :  { %v4101_v0 = vpop.permute.xlu0 %4100 }
0x7573   :  { %v4103_v32 = vmul.f32 %v5564_v48, %v4101_v0 }
0x7575   :  { %4105 = vrot.lane.b32.xlu1 %v4103_v32, %s5609_s24 }
0x75e7   :  { %v4106_v60 = vpop.permute.xlu1 %4105 }
0x75e8   :  { %v4108_v63 = vadd.f32 %v4106_v60, %v4098_v40 }
0x75ea   :  { %5565 = vtanh.f32 %v4108_v63 }
0x75f4   :  { %v5566_v47 = vpop.eup %5565 }
0x75f5   :  { %4111 = vrot.lane.b32.xlu0 %v5566_v47, %s5604_s7 }
0x7667   :  { %v4112_v34 = vpop.permute.xlu0 %4111 }
0x7668   :  { %v4114_v10 = vmul.f32 %v5564_v48, %v4112_v34 }
0x766a   :  { %v4115_v16 = vpack.c.bf16 %v4114_v10, %v4114_v10  ;;  %v4263_v25 = vpack.c.bf16 %v4114_v10, %v6621_v46  ;;  %v4262_v46 = vpack.c.bf16 %v6605_v26, %v6588_v57  ;;  %v4604_v57 = vld [vmem:[%s6702_s5] ss:$0 sm:$0xff] }
0x766c   :  { %4117 = vrot.lane.b32.xlu1 %v4115_v16, %s5609_s24 }
0x76de   :  { %v4118_v17 = vpop.permute.xlu1 %4117 }
0x76df   :  { %5235 = vmatmul.mubr.msk.bf16.vlgmr.msra.gmra.mrb[112].mxu1 %vm73_vm1, %v4118_v17 }
0x76e0   :  { %5247 = vmatpush3.bf16.msra.mxu1 %v5289_v35 }
0x76e1   :  { %5248 = vmatprep.subr.bf16.mxu1 %v5290_v31 }
0x76e4   :  { %5249 = vmatpush3.bf16.msra.mxu1 %v5290_v31 }
0x77b2   :  { %v4156_v19 = vpop.f32.mrb[112].mxu1 }
0x77b3   :  { %v4162_v12 = vadd.f32 %v4156_v19, %v3661_v28  ;;  %v5236_v43 = vpop.f32.mrb[113].mxu1 }
0x77b4   :  { %v4159_v33 = vpop.f32.mrb[114].mxu1 }
0x77b5   :  { %v4599_v36 = vmul.f32 -1.442695, %v4162_v12  ;;  %v5237_v62 = vpop.f32.mrb[115].mxu1 }
0x77b7   :  { %5567 = vpow2.f32 %v4599_v36 }
0x77c1   :  { %v5568_v51 = vpop.eup %5567 }
0x77c2   :  { %v4166_v21 = vadd.f32 1.0, %v5568_v51 }
0x77c4   :  { %5569 = vrcp.f32 %v4166_v21 }
0x77ce   :  { %v5570_v24 = vpop.eup %5569 }
0x77cf   :  { %v4169_v30 = vmul.f32 2.0, %v5570_v24  ;;  %v4171_v20 = vmul.f32 %v5570_v24, %v4108_v63 }
0x77d1   :  { %v4600_v39 = vadd.f32 -1.0, %v4169_v30 }
0x77d3   :  { %4173 = vrot.lane.b32.xlu0 %v4600_v39, %s5604_s7 }
0x7845   :  { %v4174_v22 = vpop.permute.xlu0 %4173 }
0x7846   :  { %v4176_v11 = vmul.f32 %v5570_v24, %v4174_v22 }
0x7848   :  { %4178 = vrot.lane.b32.xlu1 %v4176_v11, %s5609_s24 }
0x78ba   :  { %v4179_v27 = vpop.permute.xlu1 %4178 }
0x78bb   :  { %v4181_v14 = vadd.f32 %v4179_v27, %v4171_v20 }
0x78bd   :  { %5571 = vtanh.f32 %v4181_v14 }
0x78c7   :  { %v5572_v13 = vpop.eup %5571 }
0x78c8   :  { %4184 = vrot.lane.b32.xlu0 %v5572_v13, %s5604_s7 }
0x793a   :  { %v4185_v2 = vpop.permute.xlu0 %4184 }
0x793b   :  { %v4187_v37 = vmul.f32 %v5570_v24, %v4185_v2 }
0x793d   :  { %v4188_v38 = vpack.c.bf16 %v4187_v37, %v4187_v37 }
0x793f   :  { %4190 = vrot.lane.b32.xlu1 %v4188_v38, %s5609_s24 }
0x79b1   :  { %v4191_v61 = vpop.permute.xlu1 %4190 }
0x79b2   :  { %5243 = vmatmul.mubr.msk.bf16.vlgmr.msra.gmra.mrb[116].mxu0 %vm73_vm1, %v4191_v61 }
0x7a85   :  { %v4229_v58 = vpop.f32.mrb[116].mxu0 }
0x7a86   :  { %v4235_v45 = vadd.f32 %v4229_v58, %v3664_v23  ;;  %v5244_v3 = vpop.f32.mrb[117].mxu0 }
0x7a87   :  { %v4232_v54 = vpop.f32.mrb[118].mxu0 }
0x7a88   :  { %v4602_v6 = vmul.f32 -1.442695, %v4235_v45  ;;  %v5245_v18 = vpop.f32.mrb[119].mxu0 }
0x7a8a   :  { %5573 = vpow2.f32 %v4602_v6 }
0x7a94   :  { %v5574_v4 = vpop.eup %5573 }
0x7a95   :  { %v4239_v15 = vadd.f32 1.0, %v5574_v4 }
0x7a97   :  { %5575 = vrcp.f32 %v4239_v15 }
0x7aa1   :  { %v5576_v42 = vpop.eup %5575 }
0x7aa2   :  { %v4242_v44 = vmul.f32 2.0, %v5576_v42  ;;  %v4244_v53 = vmul.f32 %v5576_v42, %v4181_v14 }
0x7aa4   :  { %v4603_v49 = vadd.f32 -1.0, %v4242_v44 }
0x7aa6   :  { %4246 = vrot.lane.b32.xlu0 %v4603_v49, %s5604_s7 }
0x7b18   :  { %v4247_v50 = vpop.permute.xlu0 %4246 }
0x7b19   :  { %v4249_v52 = vmul.f32 %v5576_v42, %v4247_v50 }
0x7b1b   :  { %4251 = vrot.lane.b32.xlu1 %v4249_v52, %s5609_s24 }
0x7b1f   :  { %4280 = vrot.lane.b32.xlu1 %v4261_v7, %s5609_s24 }
0x7b23   :  { %4284 = vrot.lane.b32.xlu1 %v4263_v25, %s5609_s24 }
0x7b8d   :  { %v4252_v1 = vpop.permute.xlu1 %4251 }
0x7b8e   :  { %v4254_v55 = vadd.f32 %v4252_v1, %v4244_v53 }
0x7b90   :  { %5577 = vtanh.f32 %v4254_v55 }
0x7b91   :  { %v4281_v59 = vpop.permute.xlu1 %4280 }
0x7b92   :  { %5250 = vmatprep.mubr.msk.bf16.mxu1 %vm73_vm1, %v4281_v59 }
0x7b95   :  { %v4285_v41 = vpop.permute.xlu1 %4284 }
0x7b9a   :  { %v5578_v8 = vpop.eup %5577 }
0x7b9b   :  { %4257 = vrot.lane.b32.xlu0 %v5578_v8, %s5604_s7 }
0x7b9f   :  { %4282 = vrot.lane.b32.xlu0 %v4262_v46, %s5609_s24 }
0x7c0d   :  { %v4258_v9 = vpop.permute.xlu0 %4257 }
0x7c0e   :  { %v4260_v5 = vmul.f32 %v5576_v42, %v4258_v9 }
0x7c10   :  { %v4264_v29 = vpack.c.bf16 %v4260_v5, %v4187_v37 }
0x7c11   :  { %v4283_v48 = vpop.permute.xlu0 %4282 }
0x7c12   :  { %4286 = vrot.lane.b32.xlu0 %v4264_v29, %s5609_s24  ;;  %5251 = vmatmul.mubr.msk.bf16.vlgmr.msra.gmra.mrb[116].mxu1 %vm73_vm1, %v4283_v48 }
0x7c13   :  { %5254 = vmatprep.mubr.msk.bf16.mxu1 %vm73_vm1, %v4285_v41 }
0x7c84   :  { %v4287_v56 = vpop.permute.xlu0 %4286 }
0x7c85   :  { %5255 = vmatmul.mubr.msk.bf16.gmra.mrb[120].mxu1 %vm73_vm1, %v4287_v56 }
0x7ce5   :  { %v5252_v26 = vpop.f32.mrb[116].mxu1 }
0x7ce6   :  { %v4355_v0 = vadd.f32 %v5252_v26, %v4604_v57  ;;  %v4346_v32 = vpop.f32.mrb[117].mxu1 }
0x7ce7   :  { %v4347_v40 = vadd.f32 %v4604_v57, %v4346_v32  ;;  %v5253_v60 = vpop.f32.mrb[118].mxu1 }
0x7ce8   :  { %4379 = vst [vmem:[%s6703_s6 + $0x10] sm:$0xff] %v4355_v0  ;;  %v4358_v63 = vadd.f32 %v5253_v60, %v4604_v57  ;;  %v4349_v47 = vpop.f32.mrb[119].mxu1 }
0x7ce9   :  { %4377 = vst [vmem:[%s6703_s6] sm:$0xff] %v4347_v40  ;;  %v4350_v34 = vadd.f32 %v4604_v57, %v4349_v47 }
0x7cea   :  { %4380 = vst [vmem:[%s6703_s6 + $0x18] sm:$0xff] %v4358_v63 }
0x7ceb   :  { %4378 = vst [vmem:[%s6703_s6 + $0x8] sm:$0xff] %v4350_v34 }
0x7d58   :  { %v5256_v10 = vpop.f32.mrb[120].mxu1 }
0x7d59   :  { %v4371_v16 = vadd.f32 %v5256_v10, %v4604_v57  ;;  %v4362_v17 = vpop.f32.mrb[121].mxu1 }
0x7d5a   :  { %v4363_v28 = vadd.f32 %v4604_v57, %v4362_v17  ;;  %v5257_v19 = vpop.f32.mrb[122].mxu1 }
0x7d5b   :  { %4383 = vst [vmem:[%s6703_s6 + $0x30] sm:$0xff] %v4371_v16  ;;  %v4374_v12 = vadd.f32 %v5257_v19, %v4604_v57  ;;  %v4365_v43 = vpop.f32.mrb[123].mxu1 }
0x7d5c   :  { %4381 = vst [vmem:[%s6703_s6 + $0x20] sm:$0xff] %v4363_v28  ;;  %v4366_v33 = vadd.f32 %v4604_v57, %v4365_v43 }
0x7d5d   :  { %4384 = vst [vmem:[%s6703_s6 + $0x38] sm:$0xff] %v4374_v12 }
0x7d5e   :  { %4382 = vst [vmem:[%s6703_s6 + $0x28] sm:$0xff] %v4366_v33 }
0x7d5f   :  { %4389 = vsyncpa [#allocation3], 1 }

</bundles_post_ra>
